<compile_context>
chip_gen: v7x
topology: tpu7x:2x2x1
jax: 0.10.0
libtpu: 0.0.40
codegen_flags: <defaults>
</compile_context>

<pallas_src>
import jax
import jax.numpy as jnp
from jax.experimental import pallas as pl
from jax.experimental.pallas import tpu as pltpu

# Small, MXU-friendly shapes consistent with the module (bneck_size default = 128).
B = 2            # batch
N = 128          # points per cloud (model_inputsize shrunk from 2048 for the demo)
BNECK = 128      # bottleneck size
ENC_DIMS = (3, 64, 128, 128, 256, BNECK)
DEC_DIMS = (BNECK, 256, 256, 3 * N)
BIAS_W = 3 * N   # widest bias row (decoder output), = 384


def _siamese_kernel(pts_ref, we1_ref, we2_ref, we3_ref, we4d1_ref, we5d2_ref, wd3_ref,
                    bias_ref, out_ref):
    """Fused: X = encode(sample), Y = encode(model), Y_AE = decode(Y), Sim = cos(X, Y).

    pts_ref  : (2*B*N, 3) f32 -- rows [0, B*N) = sample points, [B*N, 2*B*N) = model points
    we*      : bf16 weight slabs, (in, out), same-shaped matrices concatenated along out axis
    bias_ref : (8, 384) f32   -- row r = layer r's bias, left-aligned, zero padded
    out_ref  : (B, 3*N + 128) f32 -- [:, :3*N] = Y_AE (flat), [:, 3*N:] = Sim (broadcast)
    """
    def dense(h, w, brow, bwidth, relu=True):
        y = jnp.dot(h.astype(jnp.bfloat16), w, preferred_element_type=jnp.float32)
        y = y + bias_ref[brow:brow + 1, :bwidth]          # f32 bias add post-accumulation
        return jnp.maximum(y, 0.0) if relu else y

    # ---- shared per-point encoder MLP over BOTH clouds at once (M = 2*B*N = 512) ----
    h = pts_ref[...]                                      # (512, 3) f32
    h = dense(h, we1_ref[...], 0, 64)                     # 3   -> 64
    h = dense(h, we2_ref[...], 1, 128)                    # 64  -> 128
    h = dense(h, we3_ref[...], 2, 128)                    # 128 -> 128
    h = dense(h, we4d1_ref[:, :256], 3, 256)              # 128 -> 256   (enc layer 4)
    h = dense(h, we5d2_ref[:, :BNECK], 4, BNECK)          # 256 -> 128   (bottleneck)

    # global max-pool over the point axis, per cloud (2*B clouds of N points each)
    pooled = jnp.max(h.reshape(2 * B, N, BNECK), axis=1)  # (2*B, BNECK)
    X = pooled[:B]                                        # encode(sample_PC)
    Y = pooled[B:]                                        # encode(model_PC)

    # ---- decoder on Y: Y_AE = AE.forward(model_PC) = decode(encode(model_PC)) ----
    g = dense(Y, we4d1_ref[:, 256:], 5, 256)              # 128 -> 256   (dec layer 1)
    g = dense(g, we5d2_ref[:, BNECK:], 6, 256)            # 256 -> 256   (dec layer 2)
    g = dense(g, wd3_ref[...], 7, 3 * N, relu=False)      # 256 -> 3*N   (dec layer 3)

    # ---- F.cosine_similarity(X, Y, dim=1), eps=1e-8 clamping each norm (torch semantics) ----
    eps = jnp.float32(1e-8)
    num = jnp.sum(X * Y, axis=1, keepdims=True)
    nx = jnp.maximum(jnp.sqrt(jnp.sum(X * X, axis=1, keepdims=True)), eps)
    ny = jnp.maximum(jnp.sqrt(jnp.sum(Y * Y, axis=1, keepdims=True)), eps)
    sim = num / (nx * ny)                                 # (B, 1)

    # lane-dense combined output: [Y_AE_flat | Sim broadcast over 128 lanes]
    out_ref[:, :3 * N] = g
    out_ref[:, 3 * N:] = jnp.broadcast_to(sim, (B, 128))


def init_params(key):
    """Deterministic synthetic parameters (shapes implied by the AE / Linear definitions)."""
    n_layers = (len(ENC_DIMS) - 1) + (len(DEC_DIMS) - 1)
    keys = jax.random.split(key, n_layers)
    enc, dec, i = [], [], 0
    for din, dout in zip(ENC_DIMS[:-1], ENC_DIMS[1:]):
        w = jax.random.normal(keys[i], (din, dout), jnp.float32) / jnp.sqrt(jnp.float32(din))
        b = jnp.full((dout,), 0.01, jnp.float32)
        enc.append((w, b)); i += 1
    for din, dout in zip(DEC_DIMS[:-1], DEC_DIMS[1:]):
        w = jax.random.normal(keys[i], (din, dout), jnp.float32) / jnp.sqrt(jnp.float32(din))
        b = jnp.full((dout,), 0.01, jnp.float32)
        dec.append((w, b)); i += 1
    return {'enc': enc, 'dec': dec}


def pack_params(params):
    """Pack 16 weight/bias arrays into 7 operands: 6 bf16 weight slabs + 1 f32 bias slab."""
    enc, dec = params['enc'], params['dec']
    bf16 = jnp.bfloat16
    we1 = enc[0][0].astype(bf16)                                          # (3, 64)
    we2 = enc[1][0].astype(bf16)                                          # (64, 128)
    we3 = enc[2][0].astype(bf16)                                          # (128, 128)
    we4d1 = jnp.concatenate([enc[3][0], dec[0][0]], axis=1).astype(bf16)  # (128, 512)
    we5d2 = jnp.concatenate([enc[4][0], dec[1][0]], axis=1).astype(bf16)  # (256, 384)
    wd3 = dec[2][0].astype(bf16)                                          # (256, 384)
    bias_rows = [b for _, b in enc] + [b for _, b in dec]
    biases = jnp.stack([jnp.pad(b, (0, BIAS_W - b.shape[0])) for b in bias_rows],
                       axis=0).astype(jnp.float32)                        # (8, 384)
    return (we1, we2, we3, we4d1, we5d2, wd3, biases)


def siamese_forward(siamese_input_info, packed_params):
    """Mirrors Model.forward for the (RCNN-enabled) branch."""
    sample_PC = siamese_input_info['sample_PC']   # (B, 3, N) NCL, like PyTorch Conv1d input
    model_PC = siamese_input_info['model_PC']     # (B, 3, N)
    target = siamese_input_info['target']

    # Glue: flatten both clouds to one point-major (2*B*N, 3) slab -> single MLP pass.
    sample_flat = jnp.transpose(sample_PC, (0, 2, 1)).reshape(B * N, 3)
    model_flat = jnp.transpose(model_PC, (0, 2, 1)).reshape(B * N, 3)
    pts = jnp.concatenate([sample_flat, model_flat], axis=0).astype(jnp.float32)

    operands = (pts,) + tuple(packed_params)
    out = pl.pallas_call(
        _siamese_kernel,
        out_shape=jax.ShapeDtypeStruct((B, 3 * N + 128), jnp.float32),
        in_specs=[pl.BlockSpec(memory_space=pltpu.MemorySpace.VMEM)
                  for _ in range(len(operands))],
        out_specs=pl.BlockSpec(memory_space=pltpu.MemorySpace.VMEM),
        cost_estimate=pl.CostEstimate(flops=93_000_000, transcendentals=0,
                                      bytes_accessed=620_000),
    )(*operands)

    Y_AE = out[:, :3 * N].reshape(B, 3, N)   # decoder output back to NCL layout
    Sim = out[:, 3 * N]                      # first lane of the broadcast Sim block
    return {'Sim': Sim, 'Y_AE': Y_AE, 'target': target, 'model_PC': model_PC}


if __name__ == "__main__":
    key = jax.random.PRNGKey(0)
    kp, ks, km = jax.random.split(key, 3)
    packed = pack_params(init_params(kp))

    sample_PC = jax.random.normal(ks, (B, 3, N), jnp.float32)
    model_PC = jax.random.normal(km, (B, 3, N), jnp.float32)
    target = jnp.zeros((B,), jnp.float32)

    out = siamese_forward(
        {'sample_PC': sample_PC, 'model_PC': model_PC, 'target': target}, packed)
    jax.block_until_ready(out)

    assert out['Sim'].shape == (B,)
    assert out['Y_AE'].shape == (B, 3, N)
    print("KERNEL_OK")
</pallas_src>

<mosaic_0001>
module attributes {stable_mosaic.version = 11 : i64} {
  func.func @_siamese_kernel(%arg0: memref<512x3xf32, #tpu.memory_space<vmem>>, %arg1: memref<3x64xbf16, #tpu.memory_space<vmem>>, %arg2: memref<64x128xbf16, #tpu.memory_space<vmem>>, %arg3: memref<128x128xbf16, #tpu.memory_space<vmem>>, %arg4: memref<128x512xbf16, #tpu.memory_space<vmem>>, %arg5: memref<256x384xbf16, #tpu.memory_space<vmem>>, %arg6: memref<256x384xbf16, #tpu.memory_space<vmem>>, %arg7: memref<8x384xf32, #tpu.memory_space<vmem>>, %arg8: memref<2x512xf32, #tpu.memory_space<vmem>>) attributes {dimension_semantics = [], scalar_prefetch = 0 : i64, scratch_operands = 0 : i64, tpu.core_type = #tpu.core_type<tc>} {
    %c0 = arith.constant 0 : index
    %c0_0 = arith.constant 0 : index
    %0 = vector.load %arg0[%c0, %c0_0] : memref<512x3xf32, #tpu.memory_space<vmem>>, vector<512x3xf32>
    %c0_1 = arith.constant 0 : index
    %c0_2 = arith.constant 0 : index
    %1 = vector.load %arg1[%c0_1, %c0_2] : memref<3x64xbf16, #tpu.memory_space<vmem>>, vector<3x64xbf16>
    %2 = arith.truncf %0 : vector<512x3xf32> to vector<512x3xbf16>
    %cst = arith.constant dense<0.000000e+00> : vector<512x64xf32>
    %3 = tpu.matmul %2, %1, %cst {dimension_numbers = #tpu.dot_dimension_numbers<[1], [0], [0], [1], [0, 0, 1, 1], [], []>} : vector<512x3xbf16>, vector<3x64xbf16>, vector<512x64xf32> -> vector<512x64xf32>
    %c0_3 = arith.constant 0 : index
    %c0_4 = arith.constant 0 : index
    %4 = vector.load %arg7[%c0_3, %c0_4] : memref<8x384xf32, #tpu.memory_space<vmem>>, vector<1x64xf32>
    %5 = vector.broadcast %4 : vector<1x64xf32> to vector<512x64xf32>
    %6 = arith.addf %3, %5 : vector<512x64xf32>
    %cst_5 = arith.constant 0.000000e+00 : f32
    %7 = vector.broadcast %cst_5 : f32 to vector<512x64xf32>
    %8 = arith.maximumf %6, %7 : vector<512x64xf32>
    %c0_6 = arith.constant 0 : index
    %c0_7 = arith.constant 0 : index
    %9 = vector.load %arg2[%c0_6, %c0_7] : memref<64x128xbf16, #tpu.memory_space<vmem>>, vector<64x128xbf16>
    %10 = arith.truncf %8 : vector<512x64xf32> to vector<512x64xbf16>
    %cst_8 = arith.constant dense<0.000000e+00> : vector<512x128xf32>
    %11 = tpu.matmul %10, %9, %cst_8 {dimension_numbers = #tpu.dot_dimension_numbers<[1], [0], [0], [1], [0, 0, 1, 1], [], []>} : vector<512x64xbf16>, vector<64x128xbf16>, vector<512x128xf32> -> vector<512x128xf32>
    %c1 = arith.constant 1 : index
    %c0_9 = arith.constant 0 : index
    %12 = vector.load %arg7[%c1, %c0_9] : memref<8x384xf32, #tpu.memory_space<vmem>>, vector<1x128xf32>
    %13 = vector.broadcast %12 : vector<1x128xf32> to vector<512x128xf32>
    %14 = arith.addf %11, %13 : vector<512x128xf32>
    %cst_10 = arith.constant 0.000000e+00 : f32
    %15 = vector.broadcast %cst_10 : f32 to vector<512x128xf32>
    %16 = arith.maximumf %14, %15 : vector<512x128xf32>
    %c0_11 = arith.constant 0 : index
    %c0_12 = arith.constant 0 : index
    %17 = vector.load %arg3[%c0_11, %c0_12] : memref<128x128xbf16, #tpu.memory_space<vmem>>, vector<128x128xbf16>
    %18 = arith.truncf %16 : vector<512x128xf32> to vector<512x128xbf16>
    %cst_13 = arith.constant dense<0.000000e+00> : vector<512x128xf32>
    %19 = tpu.matmul %18, %17, %cst_13 {dimension_numbers = #tpu.dot_dimension_numbers<[1], [0], [0], [1], [0, 0, 1, 1], [], []>} : vector<512x128xbf16>, vector<128x128xbf16>, vector<512x128xf32> -> vector<512x128xf32>
    %c2 = arith.constant 2 : index
    %c0_14 = arith.constant 0 : index
    %20 = vector.load %arg7[%c2, %c0_14] : memref<8x384xf32, #tpu.memory_space<vmem>>, vector<1x128xf32>
    %21 = vector.broadcast %20 : vector<1x128xf32> to vector<512x128xf32>
    %22 = arith.addf %19, %21 : vector<512x128xf32>
    %cst_15 = arith.constant 0.000000e+00 : f32
    %23 = vector.broadcast %cst_15 : f32 to vector<512x128xf32>
    %24 = arith.maximumf %22, %23 : vector<512x128xf32>
    %c0_16 = arith.constant 0 : index
    %c0_17 = arith.constant 0 : index
    %25 = vector.load %arg4[%c0_16, %c0_17] : memref<128x512xbf16, #tpu.memory_space<vmem>>, vector<128x256xbf16>
    %26 = arith.truncf %24 : vector<512x128xf32> to vector<512x128xbf16>
    %cst_18 = arith.constant dense<0.000000e+00> : vector<512x256xf32>
    %27 = tpu.matmul %26, %25, %cst_18 {dimension_numbers = #tpu.dot_dimension_numbers<[1], [0], [0], [1], [0, 0, 1, 1], [], []>} : vector<512x128xbf16>, vector<128x256xbf16>, vector<512x256xf32> -> vector<512x256xf32>
    %c3 = arith.constant 3 : index
    %c0_19 = arith.constant 0 : index
    %28 = vector.load %arg7[%c3, %c0_19] : memref<8x384xf32, #tpu.memory_space<vmem>>, vector<1x256xf32>
    %29 = vector.broadcast %28 : vector<1x256xf32> to vector<512x256xf32>
    %30 = arith.addf %27, %29 : vector<512x256xf32>
    %cst_20 = arith.constant 0.000000e+00 : f32
    %31 = vector.broadcast %cst_20 : f32 to vector<512x256xf32>
    %32 = arith.maximumf %30, %31 : vector<512x256xf32>
    %c0_21 = arith.constant 0 : index
    %c0_22 = arith.constant 0 : index
    %33 = vector.load %arg5[%c0_21, %c0_22] : memref<256x384xbf16, #tpu.memory_space<vmem>>, vector<256x128xbf16>
    %34 = arith.truncf %32 : vector<512x256xf32> to vector<512x256xbf16>
    %cst_23 = arith.constant dense<0.000000e+00> : vector<512x128xf32>
    %35 = tpu.matmul %34, %33, %cst_23 {dimension_numbers = #tpu.dot_dimension_numbers<[1], [0], [0], [1], [0, 0, 1, 1], [], []>} : vector<512x256xbf16>, vector<256x128xbf16>, vector<512x128xf32> -> vector<512x128xf32>
    %c4 = arith.constant 4 : index
    %c0_24 = arith.constant 0 : index
    %36 = vector.load %arg7[%c4, %c0_24] : memref<8x384xf32, #tpu.memory_space<vmem>>, vector<1x128xf32>
    %37 = vector.broadcast %36 : vector<1x128xf32> to vector<512x128xf32>
    %38 = arith.addf %35, %37 : vector<512x128xf32>
    %cst_25 = arith.constant 0.000000e+00 : f32
    %39 = vector.broadcast %cst_25 : f32 to vector<512x128xf32>
    %40 = arith.maximumf %38, %39 : vector<512x128xf32>
    %41 = vector.shape_cast %40 : vector<512x128xf32> to vector<4x128x128xf32>
    %cst_26 = arith.constant dense<0xFF800000> : vector<4x128xf32>
    %42 = vector.multi_reduction <maximumf>, %41, %cst_26 [1] : vector<4x128x128xf32> to vector<4x128xf32>
    %43 = vector.extract_strided_slice %42 {offsets = [0, 0], sizes = [2, 128], strides = [1, 1]} : vector<4x128xf32> to vector<2x128xf32>
    %44 = vector.extract_strided_slice %42 {offsets = [2, 0], sizes = [2, 128], strides = [1, 1]} : vector<4x128xf32> to vector<2x128xf32>
    %c0_27 = arith.constant 0 : index
    %c256 = arith.constant 256 : index
    %45 = vector.load %arg4[%c0_27, %c256] : memref<128x512xbf16, #tpu.memory_space<vmem>>, vector<128x256xbf16>
    %46 = arith.truncf %44 : vector<2x128xf32> to vector<2x128xbf16>
    %cst_28 = arith.constant dense<0.000000e+00> : vector<2x256xf32>
    %47 = tpu.matmul %46, %45, %cst_28 {dimension_numbers = #tpu.dot_dimension_numbers<[1], [0], [0], [1], [0, 0, 1, 1], [], []>} : vector<2x128xbf16>, vector<128x256xbf16>, vector<2x256xf32> -> vector<2x256xf32>
    %c5 = arith.constant 5 : index
    %c0_29 = arith.constant 0 : index
    %48 = vector.load %arg7[%c5, %c0_29] : memref<8x384xf32, #tpu.memory_space<vmem>>, vector<1x256xf32>
    %49 = vector.broadcast %48 : vector<1x256xf32> to vector<2x256xf32>
    %50 = arith.addf %47, %49 : vector<2x256xf32>
    %cst_30 = arith.constant 0.000000e+00 : f32
    %51 = vector.broadcast %cst_30 : f32 to vector<2x256xf32>
    %52 = arith.maximumf %50, %51 : vector<2x256xf32>
    %c0_31 = arith.constant 0 : index
    %c128 = arith.constant 128 : index
    %53 = vector.load %arg5[%c0_31, %c128] : memref<256x384xbf16, #tpu.memory_space<vmem>>, vector<256x256xbf16>
    %54 = arith.truncf %52 : vector<2x256xf32> to vector<2x256xbf16>
    %cst_32 = arith.constant dense<0.000000e+00> : vector<2x256xf32>
    %55 = tpu.matmul %54, %53, %cst_32 {dimension_numbers = #tpu.dot_dimension_numbers<[1], [0], [0], [1], [0, 0, 1, 1], [], []>} : vector<2x256xbf16>, vector<256x256xbf16>, vector<2x256xf32> -> vector<2x256xf32>
    %c6 = arith.constant 6 : index
    %c0_33 = arith.constant 0 : index
    %56 = vector.load %arg7[%c6, %c0_33] : memref<8x384xf32, #tpu.memory_space<vmem>>, vector<1x256xf32>
    %57 = vector.broadcast %56 : vector<1x256xf32> to vector<2x256xf32>
    %58 = arith.addf %55, %57 : vector<2x256xf32>
    %cst_34 = arith.constant 0.000000e+00 : f32
    %59 = vector.broadcast %cst_34 : f32 to vector<2x256xf32>
    %60 = arith.maximumf %58, %59 : vector<2x256xf32>
    %c0_35 = arith.constant 0 : index
    %c0_36 = arith.constant 0 : index
    %61 = vector.load %arg6[%c0_35, %c0_36] : memref<256x384xbf16, #tpu.memory_space<vmem>>, vector<256x384xbf16>
    %62 = arith.truncf %60 : vector<2x256xf32> to vector<2x256xbf16>
    %cst_37 = arith.constant dense<0.000000e+00> : vector<2x384xf32>
    %63 = tpu.matmul %62, %61, %cst_37 {dimension_numbers = #tpu.dot_dimension_numbers<[1], [0], [0], [1], [0, 0, 1, 1], [], []>} : vector<2x256xbf16>, vector<256x384xbf16>, vector<2x384xf32> -> vector<2x384xf32>
    %c7 = arith.constant 7 : index
    %c0_38 = arith.constant 0 : index
    %64 = vector.load %arg7[%c7, %c0_38] : memref<8x384xf32, #tpu.memory_space<vmem>>, vector<1x384xf32>
    %65 = vector.broadcast %64 : vector<1x384xf32> to vector<2x384xf32>
    %66 = arith.addf %63, %65 : vector<2x384xf32>
    %67 = arith.mulf %43, %44 : vector<2x128xf32>
    %cst_39 = arith.constant dense<0.000000e+00> : vector<2xf32>
    %68 = vector.multi_reduction <add>, %67, %cst_39 [1] : vector<2x128xf32> to vector<2xf32>
    %69 = vector.shape_cast %68 : vector<2xf32> to vector<2x1xf32>
    %70 = arith.mulf %43, %43 : vector<2x128xf32>
    %cst_40 = arith.constant dense<0.000000e+00> : vector<2xf32>
    %71 = vector.multi_reduction <add>, %70, %cst_40 [1] : vector<2x128xf32> to vector<2xf32>
    %72 = vector.shape_cast %71 : vector<2xf32> to vector<2x1xf32>
    %73 = math.sqrt %72 : vector<2x1xf32>
    %cst_41 = arith.constant 9.99999993E-9 : f32
    %74 = vector.broadcast %cst_41 : f32 to vector<2x1xf32>
    %75 = arith.maximumf %73, %74 : vector<2x1xf32>
    %76 = arith.mulf %44, %44 : vector<2x128xf32>
    %cst_42 = arith.constant dense<0.000000e+00> : vector<2xf32>
    %77 = vector.multi_reduction <add>, %76, %cst_42 [1] : vector<2x128xf32> to vector<2xf32>
    %78 = vector.shape_cast %77 : vector<2xf32> to vector<2x1xf32>
    %79 = math.sqrt %78 : vector<2x1xf32>
    %cst_43 = arith.constant 9.99999993E-9 : f32
    %80 = vector.broadcast %cst_43 : f32 to vector<2x1xf32>
    %81 = arith.maximumf %79, %80 : vector<2x1xf32>
    %82 = arith.mulf %75, %81 : vector<2x1xf32>
    %83 = arith.divf %69, %82 : vector<2x1xf32>
    %c0_44 = arith.constant 0 : index
    %c0_45 = arith.constant 0 : index
    %84 = vector.load %arg8[%c0_44, %c0_45] : memref<2x512xf32, #tpu.memory_space<vmem>>, vector<2x384xf32>
    tpu.vector_store %arg8[%c0_44, %c0_45], %66 {strides = array<i32>} : memref<2x512xf32, #tpu.memory_space<vmem>>, vector<2x384xf32>,
    %85 = vector.shape_cast %83 : vector<2x1xf32> to vector<2x1xf32>
    %86 = vector.broadcast %85 : vector<2x1xf32> to vector<2x128xf32>
    %c0_46 = arith.constant 0 : index
    %c384 = arith.constant 384 : index
    %87 = vector.load %arg8[%c0_46, %c384] : memref<2x512xf32, #tpu.memory_space<vmem>>, vector<2x128xf32>
    tpu.vector_store %arg8[%c0_46, %c384], %86 {strides = array<i32>} : memref<2x512xf32, #tpu.memory_space<vmem>>, vector<2x128xf32>,
    return
  }
}

</mosaic_0001>

<bundles_post_ra>
// kernel: tpu_custom_call.1
= control target key start
LH: loop header
LB: loop body
LE: loop exit
PB: predicated region body
PF: predicated region fallthrough
CT: control target
= control target key end

     0   :  { %13 = vsyncpa [#allocation3], 0  ;;  %s5710_s0 = inlined_call_operand.vmem [shape: f32[512,3], index: 0, kind: input, shape index: {}]   ;;  %s5711_s1 = inlined_call_operand.vmem [shape: bf16[3,64], index: 1, kind: input, shape index: {}]   ;;  %s5712_s2 = inlined_call_operand.vmem [shape: bf16[64,128], index: 2, kind: input, shape index: {}]   ;;  %s5713_s3 = inlined_call_operand.vmem [shape: bf16[128,128], index: 3, kind: input, shape index: {}]   ;;  %s5714_s4 = inlined_call_operand.hbm [shape: bf16[128,512], index: 4, kind: input, shape index: {}]   ;;  %s5715_s5 = inlined_call_operand.vmem [shape: bf16[256,384], index: 5, kind: input, shape index: {}]   ;;  %s5716_s6 = inlined_call_operand.hbm [shape: bf16[256,384], index: 6, kind: input, shape index: {}]   ;;  %s5717_s7 = inlined_call_operand.vmem [shape: f32[8,384], index: 7, kind: input, shape index: {}]   ;;  %s5718_s8 = inlined_call_operand.hbm [shape: f32[2,512], index: 8, kind: output, shape index: {}]  }
   0x1   :  { %14 = vsyncpa [#allocation6], 0 }
   0x2   :  { %15 = vsyncpa [#allocation4], 0  ;;  %s4583_s27 = smov [#allocation2]   ;;  %s4511_s9 = scalar_lea.hbm %s5714_s4, 4096 }
   0x3   :  { %s29_s28 = sshll.u32 %s4583_s27, 4  ;;  %p4512_p0 = scmp.ne.s32.totalorder %s5714_s4, %s4511_s9  ;;  %s30_s28 = int_to_ptr.vmem [resolvable:$true] %s29_s28 }
   0x4   :  { %p4515_p1 = scmp.lt.u32.totalorder %s4511_s9, %s5714_s4 }
   0x6   :  { %p4517_p2 = pnand %p4515_p1, %p4512_p0 }
   0x8   :  { %4520 = shalt.err (!%p4517_p2)
}
   0x9   :  { %s4521_s14 = scalar_lea.vmem %s30_s28, 4096  ;;  %p4526_p4 = scmp.lt.s32.totalorder %s30_s28, %s30_s28 }
   0xa   :  { %p4522_p3 = scmp.ne.s32.totalorder %s30_s28, %s4521_s14  ;;  %p4527_p5 = scmp.lt.s32.totalorder %s4521_s14, %s4521_s14 }
   0xc   :  { %p4528_p6 = por %p4527_p5, %p4526_p4 }
   0xe   :  { %p4529_p7 = pnand %p4528_p6, %p4522_p3 }
  0x10   :  { %4532 = shalt.err (!%p4529_p7)
}
  0x11   :  { %s4584_s15 = smov 256   ;;  %s4585_s16 = smov 16  }
  0x12   :  { %35 = dma.hbm_to_vmem [thread:$0]  %s5714_s4, 4096, %s30_s28, [#allocation3], %s4584_s15, %s4584_s15, %s4585_s16  }
  0x13   :  { %s4586_s19 = smov [#allocation5]   ;;  %s4533_s23 = scalar_lea.hbm %s5716_s6, 6144 }
  0x14   :  { %s43_s20 = sshll.u32 %s4586_s19, 4  ;;  %p4534_p8 = scmp.ne.s32.totalorder %s5716_s6, %s4533_s23  ;;  %s44_s20 = int_to_ptr.vmem [resolvable:$true] %s43_s20 }
  0x15   :  { %p4537_p9 = scmp.lt.u32.totalorder %s4533_s23, %s5716_s6 }
  0x17   :  { %p4539_p10 = pnand %p4537_p9, %p4534_p8 }
  0x19   :  { %4542 = shalt.err (!%p4539_p10)
}
  0x1a   :  { %s4543_s29 = scalar_lea.vmem %s44_s20, 6144  ;;  %p4548_p12 = scmp.lt.s32.totalorder %s44_s20, %s44_s20 }
  0x1b   :  { %p4544_p11 = scmp.ne.s32.totalorder %s44_s20, %s4543_s29  ;;  %p4549_p13 = scmp.lt.s32.totalorder %s4543_s29, %s4543_s29 }
  0x1d   :  { %p4550_p0 = por %p4549_p13, %p4548_p12 }
  0x1f   :  { %p4551_p1 = pnand %p4550_p0, %p4544_p11 }
  0x21   :  { %4554 = shalt.err (!%p4551_p1)
}
  0x22   :  { %s4587_s4 = smov 192   ;;  %s4588_s28 = smov 12  }
  0x23   :  { %49 = dma.hbm_to_vmem [thread:$0]  %s5716_s6, 6144, %s44_s20, [#allocation6], %s4587_s4, %s4587_s4, %s4588_s28  }
  0x24   :  { %4577 = dma.done.wait [#allocation3], 4096  }
  0x25   :  { %4578 = vsyncadd [#allocation3], 4294963200 }
  0x26   :  { %4579 = dma.done.wait [#allocation6], 6144  }
  0x27   :  { %4580 = vsyncadd [#allocation6], 4294961152  ;;  %vm254_vm0 = vcmask 1040384   ;;  %vm255_vm1 = vcmask 1041408   ;;  %v4589_v0 = vmov 65535   ;;  %v59_v4 = vld [vmem:[%s5710_s0] sm:$0xff] }
  0x28   :  { %v256_v1 = vsel %vm254_vm0, 4294967295, %v4589_v0  ;;  %v123_v3 = vld [vmem:[%s5711_s1] sm:$0x3]  ;;  %v60_v5 = vld [vmem:[%s5710_s0 + $0x8] sm:$0xff]  ;;  %vm157_vm2 = vcmask 23552   ;;  %v61_v8 = vld [vmem:[%s5710_s0 + $0x10] sm:$0xff] }
  0x29   :  { %v257_v2 = vsel %vm255_vm1, %v256_v1, 0  ;;  %v124_v7 = vpack.c.bf16 %v60_v5, %v59_v4  ;;  %v62_v9 = vld [vmem:[%s5710_s0 + $0x18] sm:$0xff]  ;;  %v63_v10 = vld [vmem:[%s5710_s0 + $0x20] sm:$0xff]  ;;  %v64_v11 = vld [vmem:[%s5710_s0 + $0x28] sm:$0xff]  ;;  %vm679_vm3 = vcmask 523264   ;;  %vm2866_vm4 = vcmask 1041409  }
  0x2a   :  { %v259_v6 = vand.u32 %v257_v2, %v123_v3  ;;  %v125_v12 = vpack.c.bf16 %v62_v9, %v61_v8  ;;  %v126_v13 = vpack.c.bf16 %v64_v11, %v63_v10  ;;  %v65_v14 = vld [vmem:[%s5710_s0 + $0x30] sm:$0xff]  ;;  %v66_v15 = vld [vmem:[%s5710_s0 + $0x38] sm:$0xff]  ;;  %v67_v16 = vld [vmem:[%s5710_s0 + $0x40] sm:$0xff] }
  0x2b   :  { %4089 = vmatprep.mubr.msk.bf16.mxu0 %vm157_vm2, %v124_v7  ;;  %v68_v17 = vld [vmem:[%s5710_s0 + $0x48] sm:$0xff]  ;;  %v127_v18 = vpack.c.bf16 %v66_v15, %v65_v14  ;;  %v69_v20 = vld [vmem:[%s5710_s0 + $0x50] sm:$0xff]  ;;  %v70_v21 = vld [vmem:[%s5710_s0 + $0x58] sm:$0xff] }
  0x2c   :  { %4087 = vmatprep.subr.bf16.mxu0 %v259_v6  ;;  %4305 = vmatprep.subr.bf16.mxu1 %v259_v6  ;;  %v128_v19 = vpack.c.bf16 %v68_v17, %v67_v16  ;;  %v71_v22 = vld [vmem:[%s5710_s0 + $0x60] sm:$0xff]  ;;  %v72_v23 = vld [vmem:[%s5710_s0 + $0x68] sm:$0xff]  ;;  %v129_v24 = vpack.c.bf16 %v70_v21, %v69_v20  ;;  %v117_v27 = vld [vmem:[%s5710_s0 + $0x1d0] sm:$0xff] }
  0x2d   :  { %4088 = vmatpush3.bf16.msra.mxu0 %v259_v6  ;;  %4306 = vmatpush3.bf16.msra.mxu1 %v259_v6  ;;  %v115_v25 = vld [vmem:[%s5710_s0 + $0x1c0] sm:$0xff]  ;;  %v116_v26 = vld [vmem:[%s5710_s0 + $0x1c8] sm:$0xff]  ;;  %v130_v28 = vpack.c.bf16 %v72_v23, %v71_v22  ;;  %v118_v30 = vld [vmem:[%s5710_s0 + $0x1d8] sm:$0xff] }
  0x2e   :  { %v152_v29 = vpack.c.bf16 %v116_v26, %v115_v25  ;;  %v119_v31 = vld [vmem:[%s5710_s0 + $0x1e0] sm:$0xff]  ;;  %v120_v32 = vld [vmem:[%s5710_s0 + $0x1e8] sm:$0xff]  ;;  %v153_v33 = vpack.c.bf16 %v118_v30, %v117_v27  ;;  %v73_v35 = vld [vmem:[%s5710_s0 + $0x70] sm:$0xff] }
  0x2f   :  { %v154_v34 = vpack.c.bf16 %v120_v32, %v119_v31  ;;  %v74_v36 = vld [vmem:[%s5710_s0 + $0x78] sm:$0xff]  ;;  %v121_v37 = vld [vmem:[%s5710_s0 + $0x1f0] sm:$0xff]  ;;  %v4317_v39 = vld [vmem:[%s5712_s2] sm:$0xff]  }
  0x30   :  { %4090 = vmatmul.mubr.msk.bf16.vlgmr.msra.gmra.mrb[0].mxu0 %vm157_vm2, %v125_v12  ;;  %4145 = vmatprep.mubr.msk.bf16.mxu1 %vm157_vm2, %v152_v29  ;;  %v122_v38 = vld [vmem:[%s5710_s0 + $0x1f8] sm:$0xff]  ;;  %v75_v40 = vld [vmem:[%s5710_s0 + $0x80] sm:$0xff]  ;;  %v76_v41 = vld [vmem:[%s5710_s0 + $0x88] sm:$0xff]  ;;  %v131_v43 = vpack.c.bf16 %v74_v36, %v73_v35 }
  0x31   :  { %4093 = vmatprep.mubr.msk.bf16.mxu0 %vm157_vm2, %v126_v13  ;;  %4146 = vmatmul.mubr.msk.bf16.vlgmr.msra.gmra.mrb[0].mxu1 %vm157_vm2, %v153_v33  ;;  %v4318_v42 = vld [vmem:[%s5712_s2 + $0x8] sm:$0xff]   ;;  %v155_v44 = vpack.c.bf16 %v122_v38, %v121_v37  ;;  %v132_v45 = vpack.c.bf16 %v76_v41, %v75_v40  ;;  %v77_v46 = vld [vmem:[%s5710_s0 + $0x90] sm:$0xff]  ;;  %v78_v47 = vld [vmem:[%s5710_s0 + $0x98] sm:$0xff] }
  0x32   :  { %4149 = vmatprep.mubr.msk.bf16.mxu1 %vm157_vm2, %v154_v34  ;;  %4153 = vmatprep.subr.bf16.mxu1 %v4317_v39  ;;  %v79_v48 = vld [vmem:[%s5710_s0 + $0xa0] sm:$0xff]  ;;  %v80_v49 = vld [vmem:[%s5710_s0 + $0xa8] sm:$0xff]  ;;  %v133_v50 = vpack.c.bf16 %v78_v47, %v77_v46  ;;  %v81_v52 = vld [vmem:[%s5710_s0 + $0xb0] sm:$0xff] }
  0x33   :  { %4154 = vmatpush3.bf16.msra.mxu1 %v4317_v39  ;;  %v134_v51 = vpack.c.bf16 %v80_v49, %v79_v48  ;;  %v82_v53 = vld [vmem:[%s5710_s0 + $0xb8] sm:$0xff]  ;;  %v83_v54 = vld [vmem:[%s5710_s0 + $0xc0] sm:$0xff]  ;;  %v84_v55 = vld [vmem:[%s5710_s0 + $0xc8] sm:$0xff] }
  0x34   :  { %4155 = vmatprep.subr.bf16.mxu1 %v4318_v42  ;;  %v135_v56 = vpack.c.bf16 %v82_v53, %v81_v52  ;;  %v136_v57 = vpack.c.bf16 %v84_v55, %v83_v54  ;;  %v85_v58 = vld [vmem:[%s5710_s0 + $0xd0] sm:$0xff]  ;;  %v86_v59 = vld [vmem:[%s5710_s0 + $0xd8] sm:$0xff]  ;;  %v87_v60 = vld [vmem:[%s5710_s0 + $0xe0] sm:$0xff] }
  0x35   :  { %v88_v61 = vld [vmem:[%s5710_s0 + $0xe8] sm:$0xff]  ;;  %v137_v62 = vpack.c.bf16 %v86_v59, %v85_v58  ;;  %v89_v0 = vld [vmem:[%s5710_s0 + $0xf0] sm:$0xff]  ;;  %v90_v1 = vld [vmem:[%s5710_s0 + $0xf8] sm:$0xff] }
  0x36   :  { %v138_v63 = vpack.c.bf16 %v88_v61, %v87_v60  ;;  %v91_v2 = vld [vmem:[%s5710_s0 + $0x100] sm:$0xff]  ;;  %v92_v3 = vld [vmem:[%s5710_s0 + $0x108] sm:$0xff]  ;;  %v139_v4 = vpack.c.bf16 %v90_v1, %v89_v0  ;;  %v93_v6 = vld [vmem:[%s5710_s0 + $0x110] sm:$0xff] }
  0x37   :  { %4156 = vmatpush3.bf16.msra.mxu1 %v4318_v42  ;;  %v140_v5 = vpack.c.bf16 %v92_v3, %v91_v2  ;;  %v94_v7 = vld [vmem:[%s5710_s0 + $0x118] sm:$0xff]  ;;  %v95_v8 = vld [vmem:[%s5710_s0 + $0x120] sm:$0xff]  ;;  %v96_v9 = vld [vmem:[%s5710_s0 + $0x128] sm:$0xff] }
  0x38   :  { %4094 = vmatmul.mubr.msk.bf16.gmra.mrb[4].mxu0 %vm157_vm2, %v127_v18  ;;  %v141_v10 = vpack.c.bf16 %v94_v7, %v93_v6  ;;  %v142_v11 = vpack.c.bf16 %v96_v9, %v95_v8  ;;  %v97_v12 = vld [vmem:[%s5710_s0 + $0x130] sm:$0xff]  ;;  %v98_v13 = vld [vmem:[%s5710_s0 + $0x138] sm:$0xff]  ;;  %v99_v14 = vld [vmem:[%s5710_s0 + $0x140] sm:$0xff] }
  0x39   :  { %4097 = vmatprep.mubr.msk.bf16.mxu0 %vm157_vm2, %v128_v19  ;;  %4150 = vmatmul.mubr.msk.bf16.gmra.mrb[4].mxu1 %vm157_vm2, %v155_v44  ;;  %v100_v15 = vld [vmem:[%s5710_s0 + $0x148] sm:$0xff]  ;;  %v143_v16 = vpack.c.bf16 %v98_v13, %v97_v12  ;;  %v101_v18 = vld [vmem:[%s5710_s0 + $0x150] sm:$0xff]  ;;  %v102_v19 = vld [vmem:[%s5710_s0 + $0x158] sm:$0xff] }
  0x3a   :  { %v144_v17 = vpack.c.bf16 %v100_v15, %v99_v14  ;;  %v103_v20 = vld [vmem:[%s5710_s0 + $0x160] sm:$0xff]  ;;  %v104_v21 = vld [vmem:[%s5710_s0 + $0x168] sm:$0xff]  ;;  %v145_v22 = vpack.c.bf16 %v102_v19, %v101_v18  ;;  %v106_v25 = vld [vmem:[%s5710_s0 + $0x178] sm:$0xff] }
  0x3b   :  { %v146_v23 = vpack.c.bf16 %v104_v21, %v103_v20  ;;  %v107_v26 = vld [vmem:[%s5710_s0 + $0x180] sm:$0xff]  ;;  %v108_v27 = vld [vmem:[%s5710_s0 + $0x188] sm:$0xff]  ;;  %v4319_v29 = vld [vmem:[%s5712_s2 + $0x10] sm:$0xff]  }
  0x3c   :  { %v148_v30 = vpack.c.bf16 %v108_v27, %v107_v26  ;;  %4157 = vmatprep.subr.bf16.mxu1 %v4319_v29  ;;  %v4320_v31 = vld [vmem:[%s5712_s2 + $0x18] sm:$0xff]   ;;  %v109_v32 = vld [vmem:[%s5710_s0 + $0x190] sm:$0xff]  ;;  %v111_v34 = vld [vmem:[%s5710_s0 + $0x1a0] sm:$0xff] }
  0x3d   :  { %4158 = vmatpush3.bf16.msra.mxu1 %v4319_v29  ;;  %v110_v33 = vld [vmem:[%s5710_s0 + $0x198] sm:$0xff]  ;;  %v112_v35 = vld [vmem:[%s5710_s0 + $0x1a8] sm:$0xff]  ;;  %v113_v38 = vld [vmem:[%s5710_s0 + $0x1b0] sm:$0xff] }
  0x3e   :  { %4159 = vmatprep.subr.bf16.mxu1 %v4320_v31  ;;  %v149_v36 = vpack.c.bf16 %v110_v33, %v109_v32  ;;  %v150_v37 = vpack.c.bf16 %v112_v35, %v111_v34  ;;  %v114_v39 = vld [vmem:[%s5710_s0 + $0x1b8] sm:$0xff]  ;;  %v4321_v41 = vld [vmem:[%s5713_s3] sm:$0xff]   ;;  %v4322_v42 = vld [vmem:[%s5713_s3 + $0x8] sm:$0xff]  }
  0x3f   :  { %v151_v40 = vpack.c.bf16 %v114_v39, %v113_v38  ;;  %4225 = vmatprep.subr.bf16.mxu0 %v4321_v41  ;;  %v4324_v44 = vld [vmem:[%s5713_s3 + $0x18] sm:$0xff]   ;;  %v4326_v46 = vld [vmem:[%s5713_s3 + $0x28] sm:$0xff]   ;;  %v4327_v47 = vld [vmem:[%s5713_s3 + $0x30] sm:$0xff]  }
  0x40   :  { %4098 = vmatmul.mubr.msk.bf16.gmra.mrb[8].mxu0 %vm157_vm2, %v129_v24  ;;  %v105_v24 = vld [vmem:[%s5710_s0 + $0x170] sm:$0xff]  ;;  %v4926_v48 = vld [vmem:[%s5717_s7] ss:$0 sm:$0xff] }
  0x41   :  { %4101 = vmatprep.mubr.msk.bf16.mxu0 %vm157_vm2, %v130_v28  ;;  %v147_v28 = vpack.c.bf16 %v106_v25, %v105_v24  ;;  %4160 = vmatpush3.bf16.msra.mxu1 %v4320_v31 }
  0x42   :  { %4226 = vmatpush3.bf16.msra.mxu0 %v4321_v41 }
  0x43   :  { %4227 = vmatprep.subr.bf16.mxu0 %v4322_v42 }
  0x46   :  { %4228 = vmatpush3.bf16.msra.mxu0 %v4322_v42 }
  0x48   :  { %4102 = vmatmul.mubr.msk.bf16.gmra.mrb[12].mxu0 %vm157_vm2, %v131_v43  ;;  %v4323_v43 = vld [vmem:[%s5713_s3 + $0x10] sm:$0xff]  }
  0x49   :  { %4105 = vmatprep.mubr.msk.bf16.mxu0 %vm157_vm2, %v132_v45  ;;  %4229 = vmatprep.subr.bf16.mxu0 %v4323_v43  ;;  %v4325_v45 = vld [vmem:[%s5713_s3 + $0x20] sm:$0xff]  }
  0x4a   :  { %4230 = vmatpush3.bf16.msra.mxu0 %v4323_v43 }
  0x4b   :  { %4231 = vmatprep.subr.bf16.mxu0 %v4324_v44 }
  0x4e   :  { %4232 = vmatpush3.bf16.msra.mxu0 %v4324_v44 }
  0x4f   :  { %4233 = vmatprep.subr.bf16.mxu0 %v4325_v45 }
  0x50   :  { %4106 = vmatmul.mubr.msk.bf16.gmra.mrb[16].mxu0 %vm157_vm2, %v133_v50 }
  0x51   :  { %4109 = vmatprep.mubr.msk.bf16.mxu0 %vm157_vm2, %v134_v51 }
  0x52   :  { %4234 = vmatpush3.bf16.msra.mxu0 %v4325_v45 }
  0x53   :  { %4235 = vmatprep.subr.bf16.mxu0 %v4326_v46 }
  0x56   :  { %4236 = vmatpush3.bf16.msra.mxu0 %v4326_v46 }
  0x57   :  { %4237 = vmatprep.subr.bf16.mxu0 %v4327_v47 }
  0x58   :  { %4110 = vmatmul.mubr.msk.bf16.gmra.mrb[20].mxu0 %vm157_vm2, %v135_v56  ;;  %v4328_v56 = vld [vmem:[%s5713_s3 + $0x38] sm:$0xff]  }
  0x59   :  { %4113 = vmatprep.mubr.msk.bf16.mxu0 %vm157_vm2, %v136_v57 }
  0x5a   :  { %4238 = vmatpush3.bf16.msra.mxu0 %v4327_v47 }
  0x5b   :  { %4239 = vmatprep.subr.bf16.mxu0 %v4328_v56 }
  0x5e   :  { %4240 = vmatpush3.bf16.msra.mxu0 %v4328_v56 }
  0x60   :  { %4114 = vmatmul.mubr.msk.bf16.gmra.mrb[24].mxu0 %vm157_vm2, %v137_v62 }
  0x61   :  { %4117 = vmatprep.mubr.msk.bf16.mxu0 %vm157_vm2, %v138_v63 }
  0x68   :  { %4118 = vmatmul.mubr.msk.bf16.gmra.mrb[28].mxu0 %vm157_vm2, %v139_v4 }
  0x69   :  { %4121 = vmatprep.mubr.msk.bf16.mxu0 %vm157_vm2, %v140_v5 }
  0x70   :  { %4122 = vmatmul.mubr.msk.bf16.gmra.mrb[32].mxu0 %vm157_vm2, %v141_v10 }
  0x71   :  { %4125 = vmatprep.mubr.msk.bf16.mxu0 %vm157_vm2, %v142_v11 }
  0x78   :  { %4126 = vmatmul.mubr.msk.bf16.gmra.mrb[36].mxu0 %vm157_vm2, %v143_v16 }
  0x79   :  { %4129 = vmatprep.mubr.msk.bf16.mxu0 %vm157_vm2, %v144_v17 }
  0x80   :  { %4130 = vmatmul.mubr.msk.bf16.gmra.mrb[40].mxu0 %vm157_vm2, %v145_v22 }
  0x81   :  { %4133 = vmatprep.mubr.msk.bf16.mxu0 %vm157_vm2, %v146_v23 }
  0x88   :  { %4134 = vmatmul.mubr.msk.bf16.gmra.mrb[44].mxu0 %vm157_vm2, %v147_v28 }
  0x89   :  { %4137 = vmatprep.mubr.msk.bf16.mxu0 %vm157_vm2, %v148_v30 }
  0x90   :  { %4138 = vmatmul.mubr.msk.bf16.gmra.mrb[48].mxu0 %vm157_vm2, %v149_v36 }
  0x91   :  { %4141 = vmatprep.mubr.msk.bf16.mxu0 %vm157_vm2, %v150_v37 }
  0x98   :  { %4142 = vmatmul.mubr.msk.bf16.gmra.mrb[52].mxu0 %vm157_vm2, %v151_v40 }
 0x103   :  { %v4091_v49 = vpop.f32.mrb[0].mxu0 }
 0x104   :  { %v304_v50 = vadd.f32 %v4091_v49, %v4926_v48  ;;  %v295_v51 = vpop.f32.mrb[1].mxu0  ;;  %v4147_v15 = vpop.f32.mrb[0].mxu1 }
 0x105   :  { %v296_v52 = vadd.f32 %v295_v51, %v4926_v48  ;;  %v4092_v53 = vpop.f32.mrb[2].mxu0  ;;  %v528_v18 = vadd.f32 %v4147_v15, %v4926_v48  ;;  %v519_v19 = vpop.f32.mrb[1].mxu1 }
 0x106   :  { %v307_v54 = vadd.f32 %v4092_v53, %v4926_v48  ;;  %v298_v55 = vpop.f32.mrb[3].mxu0  ;;  %v552_v58 = vmax.f32 %v304_v50, 0.0  ;;  %v520_v22 = vadd.f32 %v519_v19, %v4926_v48  ;;  %v4148_v23 = vpop.f32.mrb[2].mxu1 }
 0x107   :  { %v299_v57 = vadd.f32 %v298_v55, %v4926_v48  ;;  %v550_v60 = vmax.f32 %v296_v52, 0.0  ;;  %v608_v27 = vmax.f32 %v528_v18, 0.0  ;;  %v531_v28 = vadd.f32 %v4148_v23, %v4926_v48  ;;  %v522_v29 = vpop.f32.mrb[3].mxu1 }
 0x108   :  { %v553_v59 = vmax.f32 %v307_v54, 0.0  ;;  %v606_v32 = vmax.f32 %v520_v22, 0.0  ;;  %v523_v33 = vadd.f32 %v522_v29, %v4926_v48 }
 0x109   :  { %v551_v61 = vmax.f32 %v299_v57, 0.0  ;;  %v609_v35 = vmax.f32 %v531_v28, 0.0 }
 0x10a   :  { %v623_v62 = vpack.c.bf16 %v553_v59, %v552_v58  ;;  %v607_v37 = vmax.f32 %v523_v33, 0.0 }
 0x10b   :  { %v622_v63 = vpack.c.bf16 %v551_v61, %v550_v60  ;;  %v4095_v0 = vpop.f32.mrb[4].mxu0  ;;  %v4951_v39 = vpack.c.bf16 %v609_v35, %v608_v27 }
 0x10c   :  { %v320_v1 = vadd.f32 %v4095_v0, %v4926_v48  ;;  %v311_v2 = vpop.f32.mrb[5].mxu0  ;;  %v4953_v42 = vpack.c.bf16 %v607_v37, %v606_v32  ;;  %v4151_v43 = vpop.f32.mrb[4].mxu1 }
 0x10d   :  { %v312_v3 = vadd.f32 %v311_v2, %v4926_v48  ;;  %v4096_v4 = vpop.f32.mrb[6].mxu0  ;;  %4161 = vmatprep.mubr.msk.bf16.mxu1 %vm679_vm3, %v622_v63  ;;  %v544_v46 = vadd.f32 %v4151_v43, %v4926_v48  ;;  %v535_v47 = vpop.f32.mrb[5].mxu1 }
 0x10e   :  { %v556_v5 = vmax.f32 %v320_v1, 0.0  ;;  %v323_v6 = vadd.f32 %v4096_v4, %v4926_v48  ;;  %v314_v7 = vpop.f32.mrb[7].mxu0  ;;  %4162 = vmatmul.mubr.msk.bf16.vlgmr.msra.gmra.mrb[8].mxu1 %vm679_vm3, %v623_v62  ;;  %v536_v51 = vadd.f32 %v535_v47, %v4926_v48  ;;  %v4152_v52 = vpop.f32.mrb[6].mxu1 }
 0x10f   :  { %v554_v8 = vmax.f32 %v312_v3, 0.0  ;;  %v315_v9 = vadd.f32 %v314_v7, %v4926_v48  ;;  %v612_v56 = vmax.f32 %v544_v46, 0.0  ;;  %v547_v57 = vadd.f32 %v4152_v52, %v4926_v48  ;;  %v538_v58 = vpop.f32.mrb[7].mxu1 }
 0x110   :  { %v557_v10 = vmax.f32 %v323_v6, 0.0  ;;  %v610_v61 = vmax.f32 %v536_v51, 0.0  ;;  %v539_v62 = vadd.f32 %v538_v58, %v4926_v48 }
 0x111   :  { %v555_v11 = vmax.f32 %v315_v9, 0.0  ;;  %v613_v0 = vmax.f32 %v547_v57, 0.0 }
 0x112   :  { %v625_v12 = vpack.c.bf16 %v557_v10, %v556_v5  ;;  %v611_v2 = vmax.f32 %v539_v62, 0.0 }
 0x113   :  { %v624_v13 = vpack.c.bf16 %v555_v11, %v554_v8  ;;  %v4099_v14 = vpop.f32.mrb[8].mxu0  ;;  %v4965_v4 = vpack.c.bf16 %v613_v0, %v612_v56 }
 0x114   :  { %v336_v16 = vadd.f32 %v4099_v14, %v4926_v48  ;;  %v327_v17 = vpop.f32.mrb[9].mxu0  ;;  %v4967_v7 = vpack.c.bf16 %v611_v2, %v610_v61 }
 0x115   :  { %4165 = vmatprep.mubr.msk.bf16.mxu1 %vm679_vm3, %v624_v13  ;;  %v328_v20 = vadd.f32 %v327_v17, %v4926_v48  ;;  %v4100_v21 = vpop.f32.mrb[10].mxu0 }
 0x116   :  { %4166 = vmatmul.mubr.msk.bf16.gmra.mrb[12].mxu1 %vm679_vm3, %v625_v12  ;;  %v560_v24 = vmax.f32 %v336_v16, 0.0  ;;  %v339_v25 = vadd.f32 %v4100_v21, %v4926_v48  ;;  %v330_v26 = vpop.f32.mrb[11].mxu0 }
 0x117   :  { %v558_v30 = vmax.f32 %v328_v20, 0.0  ;;  %v331_v31 = vadd.f32 %v330_v26, %v4926_v48 }
 0x118   :  { %v561_v34 = vmax.f32 %v339_v25, 0.0 }
 0x119   :  { %v559_v36 = vmax.f32 %v331_v31, 0.0 }
 0x11a   :  { %v627_v38 = vpack.c.bf16 %v561_v34, %v560_v24 }
 0x11b   :  { %v626_v40 = vpack.c.bf16 %v559_v36, %v558_v30  ;;  %v4103_v41 = vpop.f32.mrb[12].mxu0 }
 0x11c   :  { %v352_v44 = vadd.f32 %v4103_v41, %v4926_v48  ;;  %v343_v45 = vpop.f32.mrb[13].mxu0 }
 0x11d   :  { %4169 = vmatprep.mubr.msk.bf16.mxu1 %vm679_vm3, %v626_v40  ;;  %v344_v49 = vadd.f32 %v343_v45, %v4926_v48  ;;  %v4104_v50 = vpop.f32.mrb[14].mxu0 }
 0x11e   :  { %4170 = vmatmul.mubr.msk.bf16.gmra.mrb[16].mxu1 %vm679_vm3, %v627_v38  ;;  %v564_v53 = vmax.f32 %v352_v44, 0.0  ;;  %v355_v54 = vadd.f32 %v4104_v50, %v4926_v48  ;;  %v346_v55 = vpop.f32.mrb[15].mxu0 }
 0x11f   :  { %v562_v59 = vmax.f32 %v344_v49, 0.0  ;;  %v347_v60 = vadd.f32 %v346_v55, %v4926_v48 }
 0x120   :  { %v565_v63 = vmax.f32 %v355_v54, 0.0 }
 0x121   :  { %v563_v1 = vmax.f32 %v347_v60, 0.0 }
 0x122   :  { %v629_v3 = vpack.c.bf16 %v565_v63, %v564_v53 }
 0x123   :  { %v628_v5 = vpack.c.bf16 %v563_v1, %v562_v59  ;;  %v4107_v6 = vpop.f32.mrb[16].mxu0 }
 0x124   :  { %v368_v8 = vadd.f32 %v4107_v6, %v4926_v48  ;;  %v359_v9 = vpop.f32.mrb[17].mxu0 }
 0x125   :  { %4173 = vmatprep.mubr.msk.bf16.mxu1 %vm679_vm3, %v628_v5  ;;  %v360_v10 = vadd.f32 %v359_v9, %v4926_v48  ;;  %v4108_v11 = vpop.f32.mrb[18].mxu0 }
 0x126   :  { %4174 = vmatmul.mubr.msk.bf16.gmra.mrb[20].mxu1 %vm679_vm3, %v629_v3  ;;  %v568_v12 = vmax.f32 %v368_v8, 0.0  ;;  %v371_v13 = vadd.f32 %v4108_v11, %v4926_v48  ;;  %v362_v14 = vpop.f32.mrb[19].mxu0 }
 0x127   :  { %v566_v15 = vmax.f32 %v360_v10, 0.0  ;;  %v363_v16 = vadd.f32 %v362_v14, %v4926_v48 }
 0x128   :  { %v569_v17 = vmax.f32 %v371_v13, 0.0 }
 0x129   :  { %v567_v18 = vmax.f32 %v363_v16, 0.0 }
 0x12a   :  { %v631_v19 = vpack.c.bf16 %v569_v17, %v568_v12 }
 0x12b   :  { %v630_v20 = vpack.c.bf16 %v567_v18, %v566_v15  ;;  %v4111_v21 = vpop.f32.mrb[20].mxu0 }
 0x12c   :  { %v384_v22 = vadd.f32 %v4111_v21, %v4926_v48  ;;  %v375_v23 = vpop.f32.mrb[21].mxu0 }
 0x12d   :  { %4177 = vmatprep.mubr.msk.bf16.mxu1 %vm679_vm3, %v630_v20  ;;  %v376_v24 = vadd.f32 %v375_v23, %v4926_v48  ;;  %v4112_v25 = vpop.f32.mrb[22].mxu0 }
 0x12e   :  { %4178 = vmatmul.mubr.msk.bf16.gmra.mrb[24].mxu1 %vm679_vm3, %v631_v19  ;;  %v572_v26 = vmax.f32 %v384_v22, 0.0  ;;  %v387_v27 = vadd.f32 %v4112_v25, %v4926_v48  ;;  %v378_v28 = vpop.f32.mrb[23].mxu0 }
 0x12f   :  { %v570_v29 = vmax.f32 %v376_v24, 0.0  ;;  %v379_v30 = vadd.f32 %v378_v28, %v4926_v48 }
 0x130   :  { %v573_v31 = vmax.f32 %v387_v27, 0.0 }
 0x131   :  { %v571_v32 = vmax.f32 %v379_v30, 0.0 }
 0x132   :  { %v633_v33 = vpack.c.bf16 %v573_v31, %v572_v26 }
 0x133   :  { %v632_v34 = vpack.c.bf16 %v571_v32, %v570_v29  ;;  %v4115_v35 = vpop.f32.mrb[24].mxu0 }
 0x134   :  { %v400_v36 = vadd.f32 %v4115_v35, %v4926_v48  ;;  %v391_v37 = vpop.f32.mrb[25].mxu0 }
 0x135   :  { %4181 = vmatprep.mubr.msk.bf16.mxu1 %vm679_vm3, %v632_v34  ;;  %v392_v38 = vadd.f32 %v391_v37, %v4926_v48  ;;  %v4116_v40 = vpop.f32.mrb[26].mxu0 }
 0x136   :  { %4182 = vmatmul.mubr.msk.bf16.gmra.mrb[28].mxu1 %vm679_vm3, %v633_v33  ;;  %v576_v41 = vmax.f32 %v400_v36, 0.0  ;;  %v403_v43 = vadd.f32 %v4116_v40, %v4926_v48  ;;  %v394_v44 = vpop.f32.mrb[27].mxu0 }
 0x137   :  { %v574_v45 = vmax.f32 %v392_v38, 0.0  ;;  %v395_v46 = vadd.f32 %v394_v44, %v4926_v48 }
 0x138   :  { %v577_v47 = vmax.f32 %v403_v43, 0.0 }
 0x139   :  { %v575_v49 = vmax.f32 %v395_v46, 0.0 }
 0x13a   :  { %v635_v50 = vpack.c.bf16 %v577_v47, %v576_v41 }
 0x13b   :  { %v634_v51 = vpack.c.bf16 %v575_v49, %v574_v45  ;;  %v4119_v52 = vpop.f32.mrb[28].mxu0 }
 0x13c   :  { %v416_v53 = vadd.f32 %v4119_v52, %v4926_v48  ;;  %v407_v54 = vpop.f32.mrb[29].mxu0 }
 0x13d   :  { %4185 = vmatprep.mubr.msk.bf16.mxu1 %vm679_vm3, %v634_v51  ;;  %v408_v55 = vadd.f32 %v407_v54, %v4926_v48  ;;  %v4120_v56 = vpop.f32.mrb[30].mxu0 }
 0x13e   :  { %4186 = vmatmul.mubr.msk.bf16.gmra.mrb[32].mxu1 %vm679_vm3, %v635_v50  ;;  %v580_v57 = vmax.f32 %v416_v53, 0.0  ;;  %v419_v58 = vadd.f32 %v4120_v56, %v4926_v48  ;;  %v410_v59 = vpop.f32.mrb[31].mxu0 }
 0x13f   :  { %v578_v60 = vmax.f32 %v408_v55, 0.0  ;;  %v411_v61 = vadd.f32 %v410_v59, %v4926_v48 }
 0x140   :  { %v581_v62 = vmax.f32 %v419_v58, 0.0 }
 0x141   :  { %v579_v63 = vmax.f32 %v411_v61, 0.0 }
 0x142   :  { %v637_v0 = vpack.c.bf16 %v581_v62, %v580_v57 }
 0x143   :  { %v636_v1 = vpack.c.bf16 %v579_v63, %v578_v60  ;;  %v4123_v2 = vpop.f32.mrb[32].mxu0 }
 0x144   :  { %v432_v3 = vadd.f32 %v4123_v2, %v4926_v48  ;;  %v423_v5 = vpop.f32.mrb[33].mxu0 }
 0x145   :  { %4189 = vmatprep.mubr.msk.bf16.mxu1 %vm679_vm3, %v636_v1  ;;  %v424_v6 = vadd.f32 %v423_v5, %v4926_v48  ;;  %v4124_v8 = vpop.f32.mrb[34].mxu0 }
 0x146   :  { %4190 = vmatmul.mubr.msk.bf16.gmra.mrb[36].mxu1 %vm679_vm3, %v637_v0  ;;  %v584_v9 = vmax.f32 %v432_v3, 0.0  ;;  %v435_v10 = vadd.f32 %v4124_v8, %v4926_v48  ;;  %v426_v11 = vpop.f32.mrb[35].mxu0 }
 0x147   :  { %v582_v12 = vmax.f32 %v424_v6, 0.0  ;;  %v427_v13 = vadd.f32 %v426_v11, %v4926_v48 }
 0x148   :  { %v585_v14 = vmax.f32 %v435_v10, 0.0 }
 0x149   :  { %v583_v15 = vmax.f32 %v427_v13, 0.0 }
 0x14a   :  { %v639_v16 = vpack.c.bf16 %v585_v14, %v584_v9 }
 0x14b   :  { %v638_v17 = vpack.c.bf16 %v583_v15, %v582_v12  ;;  %v4127_v18 = vpop.f32.mrb[36].mxu0 }
 0x14c   :  { %v448_v19 = vadd.f32 %v4127_v18, %v4926_v48  ;;  %v439_v20 = vpop.f32.mrb[37].mxu0 }
 0x14d   :  { %4193 = vmatprep.mubr.msk.bf16.mxu1 %vm679_vm3, %v638_v17  ;;  %v440_v21 = vadd.f32 %v439_v20, %v4926_v48  ;;  %v4128_v22 = vpop.f32.mrb[38].mxu0 }
 0x14e   :  { %4194 = vmatmul.mubr.msk.bf16.gmra.mrb[40].mxu1 %vm679_vm3, %v639_v16  ;;  %v588_v23 = vmax.f32 %v448_v19, 0.0  ;;  %v451_v24 = vadd.f32 %v4128_v22, %v4926_v48  ;;  %v442_v25 = vpop.f32.mrb[39].mxu0 }
 0x14f   :  { %v586_v26 = vmax.f32 %v440_v21, 0.0  ;;  %v443_v27 = vadd.f32 %v442_v25, %v4926_v48 }
 0x150   :  { %v589_v28 = vmax.f32 %v451_v24, 0.0 }
 0x151   :  { %v587_v29 = vmax.f32 %v443_v27, 0.0 }
 0x152   :  { %v641_v30 = vpack.c.bf16 %v589_v28, %v588_v23 }
 0x153   :  { %v640_v31 = vpack.c.bf16 %v587_v29, %v586_v26  ;;  %v4131_v32 = vpop.f32.mrb[40].mxu0  ;;  %v4331_v29 = vld [vmem:[#allocation2 + $0x4] ss:$16 sps:$4 sm:$0xff]  }
 0x154   :  { %v464_v33 = vadd.f32 %v4131_v32, %v4926_v48  ;;  %v455_v34 = vpop.f32.mrb[41].mxu0  ;;  %1720 = vmatprep.subr.bf16.mxu1 %v4331_v29  ;;  %v4335_v32 = vld [vmem:[#allocation2 + $0x40] ss:$16 sps:$4 sm:$0xff]  }
 0x155   :  { %4197 = vmatprep.mubr.msk.bf16.mxu1 %vm679_vm3, %v640_v31  ;;  %v456_v35 = vadd.f32 %v455_v34, %v4926_v48  ;;  %v4132_v36 = vpop.f32.mrb[42].mxu0  ;;  %v4334_v31 = vld [vmem:[#allocation2 + $0x24] ss:$16 sps:$4 sm:$0xff]  }
 0x156   :  { %4198 = vmatmul.mubr.msk.bf16.gmra.mrb[44].mxu1 %vm679_vm3, %v641_v30  ;;  %v592_v37 = vmax.f32 %v464_v33, 0.0  ;;  %v467_v38 = vadd.f32 %v4132_v36, %v4926_v48  ;;  %v458_v40 = vpop.f32.mrb[43].mxu0  ;;  %v4332_v30 = vld [vmem:[#allocation2 + $0x20] ss:$16 sps:$4 sm:$0xff]   ;;  %v4337_v33 = vld [vmem:[#allocation2 + $0x44] ss:$16 sps:$4 sm:$0xff]  }
 0x157   :  { %v590_v41 = vmax.f32 %v456_v35, 0.0  ;;  %v459_v43 = vadd.f32 %v458_v40, %v4926_v48  ;;  %v4343_v34 = vld [vmem:[#allocation2 + $0x84] ss:$16 sps:$4 sm:$0xff]   ;;  %v4347_v36 = vld [vmem:[#allocation2 + $0xc0] ss:$16 sps:$4 sm:$0xff]  }
 0x158   :  { %v593_v44 = vmax.f32 %v467_v38, 0.0  ;;  %v4346_v35 = vld [vmem:[#allocation2 + $0xa4] ss:$16 sps:$4 sm:$0xff]   ;;  %v5042_v38 = vld [vmem:[%s5717_s7 + $0x1] ss:$0 sm:$0xff] }
 0x159   :  { %v591_v45 = vmax.f32 %v459_v43, 0.0 }
 0x15a   :  { %v643_v46 = vpack.c.bf16 %v593_v44, %v592_v37  ;;  %v4349_v37 = vld [vmem:[#allocation2 + $0xc4] ss:$16 sps:$4 sm:$0xff]  }
 0x15b   :  { %v642_v47 = vpack.c.bf16 %v591_v45, %v590_v41  ;;  %v4135_v49 = vpop.f32.mrb[44].mxu0 }
 0x15c   :  { %v480_v50 = vadd.f32 %v4135_v49, %v4926_v48  ;;  %v471_v51 = vpop.f32.mrb[45].mxu0  ;;  %v4350_v49 = vld [vmem:[#allocation2 + $0xe0] ss:$16 sps:$4 sm:$0xff]  }
 0x15d   :  { %4201 = vmatprep.mubr.msk.bf16.mxu1 %vm679_vm3, %v642_v47  ;;  %v472_v52 = vadd.f32 %v471_v51, %v4926_v48  ;;  %v4136_v53 = vpop.f32.mrb[46].mxu0 }
 0x15e   :  { %4202 = vmatmul.mubr.msk.bf16.gmra.mrb[48].mxu1 %vm679_vm3, %v643_v46  ;;  %v596_v54 = vmax.f32 %v480_v50, 0.0  ;;  %v483_v55 = vadd.f32 %v4136_v53, %v4926_v48  ;;  %v474_v56 = vpop.f32.mrb[47].mxu0  ;;  %v4352_v50 = vld [vmem:[#allocation2 + $0xe4] ss:$16 sps:$4 sm:$0xff]  }
 0x15f   :  { %v594_v57 = vmax.f32 %v472_v52, 0.0  ;;  %v475_v58 = vadd.f32 %v474_v56, %v4926_v48 }
 0x160   :  { %v597_v59 = vmax.f32 %v483_v55, 0.0 }
 0x161   :  { %v595_v60 = vmax.f32 %v475_v58, 0.0 }
 0x162   :  { %v645_v61 = vpack.c.bf16 %v597_v59, %v596_v54 }
 0x163   :  { %v644_v62 = vpack.c.bf16 %v595_v60, %v594_v57  ;;  %v4139_v63 = vpop.f32.mrb[48].mxu0 }
 0x164   :  { %v496_v0 = vadd.f32 %v4139_v63, %v4926_v48  ;;  %v487_v1 = vpop.f32.mrb[49].mxu0 }
 0x165   :  { %4205 = vmatprep.mubr.msk.bf16.mxu1 %vm679_vm3, %v644_v62  ;;  %v488_v2 = vadd.f32 %v487_v1, %v4926_v48  ;;  %v4140_v3 = vpop.f32.mrb[50].mxu0 }
 0x166   :  { %4206 = vmatmul.mubr.msk.bf16.gmra.mrb[52].mxu1 %vm679_vm3, %v645_v61  ;;  %v600_v5 = vmax.f32 %v496_v0, 0.0  ;;  %v499_v6 = vadd.f32 %v4140_v3, %v4926_v48  ;;  %v490_v8 = vpop.f32.mrb[51].mxu0 }
 0x167   :  { %v598_v9 = vmax.f32 %v488_v2, 0.0  ;;  %v491_v10 = vadd.f32 %v490_v8, %v4926_v48 }
 0x168   :  { %v601_v11 = vmax.f32 %v499_v6, 0.0 }
 0x169   :  { %v599_v12 = vmax.f32 %v491_v10, 0.0 }
 0x16a   :  { %v647_v13 = vpack.c.bf16 %v601_v11, %v600_v5 }
 0x16b   :  { %v646_v14 = vpack.c.bf16 %v599_v12, %v598_v9  ;;  %v4143_v15 = vpop.f32.mrb[52].mxu0 }
 0x16c   :  { %v512_v16 = vadd.f32 %v4143_v15, %v4926_v48  ;;  %v503_v17 = vpop.f32.mrb[53].mxu0 }
 0x16d   :  { %v504_v18 = vadd.f32 %v503_v17, %v4926_v48  ;;  %v4144_v19 = vpop.f32.mrb[54].mxu0  ;;  %4209 = vmatprep.mubr.msk.bf16.mxu1 %vm679_vm3, %v646_v14 }
 0x16e   :  { %v604_v20 = vmax.f32 %v512_v16, 0.0  ;;  %v515_v21 = vadd.f32 %v4144_v19, %v4926_v48  ;;  %v506_v22 = vpop.f32.mrb[55].mxu0  ;;  %4210 = vmatmul.mubr.msk.bf16.gmra.mrb[56].mxu1 %vm679_vm3, %v647_v13 }
 0x16f   :  { %v602_v23 = vmax.f32 %v504_v18, 0.0  ;;  %v507_v24 = vadd.f32 %v506_v22, %v4926_v48  ;;  %v4329_v48 = vld [vmem:[#allocation2] ss:$16 sps:$4 sm:$0xff]  }
 0x170   :  { %v605_v25 = vmax.f32 %v515_v21, 0.0  ;;  %1721 = vmatpush1.bf16.msra.mxu1 %v4329_v48 }
 0x171   :  { %v603_v26 = vmax.f32 %v507_v24, 0.0  ;;  %1722 = vmatprep.subr.bf16.mxu1 %v4334_v31 }
 0x172   :  { %v649_v27 = vpack.c.bf16 %v605_v25, %v604_v20 }
 0x173   :  { %v648_v28 = vpack.c.bf16 %v603_v26, %v602_v23 }
 0x174   :  { %1723 = vmatpush1.bf16.msra.mxu1 %v4332_v30 }
 0x175   :  { %4213 = vmatprep.mubr.msk.bf16.mxu1 %vm679_vm3, %v648_v28  ;;  %1724 = vmatprep.subr.bf16.mxu1 %v4337_v33 }
 0x176   :  { %4214 = vmatmul.mubr.msk.bf16.gmra.mrb[60].mxu1 %vm679_vm3, %v649_v27 }
 0x177   :  { %4217 = vmatprep.mubr.msk.bf16.mxu1 %vm679_vm3, %v4953_v42  ;;  %v4338_v42 = vld [vmem:[#allocation2 + $0x60] ss:$16 sps:$4 sm:$0xff]  }
 0x178   :  { %1725 = vmatpush1.bf16.msra.mxu1 %v4335_v32 }
 0x17e   :  { %4218 = vmatmul.mubr.msk.bf16.gmra.mrb[64].mxu1 %vm679_vm3, %v4951_v39  ;;  %v4340_v39 = vld [vmem:[#allocation2 + $0x64] ss:$16 sps:$4 sm:$0xff]  }
 0x17f   :  { %4221 = vmatprep.mubr.msk.bf16.mxu1 %vm679_vm3, %v4967_v7  ;;  %1726 = vmatprep.subr.bf16.mxu1 %v4340_v39  ;;  %v4341_v7 = vld [vmem:[#allocation2 + $0x80] ss:$16 sps:$4 sm:$0xff]  }
 0x180   :  { %1727 = vmatpush1.bf16.msra.mxu1 %v4338_v42 }
 0x181   :  { %1728 = vmatprep.subr.bf16.mxu1 %v4343_v34 }
 0x184   :  { %1729 = vmatpush1.bf16.msra.mxu1 %v4341_v7 }
 0x185   :  { %1730 = vmatprep.subr.bf16.mxu1 %v4346_v35 }
 0x186   :  { %4222 = vmatmul.mubr.msk.bf16.gmra.mrb[68].mxu1 %vm679_vm3, %v4965_v4  ;;  %v4344_v4 = vld [vmem:[#allocation2 + $0xa0] ss:$16 sps:$4 sm:$0xff]  }
 0x188   :  { %1731 = vmatpush1.bf16.msra.mxu1 %v4344_v4 }
 0x189   :  { %1732 = vmatprep.subr.bf16.mxu1 %v4349_v37 }
 0x18c   :  { %1733 = vmatpush1.bf16.msra.mxu1 %v4347_v36 }
 0x18d   :  { %1734 = vmatprep.subr.bf16.mxu1 %v4352_v50 }
 0x190   :  { %1735 = vmatpush1.bf16.msra.mxu1 %v4350_v49 }
 0x1e1   :  { %v4163_v40 = vpop.f32.mrb[8].mxu1 }
 0x1e2   :  { %v819_v41 = vadd.f32 %v4163_v40, %v5042_v38  ;;  %v810_v43 = vpop.f32.mrb[9].mxu1 }
 0x1e3   :  { %v811_v44 = vadd.f32 %v810_v43, %v5042_v38  ;;  %v4164_v45 = vpop.f32.mrb[10].mxu1 }
 0x1e4   :  { %v822_v46 = vadd.f32 %v4164_v45, %v5042_v38  ;;  %v813_v47 = vpop.f32.mrb[11].mxu1  ;;  %v1067_v52 = vmax.f32 %v819_v41, 0.0 }
 0x1e5   :  { %v814_v51 = vadd.f32 %v813_v47, %v5042_v38  ;;  %v1065_v54 = vmax.f32 %v811_v44, 0.0 }
 0x1e6   :  { %v1068_v53 = vmax.f32 %v822_v46, 0.0 }
 0x1e7   :  { %v1066_v55 = vmax.f32 %v814_v51, 0.0 }
 0x1e8   :  { %v1146_v56 = vpack.c.bf16 %v1068_v53, %v1067_v52 }
 0x1e9   :  { %v1145_v57 = vpack.c.bf16 %v1066_v55, %v1065_v54  ;;  %v4167_v58 = vpop.f32.mrb[12].mxu1 }
 0x1ea   :  { %v835_v59 = vadd.f32 %v4167_v58, %v5042_v38  ;;  %v826_v60 = vpop.f32.mrb[13].mxu1 }
 0x1eb   :  { %v827_v61 = vadd.f32 %v826_v60, %v5042_v38  ;;  %v4168_v62 = vpop.f32.mrb[14].mxu1  ;;  %4241 = vmatprep.mubr.bf16.mxu0 %v1145_v57 }
 0x1ec   :  { %v1071_v63 = vmax.f32 %v835_v59, 0.0  ;;  %v838_v0 = vadd.f32 %v4168_v62, %v5042_v38  ;;  %v829_v1 = vpop.f32.mrb[15].mxu1  ;;  %4242 = vmatmul.mubr.bf16.vlgmr.msra.gmra.mrb[56].mxu0 %v1146_v56 }
 0x1ed   :  { %v1069_v2 = vmax.f32 %v827_v61, 0.0  ;;  %v830_v3 = vadd.f32 %v829_v1, %v5042_v38 }
 0x1ee   :  { %v1072_v5 = vmax.f32 %v838_v0, 0.0 }
 0x1ef   :  { %v1070_v6 = vmax.f32 %v830_v3, 0.0 }
 0x1f0   :  { %v1148_v8 = vpack.c.bf16 %v1072_v5, %v1071_v63 }
 0x1f1   :  { %v1147_v9 = vpack.c.bf16 %v1070_v6, %v1069_v2  ;;  %v4171_v10 = vpop.f32.mrb[16].mxu1 }
 0x1f2   :  { %v851_v11 = vadd.f32 %v4171_v10, %v5042_v38  ;;  %v842_v12 = vpop.f32.mrb[17].mxu1 }
 0x1f3   :  { %4245 = vmatprep.mubr.bf16.mxu0 %v1147_v9  ;;  %v843_v13 = vadd.f32 %v842_v12, %v5042_v38  ;;  %v4172_v14 = vpop.f32.mrb[18].mxu1 }
 0x1f4   :  { %4246 = vmatmul.mubr.bf16.gmra.mrb[60].mxu0 %v1148_v8  ;;  %v1075_v15 = vmax.f32 %v851_v11, 0.0  ;;  %v854_v16 = vadd.f32 %v4172_v14, %v5042_v38  ;;  %v845_v17 = vpop.f32.mrb[19].mxu1 }
 0x1f5   :  { %v1073_v18 = vmax.f32 %v843_v13, 0.0  ;;  %v846_v19 = vadd.f32 %v845_v17, %v5042_v38 }
 0x1f6   :  { %v1076_v20 = vmax.f32 %v854_v16, 0.0 }
 0x1f7   :  { %v1074_v21 = vmax.f32 %v846_v19, 0.0 }
 0x1f8   :  { %v1150_v22 = vpack.c.bf16 %v1076_v20, %v1075_v15 }
 0x1f9   :  { %v1149_v23 = vpack.c.bf16 %v1074_v21, %v1073_v18  ;;  %v4175_v24 = vpop.f32.mrb[20].mxu1 }
 0x1fa   :  { %v867_v25 = vadd.f32 %v4175_v24, %v5042_v38  ;;  %v858_v26 = vpop.f32.mrb[21].mxu1 }
 0x1fb   :  { %4249 = vmatprep.mubr.bf16.mxu0 %v1149_v23  ;;  %v859_v27 = vadd.f32 %v858_v26, %v5042_v38  ;;  %v4176_v28 = vpop.f32.mrb[22].mxu1 }
 0x1fc   :  { %4250 = vmatmul.mubr.bf16.gmra.mrb[64].mxu0 %v1150_v22  ;;  %v1079_v48 = vmax.f32 %v867_v25, 0.0  ;;  %v870_v29 = vadd.f32 %v4176_v28, %v5042_v38  ;;  %v861_v30 = vpop.f32.mrb[23].mxu1 }
 0x1fd   :  { %v1077_v31 = vmax.f32 %v859_v27, 0.0  ;;  %v862_v32 = vadd.f32 %v861_v30, %v5042_v38 }
 0x1fe   :  { %v1080_v33 = vmax.f32 %v870_v29, 0.0 }
 0x1ff   :  { %v1078_v42 = vmax.f32 %v862_v32, 0.0 }
 0x200   :  { %v1152_v39 = vpack.c.bf16 %v1080_v33, %v1079_v48 }
 0x201   :  { %v1151_v7 = vpack.c.bf16 %v1078_v42, %v1077_v31  ;;  %v4179_v34 = vpop.f32.mrb[24].mxu1 }
 0x202   :  { %v883_v4 = vadd.f32 %v4179_v34, %v5042_v38  ;;  %v874_v35 = vpop.f32.mrb[25].mxu1 }
 0x203   :  { %4253 = vmatprep.mubr.bf16.mxu0 %v1151_v7  ;;  %v875_v36 = vadd.f32 %v874_v35, %v5042_v38  ;;  %v4180_v37 = vpop.f32.mrb[26].mxu1 }
 0x204   :  { %4254 = vmatmul.mubr.bf16.gmra.mrb[68].mxu0 %v1152_v39  ;;  %v1083_v40 = vmax.f32 %v883_v4, 0.0  ;;  %v886_v41 = vadd.f32 %v4180_v37, %v5042_v38  ;;  %v877_v43 = vpop.f32.mrb[27].mxu1 }
 0x205   :  { %v1081_v44 = vmax.f32 %v875_v36, 0.0  ;;  %v878_v45 = vadd.f32 %v877_v43, %v5042_v38 }
 0x206   :  { %v1084_v46 = vmax.f32 %v886_v41, 0.0 }
 0x207   :  { %v1082_v47 = vmax.f32 %v878_v45, 0.0 }
 0x208   :  { %v1154_v49 = vpack.c.bf16 %v1084_v46, %v1083_v40 }
 0x209   :  { %v1153_v50 = vpack.c.bf16 %v1082_v47, %v1081_v44  ;;  %v4183_v51 = vpop.f32.mrb[28].mxu1 }
 0x20a   :  { %v899_v52 = vadd.f32 %v4183_v51, %v5042_v38  ;;  %v890_v53 = vpop.f32.mrb[29].mxu1 }
 0x20b   :  { %4257 = vmatprep.mubr.bf16.mxu0 %v1153_v50  ;;  %v891_v54 = vadd.f32 %v890_v53, %v5042_v38  ;;  %v4184_v55 = vpop.f32.mrb[30].mxu1 }
 0x20c   :  { %4258 = vmatmul.mubr.bf16.gmra.mrb[72].mxu0 %v1154_v49  ;;  %v1087_v56 = vmax.f32 %v899_v52, 0.0  ;;  %v902_v57 = vadd.f32 %v4184_v55, %v5042_v38  ;;  %v893_v58 = vpop.f32.mrb[31].mxu1 }
 0x20d   :  { %v1085_v59 = vmax.f32 %v891_v54, 0.0  ;;  %v894_v60 = vadd.f32 %v893_v58, %v5042_v38 }
 0x20e   :  { %v1088_v61 = vmax.f32 %v902_v57, 0.0 }
 0x20f   :  { %v1086_v62 = vmax.f32 %v894_v60, 0.0 }
 0x210   :  { %v1156_v63 = vpack.c.bf16 %v1088_v61, %v1087_v56 }
 0x211   :  { %v1155_v0 = vpack.c.bf16 %v1086_v62, %v1085_v59  ;;  %v4187_v1 = vpop.f32.mrb[32].mxu1 }
 0x212   :  { %v915_v2 = vadd.f32 %v4187_v1, %v5042_v38  ;;  %v906_v3 = vpop.f32.mrb[33].mxu1 }
 0x213   :  { %4261 = vmatprep.mubr.bf16.mxu0 %v1155_v0  ;;  %v907_v5 = vadd.f32 %v906_v3, %v5042_v38  ;;  %v4188_v6 = vpop.f32.mrb[34].mxu1 }
 0x214   :  { %4262 = vmatmul.mubr.bf16.gmra.mrb[76].mxu0 %v1156_v63  ;;  %v1091_v8 = vmax.f32 %v915_v2, 0.0  ;;  %v918_v9 = vadd.f32 %v4188_v6, %v5042_v38  ;;  %v909_v10 = vpop.f32.mrb[35].mxu1 }
 0x215   :  { %v1089_v11 = vmax.f32 %v907_v5, 0.0  ;;  %v910_v12 = vadd.f32 %v909_v10, %v5042_v38 }
 0x216   :  { %v1092_v13 = vmax.f32 %v918_v9, 0.0 }
 0x217   :  { %v1090_v14 = vmax.f32 %v910_v12, 0.0 }
 0x218   :  { %v1158_v15 = vpack.c.bf16 %v1092_v13, %v1091_v8 }
 0x219   :  { %v1157_v16 = vpack.c.bf16 %v1090_v14, %v1089_v11  ;;  %v4191_v17 = vpop.f32.mrb[36].mxu1 }
 0x21a   :  { %v931_v18 = vadd.f32 %v4191_v17, %v5042_v38  ;;  %v922_v19 = vpop.f32.mrb[37].mxu1 }
 0x21b   :  { %4265 = vmatprep.mubr.bf16.mxu0 %v1157_v16  ;;  %v923_v20 = vadd.f32 %v922_v19, %v5042_v38  ;;  %v4192_v21 = vpop.f32.mrb[38].mxu1 }
 0x21c   :  { %4266 = vmatmul.mubr.bf16.gmra.mrb[80].mxu0 %v1158_v15  ;;  %v1095_v22 = vmax.f32 %v931_v18, 0.0  ;;  %v934_v23 = vadd.f32 %v4192_v21, %v5042_v38  ;;  %v925_v24 = vpop.f32.mrb[39].mxu1 }
 0x21d   :  { %v1093_v25 = vmax.f32 %v923_v20, 0.0  ;;  %v926_v26 = vadd.f32 %v925_v24, %v5042_v38 }
 0x21e   :  { %v1096_v27 = vmax.f32 %v934_v23, 0.0 }
 0x21f   :  { %v1094_v28 = vmax.f32 %v926_v26, 0.0 }
 0x220   :  { %v1160_v48 = vpack.c.bf16 %v1096_v27, %v1095_v22 }
 0x221   :  { %v1159_v29 = vpack.c.bf16 %v1094_v28, %v1093_v25  ;;  %v4195_v30 = vpop.f32.mrb[40].mxu1 }
 0x222   :  { %v947_v31 = vadd.f32 %v4195_v30, %v5042_v38  ;;  %v938_v32 = vpop.f32.mrb[41].mxu1 }
 0x223   :  { %4269 = vmatprep.mubr.bf16.mxu0 %v1159_v29  ;;  %v939_v33 = vadd.f32 %v938_v32, %v5042_v38  ;;  %v4196_v42 = vpop.f32.mrb[42].mxu1 }
 0x224   :  { %4270 = vmatmul.mubr.bf16.gmra.mrb[84].mxu0 %v1160_v48  ;;  %v1099_v39 = vmax.f32 %v947_v31, 0.0  ;;  %v950_v7 = vadd.f32 %v4196_v42, %v5042_v38  ;;  %v941_v34 = vpop.f32.mrb[43].mxu1 }
 0x225   :  { %v1097_v4 = vmax.f32 %v939_v33, 0.0  ;;  %v942_v35 = vadd.f32 %v941_v34, %v5042_v38 }
 0x226   :  { %v1100_v36 = vmax.f32 %v950_v7, 0.0  ;;  %v4590_v7 = vmov 0  }
 0x227   :  { %v1098_v37 = vmax.f32 %v942_v35, 0.0  ;;  %1752 = vmatprep.mubr.bf16.mxu1 %v4590_v7  ;;  %2394 = vmatprep.subr.bf16.mxu0 %v4590_v7 }
 0x228   :  { %v1162_v40 = vpack.c.bf16 %v1100_v36, %v1099_v39 }
 0x229   :  { %v1161_v41 = vpack.c.bf16 %v1098_v37, %v1097_v4  ;;  %v4199_v43 = vpop.f32.mrb[44].mxu1 }
 0x22a   :  { %v963_v44 = vadd.f32 %v4199_v43, %v5042_v38  ;;  %v954_v45 = vpop.f32.mrb[45].mxu1 }
 0x22b   :  { %4273 = vmatprep.mubr.bf16.mxu0 %v1161_v41  ;;  %v955_v46 = vadd.f32 %v954_v45, %v5042_v38  ;;  %v4200_v47 = vpop.f32.mrb[46].mxu1 }
 0x22c   :  { %4274 = vmatmul.mubr.bf16.gmra.mrb[88].mxu0 %v1162_v40  ;;  %v1103_v49 = vmax.f32 %v963_v44, 0.0  ;;  %v966_v50 = vadd.f32 %v4200_v47, %v5042_v38  ;;  %v957_v51 = vpop.f32.mrb[47].mxu1 }
 0x22d   :  { %v1101_v52 = vmax.f32 %v955_v46, 0.0  ;;  %v958_v53 = vadd.f32 %v957_v51, %v5042_v38 }
 0x22e   :  { %v1104_v54 = vmax.f32 %v966_v50, 0.0 }
 0x22f   :  { %v1102_v55 = vmax.f32 %v958_v53, 0.0 }
 0x230   :  { %v1164_v56 = vpack.c.bf16 %v1104_v54, %v1103_v49 }
 0x231   :  { %v1163_v57 = vpack.c.bf16 %v1102_v55, %v1101_v52  ;;  %v4203_v58 = vpop.f32.mrb[48].mxu1 }
 0x232   :  { %v979_v59 = vadd.f32 %v4203_v58, %v5042_v38  ;;  %v970_v60 = vpop.f32.mrb[49].mxu1 }
 0x233   :  { %4277 = vmatprep.mubr.bf16.mxu0 %v1163_v57  ;;  %v971_v61 = vadd.f32 %v970_v60, %v5042_v38  ;;  %v4204_v62 = vpop.f32.mrb[50].mxu1 }
 0x234   :  { %4278 = vmatmul.mubr.bf16.gmra.mrb[92].mxu0 %v1164_v56  ;;  %v1107_v63 = vmax.f32 %v979_v59, 0.0  ;;  %v982_v0 = vadd.f32 %v4204_v62, %v5042_v38  ;;  %v973_v1 = vpop.f32.mrb[51].mxu1 }
 0x235   :  { %v1105_v2 = vmax.f32 %v971_v61, 0.0  ;;  %v974_v3 = vadd.f32 %v973_v1, %v5042_v38 }
 0x236   :  { %v1108_v5 = vmax.f32 %v982_v0, 0.0 }
 0x237   :  { %v1106_v6 = vmax.f32 %v974_v3, 0.0 }
 0x238   :  { %v1166_v8 = vpack.c.bf16 %v1108_v5, %v1107_v63 }
 0x239   :  { %v1165_v9 = vpack.c.bf16 %v1106_v6, %v1105_v2  ;;  %v4207_v10 = vpop.f32.mrb[52].mxu1 }
 0x23a   :  { %v995_v11 = vadd.f32 %v4207_v10, %v5042_v38  ;;  %v986_v12 = vpop.f32.mrb[53].mxu1 }
 0x23b   :  { %4281 = vmatprep.mubr.bf16.mxu0 %v1165_v9  ;;  %v987_v13 = vadd.f32 %v986_v12, %v5042_v38  ;;  %v4208_v14 = vpop.f32.mrb[54].mxu1 }
 0x23c   :  { %4282 = vmatmul.mubr.bf16.gmra.mrb[96].mxu0 %v1166_v8  ;;  %v1111_v15 = vmax.f32 %v995_v11, 0.0  ;;  %v998_v16 = vadd.f32 %v4208_v14, %v5042_v38  ;;  %v989_v17 = vpop.f32.mrb[55].mxu1 }
 0x23d   :  { %v1109_v18 = vmax.f32 %v987_v13, 0.0  ;;  %v990_v19 = vadd.f32 %v989_v17, %v5042_v38 }
 0x23e   :  { %v1112_v20 = vmax.f32 %v998_v16, 0.0 }
 0x23f   :  { %v1110_v21 = vmax.f32 %v990_v19, 0.0  ;;  %v4354_v19 = vld [vmem:[%s5715_s5 + $0x18] ss:$12 sps:$4 sm:$0xff]  }
 0x240   :  { %v1168_v22 = vpack.c.bf16 %v1112_v20, %v1111_v15  ;;  %v4356_v20 = vld [vmem:[%s5715_s5 + $0x48] ss:$12 sps:$4 sm:$0xff]  }
 0x241   :  { %v1167_v23 = vpack.c.bf16 %v1110_v21, %v1109_v18  ;;  %v4211_v24 = vpop.f32.mrb[56].mxu1  ;;  %v4353_v18 = vld [vmem:[%s5715_s5] ss:$12 sps:$4 sm:$0xff]  }
 0x242   :  { %v1011_v25 = vadd.f32 %v4211_v24, %v5042_v38  ;;  %v1002_v26 = vpop.f32.mrb[57].mxu1  ;;  %2395 = vmatpush1.bf16.msra.mxu0 %v4353_v18  ;;  %v5129_v21 = vld [vmem:[%s5717_s7 + $0x2] ss:$0 sm:$0xff] }
 0x243   :  { %4285 = vmatprep.mubr.bf16.mxu0 %v1167_v23  ;;  %v1003_v27 = vadd.f32 %v1002_v26, %v5042_v38  ;;  %v4212_v28 = vpop.f32.mrb[58].mxu1  ;;  %2396 = vmatprep.subr.bf16.mxu0 %v4590_v7 }
 0x244   :  { %4286 = vmatmul.mubr.bf16.gmra.mrb[100].mxu0 %v1168_v22  ;;  %v1115_v48 = vmax.f32 %v1011_v25, 0.0  ;;  %v1014_v29 = vadd.f32 %v4212_v28, %v5042_v38  ;;  %v1005_v30 = vpop.f32.mrb[59].mxu1 }
 0x245   :  { %v1113_v31 = vmax.f32 %v1003_v27, 0.0  ;;  %v1006_v32 = vadd.f32 %v1005_v30, %v5042_v38  ;;  %v4357_v27 = vld [vmem:[%s5715_s5 + $0x60] ss:$12 sps:$4 sm:$0xff]  }
 0x246   :  { %v1116_v33 = vmax.f32 %v1014_v29, 0.0  ;;  %2397 = vmatpush1.bf16.msra.mxu0 %v4354_v19 }
 0x247   :  { %v1114_v42 = vmax.f32 %v1006_v32, 0.0  ;;  %2398 = vmatprep.subr.bf16.mxu0 %v4590_v7 }
 0x248   :  { %v1170_v39 = vpack.c.bf16 %v1116_v33, %v1115_v48 }
 0x249   :  { %v1169_v34 = vpack.c.bf16 %v1114_v42, %v1113_v31  ;;  %v4215_v4 = vpop.f32.mrb[60].mxu1 }
 0x24a   :  { %v1027_v35 = vadd.f32 %v4215_v4, %v5042_v38  ;;  %v1018_v36 = vpop.f32.mrb[61].mxu1 }
 0x24b   :  { %v1019_v37 = vadd.f32 %v1018_v36, %v5042_v38  ;;  %v4216_v40 = vpop.f32.mrb[62].mxu1  ;;  %4289 = vmatprep.mubr.bf16.mxu0 %v1169_v34 }
 0x24c   :  { %v1119_v41 = vmax.f32 %v1027_v35, 0.0  ;;  %v1030_v43 = vadd.f32 %v4216_v40, %v5042_v38  ;;  %v1021_v44 = vpop.f32.mrb[63].mxu1  ;;  %4290 = vmatmul.mubr.bf16.gmra.mrb[104].mxu0 %v1170_v39  ;;  %v4358_v40 = vld [vmem:[%s5715_s5 + $0x78] ss:$12 sps:$4 sm:$0xff]  }
 0x24d   :  { %v1117_v45 = vmax.f32 %v1019_v37, 0.0  ;;  %v1022_v46 = vadd.f32 %v1021_v44, %v5042_v38 }
 0x24e   :  { %v1120_v47 = vmax.f32 %v1030_v43, 0.0 }
 0x24f   :  { %v1118_v49 = vmax.f32 %v1022_v46, 0.0 }
 0x250   :  { %v1172_v50 = vpack.c.bf16 %v1120_v47, %v1119_v41 }
 0x251   :  { %v1171_v51 = vpack.c.bf16 %v1118_v49, %v1117_v45  ;;  %v4219_v52 = vpop.f32.mrb[64].mxu1 }
 0x252   :  { %v1043_v53 = vadd.f32 %v4219_v52, %v5042_v38  ;;  %v1034_v54 = vpop.f32.mrb[65].mxu1 }
 0x253   :  { %v1035_v55 = vadd.f32 %v1034_v54, %v5042_v38  ;;  %v4220_v56 = vpop.f32.mrb[66].mxu1  ;;  %4293 = vmatprep.mubr.bf16.mxu0 %v1171_v51 }
 0x254   :  { %v1123_v57 = vmax.f32 %v1043_v53, 0.0  ;;  %v1046_v58 = vadd.f32 %v4220_v56, %v5042_v38  ;;  %v1037_v59 = vpop.f32.mrb[67].mxu1  ;;  %4294 = vmatmul.mubr.bf16.gmra.mrb[108].mxu0 %v1172_v50 }
 0x255   :  { %v1121_v60 = vmax.f32 %v1035_v55, 0.0  ;;  %v1038_v61 = vadd.f32 %v1037_v59, %v5042_v38 }
 0x256   :  { %v1124_v62 = vmax.f32 %v1046_v58, 0.0 }
 0x257   :  { %v1122_v63 = vmax.f32 %v1038_v61, 0.0 }
 0x258   :  { %v1174_v0 = vpack.c.bf16 %v1124_v62, %v1123_v57  ;;  %v4359_v57 = vld [vmem:[%s5715_s5 + $0x90] ss:$12 sps:$4 sm:$0xff]  }
 0x259   :  { %v1173_v1 = vpack.c.bf16 %v1122_v63, %v1121_v60  ;;  %v4223_v2 = vpop.f32.mrb[68].mxu1 }
 0x25a   :  { %v1059_v3 = vadd.f32 %v4223_v2, %v5042_v38  ;;  %v1050_v5 = vpop.f32.mrb[69].mxu1 }
 0x25b   :  { %v1051_v6 = vadd.f32 %v1050_v5, %v5042_v38  ;;  %v4224_v8 = vpop.f32.mrb[70].mxu1  ;;  %4297 = vmatprep.mubr.bf16.mxu0 %v1173_v1 }
 0x25c   :  { %v1127_v9 = vmax.f32 %v1059_v3, 0.0  ;;  %v1062_v10 = vadd.f32 %v4224_v8, %v5042_v38  ;;  %v1053_v11 = vpop.f32.mrb[71].mxu1  ;;  %4298 = vmatmul.mubr.bf16.gmra.mrb[112].mxu0 %v1174_v0 }
 0x25d   :  { %v1125_v12 = vmax.f32 %v1051_v6, 0.0  ;;  %v1054_v13 = vadd.f32 %v1053_v11, %v5042_v38  ;;  %v4355_v38 = vld [vmem:[%s5715_s5 + $0x30] ss:$12 sps:$4 sm:$0xff]  }
 0x25e   :  { %v1128_v14 = vmax.f32 %v1062_v10, 0.0  ;;  %2399 = vmatpush1.bf16.msra.mxu0 %v4355_v38  ;;  %v4360_v10 = vld [vmem:[%s5715_s5 + $0xa8] ss:$12 sps:$4 sm:$0xff]  }
 0x25f   :  { %v1126_v15 = vmax.f32 %v1054_v13, 0.0  ;;  %2400 = vmatprep.subr.bf16.mxu0 %v4590_v7 }
 0x260   :  { %v1176_v16 = vpack.c.bf16 %v1128_v14, %v1127_v9 }
 0x261   :  { %v1175_v17 = vpack.c.bf16 %v1126_v15, %v1125_v12 }
 0x262   :  { %2401 = vmatpush1.bf16.msra.mxu0 %v4356_v20 }
 0x263   :  { %4301 = vmatprep.mubr.bf16.mxu0 %v1175_v17  ;;  %2402 = vmatprep.subr.bf16.mxu0 %v4590_v7 }
 0x264   :  { %4302 = vmatmul.mubr.bf16.gmra.mrb[116].mxu0 %v1176_v16 }
 0x266   :  { %2403 = vmatpush1.bf16.msra.mxu0 %v4357_v27 }
 0x267   :  { %2404 = vmatprep.subr.bf16.mxu0 %v4590_v7 }
 0x26a   :  { %2405 = vmatpush1.bf16.msra.mxu0 %v4358_v40 }
 0x26b   :  { %2406 = vmatprep.subr.bf16.mxu0 %v4590_v7 }
 0x26e   :  { %2407 = vmatpush1.bf16.msra.mxu0 %v4359_v57 }
 0x26f   :  { %2408 = vmatprep.subr.bf16.mxu0 %v4590_v7 }
 0x272   :  { %2409 = vmatpush1.bf16.msra.mxu0 %v4360_v10 }
 0x273   :  { %2410 = vmatprep.subr.bf16.mxu0 %v4590_v7 }
 0x2bf   :  { %v4243_v22 = vpop.f32.mrb[56].mxu0 }
 0x2c0   :  { %v1269_v23 = vadd.f32 %v4243_v22, %v5129_v21  ;;  %v1260_v24 = vpop.f32.mrb[57].mxu0 }
 0x2c1   :  { %v1261_v25 = vadd.f32 %v1260_v24, %v5129_v21  ;;  %v4244_v26 = vpop.f32.mrb[58].mxu0 }
 0x2c2   :  { %v1272_v28 = vadd.f32 %v4244_v26, %v5129_v21  ;;  %v1263_v48 = vpop.f32.mrb[59].mxu0  ;;  %v1517_v30 = vmax.f32 %v1269_v23, 0.0 }
 0x2c3   :  { %v1264_v29 = vadd.f32 %v1263_v48, %v5129_v21  ;;  %v1515_v32 = vmax.f32 %v1261_v25, 0.0  ;;  %v4361_v25 = vld [vmem:[%s5715_s5 + $0xc0] ss:$12 sps:$4 sm:$0xff]  }
 0x2c4   :  { %v1518_v31 = vmax.f32 %v1272_v28, 0.0  ;;  %2411 = vmatpush1.bf16.msra.mxu0 %v4361_v25 }
 0x2c5   :  { %v1516_v33 = vmax.f32 %v1264_v29, 0.0  ;;  %2412 = vmatprep.subr.bf16.mxu0 %v4590_v7 }
 0x2c6   :  { %v1596_v42 = vpack.c.bf16 %v1518_v31, %v1517_v30 }
 0x2c7   :  { %v1595_v39 = vpack.c.bf16 %v1516_v33, %v1515_v32  ;;  %v4247_v34 = vpop.f32.mrb[60].mxu0 }
 0x2c8   :  { %v1285_v4 = vadd.f32 %v4247_v34, %v5129_v21  ;;  %v1276_v35 = vpop.f32.mrb[61].mxu0 }
 0x2c9   :  { %v1277_v36 = vadd.f32 %v1276_v35, %v5129_v21  ;;  %v4248_v37 = vpop.f32.mrb[62].mxu0  ;;  %1753 = vmatmul.mubr.bf16.vlgmr.msra.gmra.mrb[72].mxu1 %v1595_v39 }
 0x2ca   :  { %v1288_v41 = vadd.f32 %v4248_v37, %v5129_v21  ;;  %v1279_v43 = vpop.f32.mrb[63].mxu0  ;;  %1762 = vmatprep.mubr.bf16.mxu1 %v4590_v7  ;;  %v1521_v45 = vmax.f32 %v1285_v4, 0.0 }
 0x2cb   :  { %v1280_v44 = vadd.f32 %v1279_v43, %v5129_v21  ;;  %v1519_v47 = vmax.f32 %v1277_v36, 0.0  ;;  %v4362_v36 = vld [vmem:[%s5715_s5 + $0xd8] ss:$12 sps:$4 sm:$0xff]  }
 0x2cc   :  { %v1522_v46 = vmax.f32 %v1288_v41, 0.0  ;;  %2413 = vmatpush1.bf16.msra.mxu0 %v4362_v36  ;;  %v4366_v36 = vld [vmem:[%s5715_s5 + $0x138] ss:$12 sps:$4 sm:$0xff]  }
 0x2cd   :  { %v1520_v49 = vmax.f32 %v1280_v44, 0.0  ;;  %2414 = vmatprep.subr.bf16.mxu0 %v4590_v7 }
 0x2ce   :  { %v1598_v50 = vpack.c.bf16 %v1522_v46, %v1521_v45 }
 0x2cf   :  { %v1597_v51 = vpack.c.bf16 %v1520_v49, %v1519_v47  ;;  %v4251_v52 = vpop.f32.mrb[64].mxu0 }
 0x2d0   :  { %v1301_v53 = vadd.f32 %v4251_v52, %v5129_v21  ;;  %v1292_v54 = vpop.f32.mrb[65].mxu0 }
 0x2d1   :  { %1763 = vmatmul.mubr.bf16.gmra.mrb[76].mxu1 %v1596_v42  ;;  %v1293_v55 = vadd.f32 %v1292_v54, %v5129_v21  ;;  %v4252_v56 = vpop.f32.mrb[66].mxu0 }
 0x2d2   :  { %v1525_v58 = vmax.f32 %v1301_v53, 0.0  ;;  %v1304_v59 = vadd.f32 %v4252_v56, %v5129_v21  ;;  %v1295_v60 = vpop.f32.mrb[67].mxu0  ;;  %1772 = vmatprep.mubr.bf16.mxu1 %v4590_v7 }
 0x2d3   :  { %v1523_v61 = vmax.f32 %v1293_v55, 0.0  ;;  %v1296_v62 = vadd.f32 %v1295_v60, %v5129_v21  ;;  %v4363_v55 = vld [vmem:[%s5715_s5 + $0xf0] ss:$12 sps:$4 sm:$0xff]  }
 0x2d4   :  { %v1526_v63 = vmax.f32 %v1304_v59, 0.0  ;;  %2415 = vmatpush1.bf16.msra.mxu0 %v4363_v55 }
 0x2d5   :  { %v1524_v0 = vmax.f32 %v1296_v62, 0.0  ;;  %2416 = vmatprep.subr.bf16.mxu0 %v4590_v7 }
 0x2d6   :  { %v1600_v1 = vpack.c.bf16 %v1526_v63, %v1525_v58 }
 0x2d7   :  { %v1599_v2 = vpack.c.bf16 %v1524_v0, %v1523_v61  ;;  %v4255_v3 = vpop.f32.mrb[68].mxu0 }
 0x2d8   :  { %v1317_v5 = vadd.f32 %v4255_v3, %v5129_v21  ;;  %v1308_v6 = vpop.f32.mrb[69].mxu0 }
 0x2d9   :  { %1773 = vmatmul.mubr.bf16.gmra.mrb[80].mxu1 %v1597_v51  ;;  %v1309_v8 = vadd.f32 %v1308_v6, %v5129_v21  ;;  %v4256_v9 = vpop.f32.mrb[70].mxu0 }
 0x2da   :  { %1782 = vmatprep.mubr.bf16.mxu1 %v4590_v7  ;;  %v1529_v11 = vmax.f32 %v1317_v5, 0.0  ;;  %v1320_v12 = vadd.f32 %v4256_v9, %v5129_v21  ;;  %v1311_v13 = vpop.f32.mrb[71].mxu0 }
 0x2db   :  { %v1527_v14 = vmax.f32 %v1309_v8, 0.0  ;;  %v1312_v15 = vadd.f32 %v1311_v13, %v5129_v21  ;;  %v4364_v8 = vld [vmem:[%s5715_s5 + $0x108] ss:$12 sps:$4 sm:$0xff]  }
 0x2dc   :  { %v1530_v16 = vmax.f32 %v1320_v12, 0.0  ;;  %2417 = vmatpush1.bf16.msra.mxu0 %v4364_v8 }
 0x2dd   :  { %v1528_v17 = vmax.f32 %v1312_v15, 0.0  ;;  %2418 = vmatprep.subr.bf16.mxu0 %v4590_v7 }
 0x2de   :  { %v5166_v18 = vpack.c.bf16 %v1530_v16, %v1529_v11 }
 0x2df   :  { %v1601_v19 = vpack.c.bf16 %v1528_v17, %v1527_v14  ;;  %v4259_v38 = vpop.f32.mrb[72].mxu0 }
 0x2e0   :  { %v1333_v20 = vadd.f32 %v4259_v38, %v5129_v21  ;;  %v1324_v22 = vpop.f32.mrb[73].mxu0 }
 0x2e1   :  { %1783 = vmatmul.mubr.bf16.gmra.mrb[84].mxu1 %v1598_v50  ;;  %v1325_v23 = vadd.f32 %v1324_v22, %v5129_v21  ;;  %v4260_v24 = vpop.f32.mrb[74].mxu0 }
 0x2e2   :  { %1792 = vmatprep.mubr.bf16.mxu1 %v4590_v7  ;;  %v1533_v26 = vmax.f32 %v1333_v20, 0.0  ;;  %v1336_v27 = vadd.f32 %v4260_v24, %v5129_v21  ;;  %v1327_v28 = vpop.f32.mrb[75].mxu0  ;;  %v4365_v24 = vld [vmem:[%s5715_s5 + $0x120] ss:$12 sps:$4 sm:$0xff]  }
 0x2e3   :  { %v1531_v48 = vmax.f32 %v1325_v23, 0.0  ;;  %v1328_v29 = vadd.f32 %v1327_v28, %v5129_v21  ;;  %2419 = vmatpush1.bf16.msra.mxu0 %v4365_v24 }
 0x2e4   :  { %v1534_v30 = vmax.f32 %v1336_v27, 0.0  ;;  %2420 = vmatprep.subr.bf16.mxu0 %v4590_v7 }
 0x2e5   :  { %v1532_v31 = vmax.f32 %v1328_v29, 0.0 }
 0x2e6   :  { %v5177_v32 = vpack.c.bf16 %v1534_v30, %v1533_v26 }
 0x2e7   :  { %v5179_v33 = vpack.c.bf16 %v1532_v31, %v1531_v48  ;;  %v4263_v42 = vpop.f32.mrb[76].mxu0  ;;  %2421 = vmatpush1.bf16.msra.mxu0 %v4366_v36 }
 0x2e8   :  { %v1349_v39 = vadd.f32 %v4263_v42, %v5129_v21  ;;  %v1340_v34 = vpop.f32.mrb[77].mxu0  ;;  %2422 = vmatprep.subr.bf16.mxu0 %v4590_v7 }
 0x2e9   :  { %1793 = vmatmul.mubr.bf16.gmra.mrb[88].mxu1 %v1599_v2  ;;  %v1341_v4 = vadd.f32 %v1340_v34, %v5129_v21  ;;  %v4264_v35 = vpop.f32.mrb[78].mxu0 }
 0x2ea   :  { %1802 = vmatprep.mubr.bf16.mxu1 %v4590_v7  ;;  %v1537_v37 = vmax.f32 %v1349_v39, 0.0  ;;  %v1352_v40 = vadd.f32 %v4264_v35, %v5129_v21  ;;  %v1343_v41 = vpop.f32.mrb[79].mxu0 }
 0x2eb   :  { %v1535_v43 = vmax.f32 %v1341_v4, 0.0  ;;  %v1344_v44 = vadd.f32 %v1343_v41, %v5129_v21 }
 0x2ec   :  { %v1538_v45 = vmax.f32 %v1352_v40, 0.0 }
 0x2ed   :  { %v1536_v46 = vmax.f32 %v1344_v44, 0.0 }
 0x2ee   :  { %v5190_v47 = vpack.c.bf16 %v1538_v45, %v1537_v37 }
 0x2ef   :  { %v5192_v49 = vpack.c.bf16 %v1536_v46, %v1535_v43  ;;  %v4267_v50 = vpop.f32.mrb[80].mxu0 }
 0x2f0   :  { %v1365_v51 = vadd.f32 %v4267_v50, %v5129_v21  ;;  %v1356_v52 = vpop.f32.mrb[81].mxu0 }
 0x2f1   :  { %1803 = vmatmul.mubr.bf16.gmra.mrb[92].mxu1 %v1600_v1  ;;  %v1357_v53 = vadd.f32 %v1356_v52, %v5129_v21  ;;  %v4268_v54 = vpop.f32.mrb[82].mxu0 }
 0x2f2   :  { %1812 = vmatprep.mubr.bf16.mxu1 %v4590_v7  ;;  %v1541_v56 = vmax.f32 %v1365_v51, 0.0  ;;  %v1368_v57 = vadd.f32 %v4268_v54, %v5129_v21  ;;  %v1359_v58 = vpop.f32.mrb[83].mxu0 }
 0x2f3   :  { %v1539_v59 = vmax.f32 %v1357_v53, 0.0  ;;  %v1360_v60 = vadd.f32 %v1359_v58, %v5129_v21 }
 0x2f4   :  { %v1542_v61 = vmax.f32 %v1368_v57, 0.0 }
 0x2f5   :  { %v1540_v62 = vmax.f32 %v1360_v60, 0.0 }
 0x2f6   :  { %v5203_v63 = vpack.c.bf16 %v1542_v61, %v1541_v56  ;;  %v4367_v56 = vld [vmem:[%s5715_s5 + $0x150] ss:$12 sps:$4 sm:$0xff]  }
 0x2f7   :  { %v5205_v0 = vpack.c.bf16 %v1540_v62, %v1539_v59  ;;  %v4271_v1 = vpop.f32.mrb[84].mxu0  ;;  %2423 = vmatpush1.bf16.msra.mxu0 %v4367_v56 }
 0x2f8   :  { %v1381_v2 = vadd.f32 %v4271_v1, %v5129_v21  ;;  %v1372_v3 = vpop.f32.mrb[85].mxu0  ;;  %2424 = vmatprep.subr.bf16.mxu0 %v4590_v7 }
 0x2f9   :  { %1813 = vmatmul.mubr.bf16.gmra.mrb[96].mxu1 %v1601_v19  ;;  %v1373_v5 = vadd.f32 %v1372_v3, %v5129_v21  ;;  %v4272_v6 = vpop.f32.mrb[86].mxu0 }
 0x2fa   :  { %1822 = vmatprep.mubr.bf16.mxu1 %v4590_v7  ;;  %v1545_v9 = vmax.f32 %v1381_v2, 0.0  ;;  %v1384_v10 = vadd.f32 %v4272_v6, %v5129_v21  ;;  %v1375_v11 = vpop.f32.mrb[87].mxu0 }
 0x2fb   :  { %v1543_v12 = vmax.f32 %v1373_v5, 0.0  ;;  %v1376_v13 = vadd.f32 %v1375_v11, %v5129_v21 }
 0x2fc   :  { %v1546_v14 = vmax.f32 %v1384_v10, 0.0 }
 0x2fd   :  { %v1544_v15 = vmax.f32 %v1376_v13, 0.0 }
 0x2fe   :  { %v5216_v16 = vpack.c.bf16 %v1546_v14, %v1545_v9 }
 0x2ff   :  { %v5218_v17 = vpack.c.bf16 %v1544_v15, %v1543_v12  ;;  %v4275_v19 = vpop.f32.mrb[88].mxu0 }
 0x300   :  { %v1397_v38 = vadd.f32 %v4275_v19, %v5129_v21  ;;  %v1388_v20 = vpop.f32.mrb[89].mxu0 }
 0x301   :  { %1823 = vmatmul.mubr.bf16.gmra.mrb[100].mxu1 %v5166_v18  ;;  %v1389_v22 = vadd.f32 %v1388_v20, %v5129_v21  ;;  %v4276_v23 = vpop.f32.mrb[90].mxu0 }
 0x302   :  { %1832 = vmatprep.mubr.bf16.mxu1 %v4590_v7  ;;  %v1549_v25 = vmax.f32 %v1397_v38, 0.0  ;;  %v1400_v26 = vadd.f32 %v4276_v23, %v5129_v21  ;;  %v1391_v27 = vpop.f32.mrb[91].mxu0 }
 0x303   :  { %v1547_v28 = vmax.f32 %v1389_v22, 0.0  ;;  %v1392_v48 = vadd.f32 %v1391_v27, %v5129_v21 }
 0x304   :  { %v1550_v29 = vmax.f32 %v1400_v26, 0.0 }
 0x305   :  { %v1548_v18 = vmax.f32 %v1392_v48, 0.0  ;;  %v4368_v48 = vld [vmem:[%s5715_s5 + $0x168] ss:$12 sps:$4 sm:$0xff]  }
 0x306   :  { %v5230_v30 = vpack.c.bf16 %v1550_v29, %v1549_v25  ;;  %2425 = vmatpush1.bf16.msra.mxu0 %v4368_v48 }
 0x307   :  { %v5232_v31 = vpack.c.bf16 %v1548_v18, %v1547_v28  ;;  %v4279_v42 = vpop.f32.mrb[92].mxu0 }
 0x308   :  { %v1413_v39 = vadd.f32 %v4279_v42, %v5129_v21  ;;  %v1404_v34 = vpop.f32.mrb[93].mxu0 }
 0x309   :  { %1833 = vmatmul.mubr.bf16.gmra.mrb[104].mxu1 %v5179_v33  ;;  %v1405_v4 = vadd.f32 %v1404_v34, %v5129_v21  ;;  %v4280_v35 = vpop.f32.mrb[94].mxu0 }
 0x30a   :  { %1842 = vmatprep.mubr.bf16.mxu1 %v4590_v7  ;;  %v1553_v37 = vmax.f32 %v1413_v39, 0.0  ;;  %v1416_v40 = vadd.f32 %v4280_v35, %v5129_v21  ;;  %v1407_v41 = vpop.f32.mrb[95].mxu0 }
 0x30b   :  { %v1551_v43 = vmax.f32 %v1405_v4, 0.0  ;;  %v1408_v44 = vadd.f32 %v1407_v41, %v5129_v21 }
 0x30c   :  { %v1554_v45 = vmax.f32 %v1416_v40, 0.0 }
 0x30d   :  { %v1552_v33 = vmax.f32 %v1408_v44, 0.0 }
 0x30e   :  { %v5244_v46 = vpack.c.bf16 %v1554_v45, %v1553_v37 }
 0x30f   :  { %v5246_v50 = vpack.c.bf16 %v1552_v33, %v1551_v43  ;;  %v4283_v51 = vpop.f32.mrb[96].mxu0 }
 0x310   :  { %v1429_v52 = vadd.f32 %v4283_v51, %v5129_v21  ;;  %v1420_v53 = vpop.f32.mrb[97].mxu0 }
 0x311   :  { %1843 = vmatmul.mubr.bf16.gmra.mrb[108].mxu1 %v5177_v32  ;;  %v1421_v54 = vadd.f32 %v1420_v53, %v5129_v21  ;;  %v4284_v55 = vpop.f32.mrb[98].mxu0 }
 0x312   :  { %1852 = vmatprep.mubr.bf16.mxu1 %v4590_v7  ;;  %v1557_v57 = vmax.f32 %v1429_v52, 0.0  ;;  %v1432_v58 = vadd.f32 %v4284_v55, %v5129_v21  ;;  %v1423_v59 = vpop.f32.mrb[99].mxu0 }
 0x313   :  { %v1555_v60 = vmax.f32 %v1421_v54, 0.0  ;;  %v1424_v61 = vadd.f32 %v1423_v59, %v5129_v21 }
 0x314   :  { %v1558_v62 = vmax.f32 %v1432_v58, 0.0 }
 0x315   :  { %v1556_v32 = vmax.f32 %v1424_v61, 0.0 }
 0x316   :  { %v5258_v1 = vpack.c.bf16 %v1558_v62, %v1557_v57 }
 0x317   :  { %v5260_v2 = vpack.c.bf16 %v1556_v32, %v1555_v60  ;;  %v4287_v3 = vpop.f32.mrb[100].mxu0 }
 0x318   :  { %v1445_v5 = vadd.f32 %v4287_v3, %v5129_v21  ;;  %v1436_v6 = vpop.f32.mrb[101].mxu0 }
 0x319   :  { %1853 = vmatmul.mubr.bf16.gmra.mrb[112].mxu1 %v5192_v49  ;;  %v1437_v8 = vadd.f32 %v1436_v6, %v5129_v21  ;;  %v4288_v9 = vpop.f32.mrb[102].mxu0 }
 0x31a   :  { %1862 = vmatprep.mubr.bf16.mxu1 %v4590_v7  ;;  %v1561_v10 = vmax.f32 %v1445_v5, 0.0  ;;  %v1448_v11 = vadd.f32 %v4288_v9, %v5129_v21  ;;  %v1439_v12 = vpop.f32.mrb[103].mxu0 }
 0x31b   :  { %v1559_v13 = vmax.f32 %v1437_v8, 0.0  ;;  %v1440_v14 = vadd.f32 %v1439_v12, %v5129_v21 }
 0x31c   :  { %v1562_v15 = vmax.f32 %v1448_v11, 0.0 }
 0x31d   :  { %v1560_v19 = vmax.f32 %v1440_v14, 0.0 }
 0x31e   :  { %v5268_v38 = vpack.c.bf16 %v1562_v15, %v1561_v10 }
 0x31f   :  { %v5270_v20 = vpack.c.bf16 %v1560_v19, %v1559_v13  ;;  %v4291_v22 = vpop.f32.mrb[104].mxu0 }
 0x320   :  { %v1461_v49 = vadd.f32 %v4291_v22, %v5129_v21  ;;  %v1452_v23 = vpop.f32.mrb[105].mxu0 }
 0x321   :  { %1863 = vmatmul.mubr.bf16.gmra.mrb[116].mxu1 %v5190_v47  ;;  %v1453_v24 = vadd.f32 %v1452_v23, %v5129_v21  ;;  %v4292_v25 = vpop.f32.mrb[106].mxu0 }
 0x322   :  { %1872 = vmatprep.mubr.bf16.mxu1 %v4590_v7  ;;  %v1565_v26 = vmax.f32 %v1461_v49, 0.0  ;;  %v1464_v27 = vadd.f32 %v4292_v25, %v5129_v21  ;;  %v1455_v28 = vpop.f32.mrb[107].mxu0 }
 0x323   :  { %v1563_v29 = vmax.f32 %v1453_v24, 0.0  ;;  %v1456_v18 = vadd.f32 %v1455_v28, %v5129_v21 }
 0x324   :  { %v1566_v42 = vmax.f32 %v1464_v27, 0.0 }
 0x325   :  { %v1564_v39 = vmax.f32 %v1456_v18, 0.0 }
 0x326   :  { %v5281_v47 = vpack.c.bf16 %v1566_v42, %v1565_v26 }
 0x327   :  { %v5283_v34 = vpack.c.bf16 %v1564_v39, %v1563_v29  ;;  %v4295_v4 = vpop.f32.mrb[108].mxu0 }
 0x328   :  { %v1477_v35 = vadd.f32 %v4295_v4, %v5129_v21  ;;  %v1468_v36 = vpop.f32.mrb[109].mxu0 }
 0x329   :  { %1873 = vmatmul.mubr.bf16.gmra.mrb[120].mxu1 %v5205_v0  ;;  %v1469_v37 = vadd.f32 %v1468_v36, %v5129_v21  ;;  %v4296_v40 = vpop.f32.mrb[110].mxu0 }
 0x32a   :  { %1882 = vmatprep.mubr.bf16.mxu1 %v4590_v7  ;;  %v1569_v41 = vmax.f32 %v1477_v35, 0.0  ;;  %v1480_v43 = vadd.f32 %v4296_v40, %v5129_v21  ;;  %v1471_v44 = vpop.f32.mrb[111].mxu0 }
 0x32b   :  { %v1567_v45 = vmax.f32 %v1469_v37, 0.0  ;;  %v1472_v33 = vadd.f32 %v1471_v44, %v5129_v21 }
 0x32c   :  { %v1570_v51 = vmax.f32 %v1480_v43, 0.0 }
 0x32d   :  { %v1568_v52 = vmax.f32 %v1472_v33, 0.0 }
 0x32e   :  { %v5291_v53 = vpack.c.bf16 %v1570_v51, %v1569_v41 }
 0x32f   :  { %v1621_v54 = vpack.c.bf16 %v1568_v52, %v1567_v45  ;;  %v4299_v55 = vpop.f32.mrb[112].mxu0 }
 0x330   :  { %v1493_v0 = vadd.f32 %v4299_v55, %v5129_v21  ;;  %v1484_v56 = vpop.f32.mrb[113].mxu0 }
 0x331   :  { %1883 = vmatmul.mubr.bf16.gmra.mrb[124].mxu1 %v5203_v63  ;;  %v1485_v57 = vadd.f32 %v1484_v56, %v5129_v21  ;;  %v4300_v58 = vpop.f32.mrb[114].mxu0 }
 0x332   :  { %1892 = vmatprep.mubr.bf16.mxu1 %v4590_v7  ;;  %v1573_v59 = vmax.f32 %v1493_v0, 0.0  ;;  %v1496_v60 = vadd.f32 %v4300_v58, %v5129_v21  ;;  %v1487_v61 = vpop.f32.mrb[115].mxu0 }
 0x333   :  { %v1571_v62 = vmax.f32 %v1485_v57, 0.0  ;;  %v1488_v32 = vadd.f32 %v1487_v61, %v5129_v21 }
 0x334   :  { %v1574_v3 = vmax.f32 %v1496_v60, 0.0 }
 0x335   :  { %v1572_v5 = vmax.f32 %v1488_v32, 0.0 }
 0x336   :  { %v5299_v6 = vpack.c.bf16 %v1574_v3, %v1573_v59 }
 0x337   :  { %v5301_v8 = vpack.c.bf16 %v1572_v5, %v1571_v62  ;;  %v4303_v9 = vpop.f32.mrb[116].mxu0 }
 0x338   :  { %v1509_v63 = vadd.f32 %v4303_v9, %v5129_v21  ;;  %v1500_v10 = vpop.f32.mrb[117].mxu0 }
 0x339   :  { %1893 = vmatmul.mubr.bf16.gmra.mrb[128].mxu1 %v5218_v17  ;;  %v1501_v11 = vadd.f32 %v1500_v10, %v5129_v21  ;;  %v4304_v12 = vpop.f32.mrb[118].mxu0 }
 0x33a   :  { %1902 = vmatprep.mubr.bf16.mxu1 %v4590_v7  ;;  %v1577_v13 = vmax.f32 %v1509_v63, 0.0  ;;  %v1512_v14 = vadd.f32 %v4304_v12, %v5129_v21  ;;  %v1503_v15 = vpop.f32.mrb[119].mxu0 }
 0x33b   :  { %v1575_v19 = vmax.f32 %v1501_v11, 0.0  ;;  %v1504_v22 = vadd.f32 %v1503_v15, %v5129_v21  ;;  %v1630_v21 = vlaneseq }
 0x33c   :  { %v1578_v49 = vmax.f32 %v1512_v14, 0.0 }
 0x33d   :  { %v1576_v23 = vmax.f32 %v1504_v22, 0.0 }
 0x33e   :  { %v5309_v24 = vpack.c.bf16 %v1578_v49, %v1577_v13 }
 0x33f   :  { %v5311_v25 = vpack.c.bf16 %v1576_v23, %v1575_v19 }
 0x341   :  { %1903 = vmatmul.mubr.bf16.gmra.mrb[132].mxu1 %v5216_v16  ;;  %v5334_v16 = vshrl.u32 %v1630_v21, 7 }
 0x342   :  { %1912 = vmatprep.mubr.bf16.mxu1 %v4590_v7 }
 0x343   :  { %v5338_v17 = vsub.s32 0, %v5334_v16 }
 0x349   :  { %1913 = vmatmul.mubr.bf16.gmra.mrb[136].mxu1 %v5232_v31  ;;  %v5344_v31 = vsub.s32 1, %v5334_v16 }
 0x34a   :  { %1922 = vmatprep.mubr.bf16.mxu1 %v4590_v7 }
 0x351   :  { %1923 = vmatmul.mubr.bf16.gmra.mrb[140].mxu1 %v5230_v30  ;;  %v3824_v30 = vld [vmem:[%s5717_s7 + $0x3] ss:$8 sm:$0x3] }
 0x352   :  { %1932 = vmatprep.mubr.bf16.mxu1 %v4590_v7 }
 0x359   :  { %1933 = vmatmul.mubr.bf16.gmra.mrb[144].mxu1 %v5246_v50  ;;  %v5350_v50 = vrot.slane %v3824_v30, %v5344_v31 }
 0x35a   :  { %1942 = vmatprep.mubr.bf16.mxu1 %v4590_v7 }
 0x361   :  { %1943 = vmatmul.mubr.bf16.gmra.mrb[148].mxu1 %v5244_v46  ;;  %v5347_v46 = vrot.slane %v3824_v30, %v5338_v17 }
 0x362   :  { %1952 = vmatprep.mubr.bf16.mxu1 %v4590_v7 }
 0x369   :  { %1953 = vmatmul.mubr.bf16.gmra.mrb[152].mxu1 %v5260_v2 }
 0x36a   :  { %1962 = vmatprep.mubr.bf16.mxu1 %v4590_v7 }
 0x371   :  { %1963 = vmatmul.mubr.bf16.gmra.mrb[156].mxu1 %v5258_v1 }
 0x372   :  { %1972 = vmatprep.mubr.bf16.mxu1 %v4590_v7 }
 0x379   :  { %1973 = vmatmul.mubr.bf16.gmra.mrb[160].mxu1 %v5270_v20 }
 0x37a   :  { %1982 = vmatprep.mubr.bf16.mxu1 %v4590_v7 }
 0x381   :  { %1983 = vmatmul.mubr.bf16.gmra.mrb[164].mxu1 %v5268_v38 }
 0x382   :  { %1992 = vmatprep.mubr.bf16.mxu1 %v4590_v7 }
 0x389   :  { %1993 = vmatmul.mubr.bf16.gmra.mrb[168].mxu1 %v5283_v34 }
 0x38a   :  { %2002 = vmatprep.mubr.bf16.mxu1 %v4590_v7 }
 0x391   :  { %2003 = vmatmul.mubr.bf16.gmra.mrb[172].mxu1 %v5281_v47 }
 0x392   :  { %2012 = vmatprep.mubr.bf16.mxu1 %v4590_v7 }
 0x399   :  { %2013 = vmatmul.mubr.bf16.gmra.mrb[176].mxu1 %v1621_v54 }
 0x39a   :  { %2022 = vmatprep.mubr.bf16.mxu1 %v4590_v7 }
 0x39c   :  { %v1754_v1 = vpop.f32.mrb[72].mxu1 }
 0x39d   :  { %v1755_v2 = vadd.f32 %v1754_v1, %v5347_v46  ;;  %v1756_v38 = vpop.f32.mrb[73].mxu1 }
 0x39e   :  { %v1757_v20 = vadd.f32 %v1756_v38, %v5350_v50  ;;  %v1758_v26 = vpop.f32.mrb[74].mxu1 }
 0x39f   :  { %v1759_v27 = vadd.f32 %v1758_v26, %v5347_v46  ;;  %v1760_v28 = vpop.f32.mrb[75].mxu1  ;;  %v2073_v29 = vmax.f32 %v1755_v2, 0.0 }
 0x3a0   :  { %v1761_v48 = vadd.f32 %v1760_v28, %v5350_v50  ;;  %v2074_v42 = vmax.f32 %v1757_v20, 0.0 }
 0x3a1   :  { %v2075_v18 = vmax.f32 %v1759_v27, 0.0  ;;  %2023 = vmatmul.mubr.bf16.gmra.mrb[180].mxu1 %v5291_v53 }
 0x3a2   :  { %v2076_v39 = vmax.f32 %v1761_v48, 0.0  ;;  %2032 = vmatprep.mubr.bf16.mxu1 %v4590_v7 }
 0x3a3   :  { %v2233_v47 = vpack.c.bf16 %v2075_v18, %v2073_v29 }
 0x3a4   :  { %v2234_v34 = vpack.c.bf16 %v2076_v39, %v2074_v42  ;;  %v1764_v4 = vpop.f32.mrb[76].mxu1 }
 0x3a5   :  { %v1765_v35 = vadd.f32 %v1764_v4, %v5347_v46  ;;  %v1766_v36 = vpop.f32.mrb[77].mxu1 }
 0x3a6   :  { %v1767_v37 = vadd.f32 %v1766_v36, %v5350_v50  ;;  %v1768_v40 = vpop.f32.mrb[78].mxu1  ;;  %2426 = vmatprep.mubr.bf16.mxu0 %v2234_v34 }
 0x3a7   :  { %v1769_v41 = vadd.f32 %v1768_v40, %v5347_v46  ;;  %v1770_v43 = vpop.f32.mrb[79].mxu1  ;;  %2427 = vmatmul.mubr.bf16.vlgmr.msra.gmra.mrb[120].mxu0 %v2233_v47  ;;  %v2077_v45 = vmax.f32 %v1765_v35, 0.0 }
 0x3a8   :  { %v1771_v44 = vadd.f32 %v1770_v43, %v5350_v50  ;;  %v2078_v51 = vmax.f32 %v1767_v37, 0.0 }
 0x3a9   :  { %v2079_v33 = vmax.f32 %v1769_v41, 0.0  ;;  %2033 = vmatmul.mubr.bf16.gmra.mrb[184].mxu1 %v5301_v8 }
 0x3aa   :  { %v2080_v52 = vmax.f32 %v1771_v44, 0.0  ;;  %2042 = vmatprep.mubr.bf16.mxu1 %v4590_v7 }
 0x3ab   :  { %v2235_v53 = vpack.c.bf16 %v2079_v33, %v2077_v45 }
 0x3ac   :  { %v2236_v54 = vpack.c.bf16 %v2080_v52, %v2078_v51  ;;  %v1774_v55 = vpop.f32.mrb[80].mxu1 }
 0x3ad   :  { %v1775_v0 = vadd.f32 %v1774_v55, %v5347_v46  ;;  %v1776_v56 = vpop.f32.mrb[81].mxu1 }
 0x3ae   :  { %v1777_v57 = vadd.f32 %v1776_v56, %v5350_v50  ;;  %v1778_v58 = vpop.f32.mrb[82].mxu1  ;;  %2434 = vmatprep.mubr.bf16.mxu0 %v2236_v54 }
 0x3af   :  { %v1779_v59 = vadd.f32 %v1778_v58, %v5347_v46  ;;  %v1780_v60 = vpop.f32.mrb[83].mxu1  ;;  %2435 = vmatmul.mubr.bf16.gmra.mrb[124].mxu0 %v2235_v53  ;;  %v2081_v62 = vmax.f32 %v1775_v0, 0.0 }
 0x3b0   :  { %v1781_v61 = vadd.f32 %v1780_v60, %v5350_v50  ;;  %v2082_v3 = vmax.f32 %v1777_v57, 0.0 }
 0x3b1   :  { %v2083_v32 = vmax.f32 %v1779_v59, 0.0  ;;  %2043 = vmatmul.mubr.bf16.gmra.mrb[188].mxu1 %v5299_v6 }
 0x3b2   :  { %v2084_v5 = vmax.f32 %v1781_v61, 0.0  ;;  %2052 = vmatprep.mubr.bf16.mxu1 %v4590_v7 }
 0x3b3   :  { %v2237_v8 = vpack.c.bf16 %v2083_v32, %v2081_v62 }
 0x3b4   :  { %v2238_v9 = vpack.c.bf16 %v2084_v5, %v2082_v3  ;;  %v1784_v63 = vpop.f32.mrb[84].mxu1 }
 0x3b5   :  { %v1785_v10 = vadd.f32 %v1784_v63, %v5347_v46  ;;  %v1786_v11 = vpop.f32.mrb[85].mxu1 }
 0x3b6   :  { %v1787_v12 = vadd.f32 %v1786_v11, %v5350_v50  ;;  %v1788_v13 = vpop.f32.mrb[86].mxu1  ;;  %2442 = vmatprep.mubr.bf16.mxu0 %v2238_v9 }
 0x3b7   :  { %v1789_v14 = vadd.f32 %v1788_v13, %v5347_v46  ;;  %v1790_v15 = vpop.f32.mrb[87].mxu1  ;;  %2443 = vmatmul.mubr.bf16.gmra.mrb[128].mxu0 %v2237_v8  ;;  %v2085_v19 = vmax.f32 %v1785_v10, 0.0 }
 0x3b8   :  { %v1791_v6 = vadd.f32 %v1790_v15, %v5350_v50  ;;  %v2086_v49 = vmax.f32 %v1787_v12, 0.0 }
 0x3b9   :  { %v2087_v22 = vmax.f32 %v1789_v14, 0.0  ;;  %2053 = vmatmul.mubr.bf16.gmra.mrb[192].mxu1 %v5311_v25 }
 0x3ba   :  { %v2088_v23 = vmax.f32 %v1791_v6, 0.0  ;;  %2062 = vmatprep.mubr.bf16.mxu1 %v4590_v7 }
 0x3bb   :  { %v2239_v21 = vpack.c.bf16 %v2087_v22, %v2085_v19 }
 0x3bc   :  { %v2240_v30 = vpack.c.bf16 %v2088_v23, %v2086_v49  ;;  %v1794_v1 = vpop.f32.mrb[88].mxu1 }
 0x3bd   :  { %v1795_v2 = vadd.f32 %v1794_v1, %v5347_v46  ;;  %v1796_v38 = vpop.f32.mrb[89].mxu1 }
 0x3be   :  { %v1797_v20 = vadd.f32 %v1796_v38, %v5350_v50  ;;  %v1798_v26 = vpop.f32.mrb[90].mxu1  ;;  %2450 = vmatprep.mubr.bf16.mxu0 %v2240_v30 }
 0x3bf   :  { %v1799_v27 = vadd.f32 %v1798_v26, %v5347_v46  ;;  %v1800_v28 = vpop.f32.mrb[91].mxu1  ;;  %2451 = vmatmul.mubr.bf16.gmra.mrb[132].mxu0 %v2239_v21  ;;  %v2089_v48 = vmax.f32 %v1795_v2, 0.0 }
 0x3c0   :  { %v1801_v25 = vadd.f32 %v1800_v28, %v5350_v50  ;;  %v2090_v18 = vmax.f32 %v1797_v20, 0.0 }
 0x3c1   :  { %v2091_v29 = vmax.f32 %v1799_v27, 0.0  ;;  %2063 = vmatmul.mubr.bf16.gmra.mrb[196].mxu1 %v5309_v24 }
 0x3c2   :  { %v2092_v42 = vmax.f32 %v1801_v25, 0.0  ;;  %2982 = vmatprep.mubr.bf16.mxu1 %v4590_v7 }
 0x3c3   :  { %v2241_v39 = vpack.c.bf16 %v2091_v29, %v2089_v48 }
 0x3c4   :  { %v2242_v47 = vpack.c.bf16 %v2092_v42, %v2090_v18  ;;  %v1804_v34 = vpop.f32.mrb[92].mxu1 }
 0x3c5   :  { %v1805_v4 = vadd.f32 %v1804_v34, %v5347_v46  ;;  %v1806_v35 = vpop.f32.mrb[93].mxu1 }
 0x3c6   :  { %v1807_v36 = vadd.f32 %v1806_v35, %v5350_v50  ;;  %v1808_v37 = vpop.f32.mrb[94].mxu1  ;;  %2458 = vmatprep.mubr.bf16.mxu0 %v2242_v47 }
 0x3c7   :  { %v1809_v40 = vadd.f32 %v1808_v37, %v5347_v46  ;;  %v1810_v41 = vpop.f32.mrb[95].mxu1  ;;  %2459 = vmatmul.mubr.bf16.gmra.mrb[136].mxu0 %v2241_v39  ;;  %v2093_v43 = vmax.f32 %v1805_v4, 0.0 }
 0x3c8   :  { %v1811_v24 = vadd.f32 %v1810_v41, %v5350_v50  ;;  %v2094_v45 = vmax.f32 %v1807_v36, 0.0 }
 0x3c9   :  { %v2095_v44 = vmax.f32 %v1809_v40, 0.0 }
 0x3ca   :  { %v2096_v7 = vmax.f32 %v1811_v24, 0.0 }
 0x3cb   :  { %v2243_v33 = vpack.c.bf16 %v2095_v44, %v2093_v43 }
 0x3cc   :  { %v2244_v51 = vpack.c.bf16 %v2096_v7, %v2094_v45  ;;  %v1814_v52 = vpop.f32.mrb[96].mxu1 }
 0x3cd   :  { %v1815_v53 = vadd.f32 %v1814_v52, %v5347_v46  ;;  %v1816_v54 = vpop.f32.mrb[97].mxu1 }
 0x3ce   :  { %v1817_v55 = vadd.f32 %v1816_v54, %v5350_v50  ;;  %v1818_v0 = vpop.f32.mrb[98].mxu1  ;;  %2466 = vmatprep.mubr.bf16.mxu0 %v2244_v51 }
 0x3cf   :  { %v1819_v56 = vadd.f32 %v1818_v0, %v5347_v46  ;;  %v1820_v57 = vpop.f32.mrb[99].mxu1  ;;  %2467 = vmatmul.mubr.bf16.gmra.mrb[140].mxu0 %v2243_v33  ;;  %v2097_v59 = vmax.f32 %v1815_v53, 0.0 }
 0x3d0   :  { %v1821_v58 = vadd.f32 %v1820_v57, %v5350_v50  ;;  %v2098_v61 = vmax.f32 %v1817_v55, 0.0 }
 0x3d1   :  { %v2099_v60 = vmax.f32 %v1819_v56, 0.0 }
 0x3d2   :  { %v2100_v62 = vmax.f32 %v1821_v58, 0.0 }
 0x3d3   :  { %v2245_v32 = vpack.c.bf16 %v2099_v60, %v2097_v59 }
 0x3d4   :  { %v2246_v3 = vpack.c.bf16 %v2100_v62, %v2098_v61  ;;  %v1824_v5 = vpop.f32.mrb[100].mxu1 }
 0x3d5   :  { %v1825_v8 = vadd.f32 %v1824_v5, %v5347_v46  ;;  %v1826_v9 = vpop.f32.mrb[101].mxu1 }
 0x3d6   :  { %v1827_v63 = vadd.f32 %v1826_v9, %v5350_v50  ;;  %v1828_v10 = vpop.f32.mrb[102].mxu1  ;;  %2474 = vmatprep.mubr.bf16.mxu0 %v2246_v3 }
 0x3d7   :  { %v1829_v11 = vadd.f32 %v1828_v10, %v5347_v46  ;;  %v1830_v12 = vpop.f32.mrb[103].mxu1  ;;  %2475 = vmatmul.mubr.bf16.gmra.mrb[144].mxu0 %v2245_v32  ;;  %v2101_v14 = vmax.f32 %v1825_v8, 0.0 }
 0x3d8   :  { %v1831_v13 = vadd.f32 %v1830_v12, %v5350_v50  ;;  %v2102_v6 = vmax.f32 %v1827_v63, 0.0 }
 0x3d9   :  { %v2103_v15 = vmax.f32 %v1829_v11, 0.0 }
 0x3da   :  { %v2104_v19 = vmax.f32 %v1831_v13, 0.0 }
 0x3db   :  { %v2247_v22 = vpack.c.bf16 %v2103_v15, %v2101_v14 }
 0x3dc   :  { %v2248_v49 = vpack.c.bf16 %v2104_v19, %v2102_v6  ;;  %v1834_v23 = vpop.f32.mrb[104].mxu1 }
 0x3dd   :  { %v1835_v21 = vadd.f32 %v1834_v23, %v5347_v46  ;;  %v1836_v30 = vpop.f32.mrb[105].mxu1 }
 0x3de   :  { %v1837_v1 = vadd.f32 %v1836_v30, %v5350_v50  ;;  %v1838_v2 = vpop.f32.mrb[106].mxu1  ;;  %2482 = vmatprep.mubr.bf16.mxu0 %v2248_v49 }
 0x3df   :  { %v1839_v38 = vadd.f32 %v1838_v2, %v5347_v46  ;;  %v1840_v20 = vpop.f32.mrb[107].mxu1  ;;  %2483 = vmatmul.mubr.bf16.gmra.mrb[148].mxu0 %v2247_v22  ;;  %v2105_v27 = vmax.f32 %v1835_v21, 0.0 }
 0x3e0   :  { %v1841_v26 = vadd.f32 %v1840_v20, %v5350_v50  ;;  %v2106_v25 = vmax.f32 %v1837_v1, 0.0 }
 0x3e1   :  { %v2107_v28 = vmax.f32 %v1839_v38, 0.0 }
 0x3e2   :  { %v2108_v48 = vmax.f32 %v1841_v26, 0.0 }
 0x3e3   :  { %v2249_v29 = vpack.c.bf16 %v2107_v28, %v2105_v27 }
 0x3e4   :  { %v2250_v18 = vpack.c.bf16 %v2108_v48, %v2106_v25  ;;  %v1844_v42 = vpop.f32.mrb[108].mxu1 }
 0x3e5   :  { %v1845_v39 = vadd.f32 %v1844_v42, %v5347_v46  ;;  %v1846_v47 = vpop.f32.mrb[109].mxu1 }
 0x3e6   :  { %v1847_v34 = vadd.f32 %v1846_v47, %v5350_v50  ;;  %v1848_v4 = vpop.f32.mrb[110].mxu1  ;;  %2490 = vmatprep.mubr.bf16.mxu0 %v2250_v18 }
 0x3e7   :  { %v1849_v35 = vadd.f32 %v1848_v4, %v5347_v46  ;;  %v1850_v36 = vpop.f32.mrb[111].mxu1  ;;  %2491 = vmatmul.mubr.bf16.gmra.mrb[152].mxu0 %v2249_v29  ;;  %v2109_v40 = vmax.f32 %v1845_v39, 0.0 }
 0x3e8   :  { %v1851_v37 = vadd.f32 %v1850_v36, %v5350_v50  ;;  %v2110_v24 = vmax.f32 %v1847_v34, 0.0 }
 0x3e9   :  { %v2111_v41 = vmax.f32 %v1849_v35, 0.0 }
 0x3ea   :  { %v2112_v43 = vmax.f32 %v1851_v37, 0.0 }
 0x3eb   :  { %v2251_v44 = vpack.c.bf16 %v2111_v41, %v2109_v40 }
 0x3ec   :  { %v2252_v45 = vpack.c.bf16 %v2112_v43, %v2110_v24  ;;  %v1854_v7 = vpop.f32.mrb[112].mxu1 }
 0x3ed   :  { %v1855_v33 = vadd.f32 %v1854_v7, %v5347_v46  ;;  %v1856_v51 = vpop.f32.mrb[113].mxu1 }
 0x3ee   :  { %v1857_v52 = vadd.f32 %v1856_v51, %v5350_v50  ;;  %v1858_v53 = vpop.f32.mrb[114].mxu1  ;;  %2498 = vmatprep.mubr.bf16.mxu0 %v2252_v45 }
 0x3ef   :  { %v1859_v54 = vadd.f32 %v1858_v53, %v5347_v46  ;;  %v1860_v55 = vpop.f32.mrb[115].mxu1  ;;  %2499 = vmatmul.mubr.bf16.gmra.mrb[156].mxu0 %v2251_v44  ;;  %v2113_v56 = vmax.f32 %v1855_v33, 0.0 }
 0x3f0   :  { %v1861_v0 = vadd.f32 %v1860_v55, %v5350_v50  ;;  %v2114_v58 = vmax.f32 %v1857_v52, 0.0 }
 0x3f1   :  { %v2115_v57 = vmax.f32 %v1859_v54, 0.0 }
 0x3f2   :  { %v2116_v59 = vmax.f32 %v1861_v0, 0.0  ;;  %v4369_v0 = vld [vmem:[#allocation2 + $0x8] ss:$16 sps:$4 sm:$0xff]  }
 0x3f3   :  { %v2253_v60 = vpack.c.bf16 %v2115_v57, %v2113_v56  ;;  %v4371_v56 = vld [vmem:[#allocation2 + $0xc] ss:$16 sps:$4 sm:$0xff]  }
 0x3f4   :  { %v2254_v61 = vpack.c.bf16 %v2116_v59, %v2114_v58  ;;  %v1864_v62 = vpop.f32.mrb[116].mxu1  ;;  %2950 = vmatprep.subr.bf16.mxu1 %v4371_v56 }
 0x3f5   :  { %v1865_v32 = vadd.f32 %v1864_v62, %v5347_v46  ;;  %v1866_v3 = vpop.f32.mrb[117].mxu1  ;;  %2951 = vmatpush1.bf16.msra.mxu1 %v4369_v0  ;;  %v4374_v0 = vld [vmem:[#allocation2 + $0x2c] ss:$16 sps:$4 sm:$0xff]  }
 0x3f6   :  { %v1867_v5 = vadd.f32 %v1866_v3, %v5350_v50  ;;  %v1868_v8 = vpop.f32.mrb[118].mxu1  ;;  %2506 = vmatprep.mubr.bf16.mxu0 %v2254_v61  ;;  %2952 = vmatprep.subr.bf16.mxu1 %v4374_v0 }
 0x3f7   :  { %v1869_v9 = vadd.f32 %v1868_v8, %v5347_v46  ;;  %v1870_v63 = vpop.f32.mrb[119].mxu1  ;;  %2507 = vmatmul.mubr.bf16.gmra.mrb[160].mxu0 %v2253_v60  ;;  %v2117_v11 = vmax.f32 %v1865_v32, 0.0 }
 0x3f8   :  { %v1871_v10 = vadd.f32 %v1870_v63, %v5350_v50  ;;  %v2118_v13 = vmax.f32 %v1867_v5, 0.0 }
 0x3f9   :  { %v2119_v12 = vmax.f32 %v1869_v9, 0.0 }
 0x3fa   :  { %v2120_v14 = vmax.f32 %v1871_v10, 0.0 }
 0x3fb   :  { %v2255_v15 = vpack.c.bf16 %v2119_v12, %v2117_v11 }
 0x3fc   :  { %v2256_v6 = vpack.c.bf16 %v2120_v14, %v2118_v13  ;;  %v1874_v19 = vpop.f32.mrb[120].mxu1 }
 0x3fd   :  { %v1875_v22 = vadd.f32 %v1874_v19, %v5347_v46  ;;  %v1876_v49 = vpop.f32.mrb[121].mxu1 }
 0x3fe   :  { %v1877_v23 = vadd.f32 %v1876_v49, %v5350_v50  ;;  %v1878_v21 = vpop.f32.mrb[122].mxu1  ;;  %2514 = vmatprep.mubr.bf16.mxu0 %v2256_v6 }
 0x3ff   :  { %v1879_v30 = vadd.f32 %v1878_v21, %v5347_v46  ;;  %v1880_v1 = vpop.f32.mrb[123].mxu1  ;;  %2515 = vmatmul.mubr.bf16.gmra.mrb[164].mxu0 %v2255_v15  ;;  %v2121_v38 = vmax.f32 %v1875_v22, 0.0 }
 0x400   :  { %v1881_v2 = vadd.f32 %v1880_v1, %v5350_v50  ;;  %v2122_v26 = vmax.f32 %v1877_v23, 0.0 }
 0x401   :  { %v2123_v20 = vmax.f32 %v1879_v30, 0.0 }
 0x402   :  { %v2124_v27 = vmax.f32 %v1881_v2, 0.0 }
 0x403   :  { %v2257_v28 = vpack.c.bf16 %v2123_v20, %v2121_v38 }
 0x404   :  { %v2258_v25 = vpack.c.bf16 %v2124_v27, %v2122_v26  ;;  %v1884_v48 = vpop.f32.mrb[124].mxu1 }
 0x405   :  { %v1885_v29 = vadd.f32 %v1884_v48, %v5347_v46  ;;  %v1886_v18 = vpop.f32.mrb[125].mxu1 }
 0x406   :  { %v1887_v42 = vadd.f32 %v1886_v18, %v5350_v50  ;;  %v1888_v39 = vpop.f32.mrb[126].mxu1  ;;  %2522 = vmatprep.mubr.bf16.mxu0 %v2258_v25 }
 0x407   :  { %v1889_v47 = vadd.f32 %v1888_v39, %v5347_v46  ;;  %v1890_v34 = vpop.f32.mrb[127].mxu1  ;;  %2523 = vmatmul.mubr.bf16.gmra.mrb[168].mxu0 %v2257_v28  ;;  %v2125_v35 = vmax.f32 %v1885_v29, 0.0 }
 0x408   :  { %v1891_v4 = vadd.f32 %v1890_v34, %v5350_v50  ;;  %v2126_v37 = vmax.f32 %v1887_v42, 0.0 }
 0x409   :  { %v2127_v36 = vmax.f32 %v1889_v47, 0.0 }
 0x40a   :  { %v2128_v40 = vmax.f32 %v1891_v4, 0.0 }
 0x40b   :  { %v2259_v41 = vpack.c.bf16 %v2127_v36, %v2125_v35 }
 0x40c   :  { %v2260_v24 = vpack.c.bf16 %v2128_v40, %v2126_v37  ;;  %v1894_v43 = vpop.f32.mrb[128].mxu1 }
 0x40d   :  { %v1895_v44 = vadd.f32 %v1894_v43, %v5347_v46  ;;  %v1896_v45 = vpop.f32.mrb[129].mxu1 }
 0x40e   :  { %v1897_v7 = vadd.f32 %v1896_v45, %v5350_v50  ;;  %v1898_v33 = vpop.f32.mrb[130].mxu1  ;;  %2530 = vmatprep.mubr.bf16.mxu0 %v2260_v24 }
 0x40f   :  { %v1899_v51 = vadd.f32 %v1898_v33, %v5347_v46  ;;  %v1900_v52 = vpop.f32.mrb[131].mxu1  ;;  %2531 = vmatmul.mubr.bf16.gmra.mrb[172].mxu0 %v2259_v41  ;;  %v2129_v54 = vmax.f32 %v1895_v44, 0.0 }
 0x410   :  { %v1901_v53 = vadd.f32 %v1900_v52, %v5350_v50  ;;  %v2130_v57 = vmax.f32 %v1897_v7, 0.0 }
 0x411   :  { %v2131_v55 = vmax.f32 %v1899_v51, 0.0 }
 0x412   :  { %v2132_v58 = vmax.f32 %v1901_v53, 0.0 }
 0x413   :  { %v2261_v59 = vpack.c.bf16 %v2131_v55, %v2129_v54  ;;  %v4372_v55 = vld [vmem:[#allocation2 + $0x28] ss:$16 sps:$4 sm:$0xff]  }
 0x414   :  { %v2262_v60 = vpack.c.bf16 %v2132_v58, %v2130_v57  ;;  %v1904_v61 = vpop.f32.mrb[132].mxu1  ;;  %2953 = vmatpush1.bf16.msra.mxu1 %v4372_v55  ;;  %v4377_v55 = vld [vmem:[#allocation2 + $0x4c] ss:$16 sps:$4 sm:$0xff]  }
 0x415   :  { %v1905_v62 = vadd.f32 %v1904_v61, %v5347_v46  ;;  %v1906_v32 = vpop.f32.mrb[133].mxu1  ;;  %2954 = vmatprep.subr.bf16.mxu1 %v4377_v55 }
 0x416   :  { %v1907_v3 = vadd.f32 %v1906_v32, %v5350_v50  ;;  %v1908_v5 = vpop.f32.mrb[134].mxu1  ;;  %2538 = vmatprep.mubr.bf16.mxu0 %v2262_v60 }
 0x417   :  { %v1909_v8 = vadd.f32 %v1908_v5, %v5347_v46  ;;  %v1910_v9 = vpop.f32.mrb[135].mxu1  ;;  %2539 = vmatmul.mubr.bf16.gmra.mrb[176].mxu0 %v2261_v59  ;;  %v2133_v10 = vmax.f32 %v1905_v62, 0.0 }
 0x418   :  { %v1911_v63 = vadd.f32 %v1910_v9, %v5350_v50  ;;  %v2134_v12 = vmax.f32 %v1907_v3, 0.0 }
 0x419   :  { %v2135_v11 = vmax.f32 %v1909_v8, 0.0 }
 0x41a   :  { %v2136_v13 = vmax.f32 %v1911_v63, 0.0 }
 0x41b   :  { %v2263_v14 = vpack.c.bf16 %v2135_v11, %v2133_v10 }
 0x41c   :  { %v2264_v15 = vpack.c.bf16 %v2136_v13, %v2134_v12  ;;  %v1914_v6 = vpop.f32.mrb[136].mxu1 }
 0x41d   :  { %v1915_v19 = vadd.f32 %v1914_v6, %v5347_v46  ;;  %v1916_v22 = vpop.f32.mrb[137].mxu1 }
 0x41e   :  { %v1917_v49 = vadd.f32 %v1916_v22, %v5350_v50  ;;  %v1918_v23 = vpop.f32.mrb[138].mxu1  ;;  %2546 = vmatprep.mubr.bf16.mxu0 %v2264_v15 }
 0x41f   :  { %v1919_v21 = vadd.f32 %v1918_v23, %v5347_v46  ;;  %v1920_v30 = vpop.f32.mrb[139].mxu1  ;;  %2547 = vmatmul.mubr.bf16.gmra.mrb[180].mxu0 %v2263_v14  ;;  %v2137_v2 = vmax.f32 %v1915_v19, 0.0 }
 0x420   :  { %v1921_v1 = vadd.f32 %v1920_v30, %v5350_v50  ;;  %v2138_v20 = vmax.f32 %v1917_v49, 0.0 }
 0x421   :  { %v2139_v38 = vmax.f32 %v1919_v21, 0.0 }
 0x422   :  { %v2140_v26 = vmax.f32 %v1921_v1, 0.0 }
 0x423   :  { %v2265_v27 = vpack.c.bf16 %v2139_v38, %v2137_v2 }
 0x424   :  { %v2266_v28 = vpack.c.bf16 %v2140_v26, %v2138_v20  ;;  %v1924_v25 = vpop.f32.mrb[140].mxu1 }
 0x425   :  { %v1925_v48 = vadd.f32 %v1924_v25, %v5347_v46  ;;  %v1926_v29 = vpop.f32.mrb[141].mxu1 }
 0x426   :  { %v1927_v18 = vadd.f32 %v1926_v29, %v5350_v50  ;;  %v1928_v42 = vpop.f32.mrb[142].mxu1  ;;  %2554 = vmatprep.mubr.bf16.mxu0 %v2266_v28 }
 0x427   :  { %v1929_v39 = vadd.f32 %v1928_v42, %v5347_v46  ;;  %v1930_v47 = vpop.f32.mrb[143].mxu1  ;;  %2555 = vmatmul.mubr.bf16.gmra.mrb[184].mxu0 %v2265_v27  ;;  %v2141_v4 = vmax.f32 %v1925_v48, 0.0 }
 0x428   :  { %v1931_v34 = vadd.f32 %v1930_v47, %v5350_v50  ;;  %v2142_v36 = vmax.f32 %v1927_v18, 0.0 }
 0x429   :  { %v2143_v35 = vmax.f32 %v1929_v39, 0.0 }
 0x42a   :  { %v2144_v37 = vmax.f32 %v1931_v34, 0.0 }
 0x42b   :  { %v2267_v40 = vpack.c.bf16 %v2143_v35, %v2141_v4 }
 0x42c   :  { %v2268_v41 = vpack.c.bf16 %v2144_v37, %v2142_v36  ;;  %v1934_v24 = vpop.f32.mrb[144].mxu1 }
 0x42d   :  { %v1935_v43 = vadd.f32 %v1934_v24, %v5347_v46  ;;  %v1936_v44 = vpop.f32.mrb[145].mxu1 }
 0x42e   :  { %v1937_v45 = vadd.f32 %v1936_v44, %v5350_v50  ;;  %v1938_v7 = vpop.f32.mrb[146].mxu1  ;;  %2562 = vmatprep.mubr.bf16.mxu0 %v2268_v41 }
 0x42f   :  { %v1939_v33 = vadd.f32 %v1938_v7, %v5347_v46  ;;  %v1940_v51 = vpop.f32.mrb[147].mxu1  ;;  %2563 = vmatmul.mubr.bf16.gmra.mrb[188].mxu0 %v2267_v40  ;;  %v2145_v53 = vmax.f32 %v1935_v43, 0.0 }
 0x430   :  { %v1941_v52 = vadd.f32 %v1940_v51, %v5350_v50  ;;  %v2146_v56 = vmax.f32 %v1937_v45, 0.0 }
 0x431   :  { %v2147_v54 = vmax.f32 %v1939_v33, 0.0 }
 0x432   :  { %v2148_v57 = vmax.f32 %v1941_v52, 0.0 }
 0x433   :  { %v2269_v58 = vpack.c.bf16 %v2147_v54, %v2145_v53  ;;  %v4375_v54 = vld [vmem:[#allocation2 + $0x48] ss:$16 sps:$4 sm:$0xff]  }
 0x434   :  { %v2270_v59 = vpack.c.bf16 %v2148_v57, %v2146_v56  ;;  %v1944_v60 = vpop.f32.mrb[148].mxu1  ;;  %2955 = vmatpush1.bf16.msra.mxu1 %v4375_v54  ;;  %v4380_v54 = vld [vmem:[#allocation2 + $0x6c] ss:$16 sps:$4 sm:$0xff]  }
 0x435   :  { %v1945_v61 = vadd.f32 %v1944_v60, %v5347_v46  ;;  %v1946_v62 = vpop.f32.mrb[149].mxu1  ;;  %2956 = vmatprep.subr.bf16.mxu1 %v4380_v54 }
 0x436   :  { %v1947_v32 = vadd.f32 %v1946_v62, %v5350_v50  ;;  %v1948_v3 = vpop.f32.mrb[150].mxu1  ;;  %2570 = vmatprep.mubr.bf16.mxu0 %v2270_v59 }
 0x437   :  { %v1949_v5 = vadd.f32 %v1948_v3, %v5347_v46  ;;  %v1950_v8 = vpop.f32.mrb[151].mxu1  ;;  %2571 = vmatmul.mubr.bf16.gmra.mrb[192].mxu0 %v2269_v58  ;;  %v2149_v63 = vmax.f32 %v1945_v61, 0.0 }
 0x438   :  { %v1951_v9 = vadd.f32 %v1950_v8, %v5350_v50  ;;  %v2150_v11 = vmax.f32 %v1947_v32, 0.0 }
 0x439   :  { %v2151_v10 = vmax.f32 %v1949_v5, 0.0 }
 0x43a   :  { %v2152_v12 = vmax.f32 %v1951_v9, 0.0 }
 0x43b   :  { %v2271_v13 = vpack.c.bf16 %v2151_v10, %v2149_v63 }
 0x43c   :  { %v2272_v14 = vpack.c.bf16 %v2152_v12, %v2150_v11  ;;  %v1954_v15 = vpop.f32.mrb[152].mxu1 }
 0x43d   :  { %v1955_v6 = vadd.f32 %v1954_v15, %v5347_v46  ;;  %v1956_v19 = vpop.f32.mrb[153].mxu1 }
 0x43e   :  { %v1957_v22 = vadd.f32 %v1956_v19, %v5350_v50  ;;  %v1958_v49 = vpop.f32.mrb[154].mxu1  ;;  %2578 = vmatprep.mubr.bf16.mxu0 %v2272_v14 }
 0x43f   :  { %v1959_v23 = vadd.f32 %v1958_v49, %v5347_v46  ;;  %v1960_v21 = vpop.f32.mrb[155].mxu1  ;;  %2579 = vmatmul.mubr.bf16.gmra.mrb[196].mxu0 %v2271_v13  ;;  %v2153_v1 = vmax.f32 %v1955_v6, 0.0 }
 0x440   :  { %v1961_v30 = vadd.f32 %v1960_v21, %v5350_v50  ;;  %v2154_v38 = vmax.f32 %v1957_v22, 0.0 }
 0x441   :  { %v2155_v2 = vmax.f32 %v1959_v23, 0.0 }
 0x442   :  { %v2156_v20 = vmax.f32 %v1961_v30, 0.0 }
 0x443   :  { %v2273_v26 = vpack.c.bf16 %v2155_v2, %v2153_v1 }
 0x444   :  { %v2274_v27 = vpack.c.bf16 %v2156_v20, %v2154_v38  ;;  %v1964_v28 = vpop.f32.mrb[156].mxu1 }
 0x445   :  { %v1965_v25 = vadd.f32 %v1964_v28, %v5347_v46  ;;  %v1966_v48 = vpop.f32.mrb[157].mxu1 }
 0x446   :  { %v1967_v29 = vadd.f32 %v1966_v48, %v5350_v50  ;;  %v1968_v18 = vpop.f32.mrb[158].mxu1  ;;  %2586 = vmatprep.mubr.bf16.mxu0 %v2274_v27 }
 0x447   :  { %v1969_v42 = vadd.f32 %v1968_v18, %v5347_v46  ;;  %v1970_v39 = vpop.f32.mrb[159].mxu1  ;;  %2587 = vmatmul.mubr.bf16.gmra.mrb[200].mxu0 %v2273_v26  ;;  %v2157_v34 = vmax.f32 %v1965_v25, 0.0 }
 0x448   :  { %v1971_v47 = vadd.f32 %v1970_v39, %v5350_v50  ;;  %v2158_v35 = vmax.f32 %v1967_v29, 0.0 }
 0x449   :  { %v2159_v4 = vmax.f32 %v1969_v42, 0.0 }
 0x44a   :  { %v2160_v36 = vmax.f32 %v1971_v47, 0.0 }
 0x44b   :  { %v2275_v37 = vpack.c.bf16 %v2159_v4, %v2157_v34 }
 0x44c   :  { %v2276_v40 = vpack.c.bf16 %v2160_v36, %v2158_v35  ;;  %v1974_v41 = vpop.f32.mrb[160].mxu1 }
 0x44d   :  { %v1975_v24 = vadd.f32 %v1974_v41, %v5347_v46  ;;  %v1976_v43 = vpop.f32.mrb[161].mxu1 }
 0x44e   :  { %v1977_v44 = vadd.f32 %v1976_v43, %v5350_v50  ;;  %v1978_v45 = vpop.f32.mrb[162].mxu1  ;;  %2594 = vmatprep.mubr.bf16.mxu0 %v2276_v40 }
 0x44f   :  { %v1979_v7 = vadd.f32 %v1978_v45, %v5347_v46  ;;  %v1980_v33 = vpop.f32.mrb[163].mxu1  ;;  %2595 = vmatmul.mubr.bf16.gmra.mrb[204].mxu0 %v2275_v37  ;;  %v2161_v52 = vmax.f32 %v1975_v24, 0.0 }
 0x450   :  { %v1981_v51 = vadd.f32 %v1980_v33, %v5350_v50  ;;  %v2162_v0 = vmax.f32 %v1977_v44, 0.0 }
 0x451   :  { %v2163_v53 = vmax.f32 %v1979_v7, 0.0 }
 0x452   :  { %v2164_v56 = vmax.f32 %v1981_v51, 0.0 }
 0x453   :  { %v2277_v57 = vpack.c.bf16 %v2163_v53, %v2161_v52  ;;  %v4378_v53 = vld [vmem:[#allocation2 + $0x68] ss:$16 sps:$4 sm:$0xff]  }
 0x454   :  { %v2278_v58 = vpack.c.bf16 %v2164_v56, %v2162_v0  ;;  %v1984_v59 = vpop.f32.mrb[164].mxu1  ;;  %2957 = vmatpush1.bf16.msra.mxu1 %v4378_v53 }
 0x455   :  { %v1985_v60 = vadd.f32 %v1984_v59, %v5347_v46  ;;  %v1986_v61 = vpop.f32.mrb[165].mxu1 }
 0x456   :  { %v1987_v62 = vadd.f32 %v1986_v61, %v5350_v50  ;;  %v1988_v32 = vpop.f32.mrb[166].mxu1  ;;  %2602 = vmatprep.mubr.bf16.mxu0 %v2278_v58 }
 0x457   :  { %v1989_v3 = vadd.f32 %v1988_v32, %v5347_v46  ;;  %v1990_v5 = vpop.f32.mrb[167].mxu1  ;;  %2603 = vmatmul.mubr.bf16.gmra.mrb[208].mxu0 %v2277_v57  ;;  %v2165_v9 = vmax.f32 %v1985_v60, 0.0 }
 0x458   :  { %v1991_v8 = vadd.f32 %v1990_v5, %v5350_v50  ;;  %v2166_v10 = vmax.f32 %v1987_v62, 0.0 }
 0x459   :  { %v2167_v63 = vmax.f32 %v1989_v3, 0.0 }
 0x45a   :  { %v2168_v11 = vmax.f32 %v1991_v8, 0.0  ;;  %v5478_v8 = vld [vmem:[%s5717_s7 + $0x4] ss:$0 sm:$0xff] }
 0x45b   :  { %v2279_v12 = vpack.c.bf16 %v2167_v63, %v2165_v9 }
 0x45c   :  { %v2280_v13 = vpack.c.bf16 %v2168_v11, %v2166_v10  ;;  %v1994_v14 = vpop.f32.mrb[168].mxu1 }
 0x45d   :  { %v1995_v15 = vadd.f32 %v1994_v14, %v5347_v46  ;;  %v1996_v6 = vpop.f32.mrb[169].mxu1 }
 0x45e   :  { %v1997_v19 = vadd.f32 %v1996_v6, %v5350_v50  ;;  %v1998_v22 = vpop.f32.mrb[170].mxu1  ;;  %2610 = vmatprep.mubr.bf16.mxu0 %v2280_v13 }
 0x45f   :  { %v1999_v49 = vadd.f32 %v1998_v22, %v5347_v46  ;;  %v2000_v23 = vpop.f32.mrb[171].mxu1  ;;  %2611 = vmatmul.mubr.bf16.gmra.mrb[212].mxu0 %v2279_v12  ;;  %v2169_v30 = vmax.f32 %v1995_v15, 0.0 }
 0x460   :  { %v2001_v21 = vadd.f32 %v2000_v23, %v5350_v50  ;;  %v2170_v2 = vmax.f32 %v1997_v19, 0.0 }
 0x461   :  { %v2171_v1 = vmax.f32 %v1999_v49, 0.0 }
 0x462   :  { %v2172_v38 = vmax.f32 %v2001_v21, 0.0 }
 0x463   :  { %v2281_v20 = vpack.c.bf16 %v2171_v1, %v2169_v30 }
 0x464   :  { %v2282_v26 = vpack.c.bf16 %v2172_v38, %v2170_v2  ;;  %v2004_v27 = vpop.f32.mrb[172].mxu1 }
 0x465   :  { %v2005_v28 = vadd.f32 %v2004_v27, %v5347_v46  ;;  %v2006_v25 = vpop.f32.mrb[173].mxu1 }
 0x466   :  { %v2007_v48 = vadd.f32 %v2006_v25, %v5350_v50  ;;  %v2008_v29 = vpop.f32.mrb[174].mxu1  ;;  %2618 = vmatprep.mubr.bf16.mxu0 %v2282_v26 }
 0x467   :  { %v2009_v18 = vadd.f32 %v2008_v29, %v5347_v46  ;;  %v2010_v42 = vpop.f32.mrb[175].mxu1  ;;  %2619 = vmatmul.mubr.bf16.gmra.mrb[216].mxu0 %v2281_v20  ;;  %v2173_v47 = vmax.f32 %v2005_v28, 0.0 }
 0x468   :  { %v2011_v39 = vadd.f32 %v2010_v42, %v5350_v50  ;;  %v2174_v4 = vmax.f32 %v2007_v48, 0.0 }
 0x469   :  { %v2175_v34 = vmax.f32 %v2009_v18, 0.0 }
 0x46a   :  { %v2176_v35 = vmax.f32 %v2011_v39, 0.0 }
 0x46b   :  { %v2283_v36 = vpack.c.bf16 %v2175_v34, %v2173_v47 }
 0x46c   :  { %v2284_v37 = vpack.c.bf16 %v2176_v35, %v2174_v4  ;;  %v2014_v40 = vpop.f32.mrb[176].mxu1 }
 0x46d   :  { %v2015_v41 = vadd.f32 %v2014_v40, %v5347_v46  ;;  %v2016_v24 = vpop.f32.mrb[177].mxu1 }
 0x46e   :  { %v2017_v43 = vadd.f32 %v2016_v24, %v5350_v50  ;;  %v2018_v44 = vpop.f32.mrb[178].mxu1  ;;  %2626 = vmatprep.mubr.bf16.mxu0 %v2284_v37 }
 0x46f   :  { %v2019_v45 = vadd.f32 %v2018_v44, %v5347_v46  ;;  %v2020_v7 = vpop.f32.mrb[179].mxu1  ;;  %2627 = vmatmul.mubr.bf16.gmra.mrb[220].mxu0 %v2283_v36  ;;  %v2177_v51 = vmax.f32 %v2015_v41, 0.0 }
 0x470   :  { %v2021_v33 = vadd.f32 %v2020_v7, %v5350_v50  ;;  %v2178_v55 = vmax.f32 %v2017_v43, 0.0 }
 0x471   :  { %v2179_v52 = vmax.f32 %v2019_v45, 0.0 }
 0x472   :  { %v2180_v0 = vmax.f32 %v2021_v33, 0.0 }
 0x473   :  { %v2285_v56 = vpack.c.bf16 %v2179_v52, %v2177_v51 }
 0x474   :  { %v2286_v57 = vpack.c.bf16 %v2180_v0, %v2178_v55  ;;  %v2024_v58 = vpop.f32.mrb[180].mxu1 }
 0x475   :  { %v2025_v59 = vadd.f32 %v2024_v58, %v5347_v46  ;;  %v2026_v60 = vpop.f32.mrb[181].mxu1 }
 0x476   :  { %v2027_v61 = vadd.f32 %v2026_v60, %v5350_v50  ;;  %v2028_v62 = vpop.f32.mrb[182].mxu1  ;;  %2634 = vmatprep.mubr.bf16.mxu0 %v2286_v57 }
 0x477   :  { %v2029_v32 = vadd.f32 %v2028_v62, %v5347_v46  ;;  %v2030_v3 = vpop.f32.mrb[183].mxu1  ;;  %2635 = vmatmul.mubr.bf16.gmra.mrb[224].mxu0 %v2285_v56  ;;  %v2181_v9 = vmax.f32 %v2025_v59, 0.0 }
 0x478   :  { %v2031_v5 = vadd.f32 %v2030_v3, %v5350_v50  ;;  %v2182_v10 = vmax.f32 %v2027_v61, 0.0 }
 0x479   :  { %v2183_v63 = vmax.f32 %v2029_v32, 0.0 }
 0x47a   :  { %v2184_v11 = vmax.f32 %v2031_v5, 0.0  ;;  %v2428_v12 = vpop.f32.mrb[120].mxu0 }
 0x47b   :  { %v2287_v13 = vpack.c.bf16 %v2183_v63, %v2181_v9  ;;  %v2429_v14 = vadd.f32 %v2428_v12, %v5478_v8  ;;  %v2430_v15 = vpop.f32.mrb[121].mxu0 }
 0x47c   :  { %v2288_v6 = vpack.c.bf16 %v2184_v11, %v2182_v10  ;;  %v2034_v19 = vpop.f32.mrb[184].mxu1  ;;  %v2431_v22 = vpop.f32.mrb[122].mxu0 }
 0x47d   :  { %v2035_v49 = vadd.f32 %v2034_v19, %v5347_v46  ;;  %v2432_v23 = vadd.f32 %v2431_v22, %v5478_v8  ;;  %v2036_v21 = vpop.f32.mrb[185].mxu1  ;;  %v2433_v30 = vpop.f32.mrb[123].mxu0  ;;  %v2683_v38 = vmax.f32 %v2429_v14, 0.0 }
 0x47e   :  { %v2037_v1 = vadd.f32 %v2036_v21, %v5350_v50  ;;  %v2038_v2 = vpop.f32.mrb[186].mxu1  ;;  %2642 = vmatprep.mubr.bf16.mxu0 %v2288_v6 }
 0x47f   :  { %v2684_v20 = vmax.f32 %v2432_v23, 0.0  ;;  %v2039_v26 = vadd.f32 %v2038_v2, %v5347_v46  ;;  %v2040_v27 = vpop.f32.mrb[187].mxu1  ;;  %2643 = vmatmul.mubr.bf16.gmra.mrb[228].mxu0 %v2287_v13  ;;  %v2185_v25 = vmax.f32 %v2035_v49, 0.0  ;;  %v4383_v2 = vld [vmem:[#allocation2 + $0x8c] ss:$16 sps:$4 sm:$0xff]  }
 0x480   :  { %v2041_v28 = vadd.f32 %v2040_v27, %v5350_v50  ;;  %v2186_v18 = vmax.f32 %v2037_v1, 0.0  ;;  %v4381_v1 = vld [vmem:[#allocation2 + $0x88] ss:$16 sps:$4 sm:$0xff]   ;;  %2958 = vmatprep.subr.bf16.mxu1 %v4383_v2  ;;  %v4386_v2 = vld [vmem:[#allocation2 + $0xac] ss:$16 sps:$4 sm:$0xff]  }
 0x481   :  { %v2747_v48 = vmax.f32 %v2683_v38, %v2684_v20  ;;  %v2187_v29 = vmax.f32 %v2039_v26, 0.0  ;;  %2959 = vmatpush1.bf16.msra.mxu1 %v4381_v1  ;;  %v4384_v1 = vld [vmem:[#allocation2 + $0xa8] ss:$16 sps:$4 sm:$0xff]  }
 0x482   :  { %v2188_v42 = vmax.f32 %v2041_v28, 0.0  ;;  %v2436_v39 = vpop.f32.mrb[124].mxu0  ;;  %2960 = vmatprep.subr.bf16.mxu1 %v4386_v2 }
 0x483   :  { %v2289_v47 = vpack.c.bf16 %v2187_v29, %v2185_v25  ;;  %v2437_v34 = vadd.f32 %v2436_v39, %v5478_v8  ;;  %v2438_v4 = vpop.f32.mrb[125].mxu0 }
 0x484   :  { %v2290_v35 = vpack.c.bf16 %v2188_v42, %v2186_v18  ;;  %v2044_v36 = vpop.f32.mrb[188].mxu1  ;;  %v2439_v37 = vpop.f32.mrb[126].mxu0 }
 0x485   :  { %v2685_v40 = vmax.f32 %v2437_v34, 0.0  ;;  %v2045_v41 = vadd.f32 %v2044_v36, %v5347_v46  ;;  %v2440_v24 = vadd.f32 %v2439_v37, %v5478_v8  ;;  %v2046_v43 = vpop.f32.mrb[189].mxu1  ;;  %v2441_v44 = vpop.f32.mrb[127].mxu0  ;;  %2961 = vmatpush1.bf16.msra.mxu1 %v4384_v1 }
 0x486   :  { %v2047_v45 = vadd.f32 %v2046_v43, %v5350_v50  ;;  %v2048_v7 = vpop.f32.mrb[190].mxu1  ;;  %2650 = vmatprep.mubr.bf16.mxu0 %v2290_v35 }
 0x487   :  { %v2748_v33 = vmax.f32 %v2747_v48, %v2685_v40  ;;  %v2686_v51 = vmax.f32 %v2440_v24, 0.0  ;;  %v2049_v52 = vadd.f32 %v2048_v7, %v5347_v46  ;;  %v2050_v53 = vpop.f32.mrb[191].mxu1  ;;  %2651 = vmatmul.mubr.bf16.gmra.mrb[232].mxu0 %v2289_v47  ;;  %v2189_v55 = vmax.f32 %v2045_v41, 0.0 }
 0x488   :  { %v2051_v54 = vadd.f32 %v2050_v53, %v5350_v50  ;;  %v2190_v57 = vmax.f32 %v2047_v45, 0.0 }
 0x489   :  { %v2749_v0 = vmax.f32 %v2748_v33, %v2686_v51  ;;  %v2191_v56 = vmax.f32 %v2049_v52, 0.0 }
 0x48a   :  { %v2192_v58 = vmax.f32 %v2051_v54, 0.0  ;;  %v2444_v59 = vpop.f32.mrb[128].mxu0 }
 0x48b   :  { %v2291_v60 = vpack.c.bf16 %v2191_v56, %v2189_v55  ;;  %v2445_v61 = vadd.f32 %v2444_v59, %v5478_v8  ;;  %v2446_v62 = vpop.f32.mrb[129].mxu0 }
 0x48c   :  { %v2292_v32 = vpack.c.bf16 %v2192_v58, %v2190_v57  ;;  %v2054_v3 = vpop.f32.mrb[192].mxu1  ;;  %v2447_v5 = vpop.f32.mrb[130].mxu0 }
 0x48d   :  { %v2687_v9 = vmax.f32 %v2445_v61, 0.0  ;;  %v2055_v63 = vadd.f32 %v2054_v3, %v5347_v46  ;;  %v2448_v10 = vadd.f32 %v2447_v5, %v5478_v8  ;;  %v2056_v11 = vpop.f32.mrb[193].mxu1  ;;  %v2449_v12 = vpop.f32.mrb[131].mxu0 }
 0x48e   :  { %v2057_v13 = vadd.f32 %v2056_v11, %v5350_v50  ;;  %v2058_v14 = vpop.f32.mrb[194].mxu1  ;;  %2658 = vmatprep.mubr.bf16.mxu0 %v2292_v32 }
 0x48f   :  { %v2750_v15 = vmax.f32 %v2749_v0, %v2687_v9  ;;  %v2688_v6 = vmax.f32 %v2448_v10, 0.0  ;;  %v2059_v19 = vadd.f32 %v2058_v14, %v5347_v46  ;;  %v2060_v22 = vpop.f32.mrb[195].mxu1  ;;  %2659 = vmatmul.mubr.bf16.gmra.mrb[236].mxu0 %v2291_v60  ;;  %v2193_v23 = vmax.f32 %v2055_v63, 0.0 }
 0x490   :  { %v2061_v49 = vadd.f32 %v2060_v22, %v5350_v50  ;;  %v2194_v38 = vmax.f32 %v2057_v13, 0.0 }
 0x491   :  { %v2751_v21 = vmax.f32 %v2750_v15, %v2688_v6  ;;  %v2195_v30 = vmax.f32 %v2059_v19, 0.0 }
 0x492   :  { %v2196_v20 = vmax.f32 %v2061_v49, 0.0  ;;  %v2452_v26 = vpop.f32.mrb[132].mxu0 }
 0x493   :  { %v2293_v27 = vpack.c.bf16 %v2195_v30, %v2193_v23  ;;  %v2453_v28 = vadd.f32 %v2452_v26, %v5478_v8  ;;  %v2454_v25 = vpop.f32.mrb[133].mxu0 }
 0x494   :  { %v2294_v48 = vpack.c.bf16 %v2196_v20, %v2194_v38  ;;  %v2064_v29 = vpop.f32.mrb[196].mxu1  ;;  %v2455_v18 = vpop.f32.mrb[134].mxu0 }
 0x495   :  { %v2689_v42 = vmax.f32 %v2453_v28, 0.0  ;;  %v2065_v39 = vadd.f32 %v2064_v29, %v5347_v46  ;;  %v2456_v47 = vadd.f32 %v2455_v18, %v5478_v8  ;;  %v2066_v34 = vpop.f32.mrb[197].mxu1  ;;  %v2457_v4 = vpop.f32.mrb[135].mxu0 }
 0x496   :  { %v2067_v35 = vadd.f32 %v2066_v34, %v5350_v50  ;;  %v2068_v36 = vpop.f32.mrb[198].mxu1  ;;  %2666 = vmatprep.mubr.bf16.mxu0 %v2294_v48 }
 0x497   :  { %v2752_v37 = vmax.f32 %v2751_v21, %v2689_v42  ;;  %v2690_v40 = vmax.f32 %v2456_v47, 0.0  ;;  %v2069_v41 = vadd.f32 %v2068_v36, %v5347_v46  ;;  %v2070_v24 = vpop.f32.mrb[199].mxu1  ;;  %2667 = vmatmul.mubr.bf16.gmra.mrb[240].mxu0 %v2293_v27  ;;  %v2197_v44 = vmax.f32 %v2065_v39, 0.0 }
 0x498   :  { %v2071_v43 = vadd.f32 %v2070_v24, %v5350_v50  ;;  %v2198_v33 = vmax.f32 %v2067_v35, 0.0 }
 0x499   :  { %v2753_v45 = vmax.f32 %v2752_v37, %v2690_v40  ;;  %v2199_v7 = vmax.f32 %v2069_v41, 0.0 }
 0x49a   :  { %v2200_v51 = vmax.f32 %v2071_v43, 0.0  ;;  %v2460_v52 = vpop.f32.mrb[136].mxu0 }
 0x49b   :  { %v2295_v53 = vpack.c.bf16 %v2199_v7, %v2197_v44  ;;  %v2461_v54 = vadd.f32 %v2460_v52, %v5478_v8  ;;  %v2462_v55 = vpop.f32.mrb[137].mxu0 }
 0x49c   :  { %v2296_v0 = vpack.c.bf16 %v2200_v51, %v2198_v33  ;;  %v2463_v56 = vpop.f32.mrb[138].mxu0 }
 0x49d   :  { %v2691_v57 = vmax.f32 %v2461_v54, 0.0  ;;  %v2464_v58 = vadd.f32 %v2463_v56, %v5478_v8  ;;  %v2465_v46 = vpop.f32.mrb[139].mxu0 }
 0x49e   :  { %2674 = vmatprep.mubr.bf16.mxu0 %v2296_v0 }
 0x49f   :  { %v2754_v59 = vmax.f32 %v2753_v45, %v2691_v57  ;;  %v2692_v60 = vmax.f32 %v2464_v58, 0.0  ;;  %2675 = vmatmul.mubr.bf16.gmra.mrb[244].mxu0 %v2295_v53 }
 0x4a1   :  { %v2755_v50 = vmax.f32 %v2754_v59, %v2692_v60 }
 0x4a2   :  { %v2468_v61 = vpop.f32.mrb[140].mxu0 }
 0x4a3   :  { %v2469_v62 = vadd.f32 %v2468_v61, %v5478_v8  ;;  %v2470_v32 = vpop.f32.mrb[141].mxu0 }
 0x4a4   :  { %v2471_v3 = vpop.f32.mrb[142].mxu0  ;;  %v4389_v32 = vld [vmem:[#allocation2 + $0xcc] ss:$16 sps:$4 sm:$0xff]  }
 0x4a5   :  { %v2693_v5 = vmax.f32 %v2469_v62, 0.0  ;;  %v2472_v9 = vadd.f32 %v2471_v3, %v5478_v8  ;;  %v2473_v63 = vpop.f32.mrb[143].mxu0  ;;  %v4387_v62 = vld [vmem:[#allocation2 + $0xc8] ss:$16 sps:$4 sm:$0xff]   ;;  %2962 = vmatprep.subr.bf16.mxu1 %v4389_v32 }
 0x4a6   :  { %2963 = vmatpush1.bf16.msra.mxu1 %v4387_v62 }
 0x4a7   :  { %v2756_v10 = vmax.f32 %v2755_v50, %v2693_v5  ;;  %v2694_v11 = vmax.f32 %v2472_v9, 0.0 }
 0x4a9   :  { %v2757_v12 = vmax.f32 %v2756_v10, %v2694_v11 }
 0x4aa   :  { %v2476_v13 = vpop.f32.mrb[144].mxu0 }
 0x4ab   :  { %v2477_v14 = vadd.f32 %v2476_v13, %v5478_v8  ;;  %v2478_v15 = vpop.f32.mrb[145].mxu0 }
 0x4ac   :  { %v2479_v6 = vpop.f32.mrb[146].mxu0 }
 0x4ad   :  { %v2695_v19 = vmax.f32 %v2477_v14, 0.0  ;;  %v2480_v22 = vadd.f32 %v2479_v6, %v5478_v8  ;;  %v2481_v49 = vpop.f32.mrb[147].mxu0 }
 0x4af   :  { %v2758_v23 = vmax.f32 %v2757_v12, %v2695_v19  ;;  %v2696_v21 = vmax.f32 %v2480_v22, 0.0 }
 0x4b1   :  { %v2759_v30 = vmax.f32 %v2758_v23, %v2696_v21 }
 0x4b2   :  { %v2484_v38 = vpop.f32.mrb[148].mxu0 }
 0x4b3   :  { %v2485_v20 = vadd.f32 %v2484_v38, %v5478_v8  ;;  %v2486_v26 = vpop.f32.mrb[149].mxu0 }
 0x4b4   :  { %v2487_v27 = vpop.f32.mrb[150].mxu0 }
 0x4b5   :  { %v2697_v28 = vmax.f32 %v2485_v20, 0.0  ;;  %v2488_v25 = vadd.f32 %v2487_v27, %v5478_v8  ;;  %v2489_v48 = vpop.f32.mrb[151].mxu0 }
 0x4b7   :  { %v2760_v29 = vmax.f32 %v2759_v30, %v2697_v28  ;;  %v2698_v18 = vmax.f32 %v2488_v25, 0.0 }
 0x4b9   :  { %v5512_v42 = vmax.f32 %v2760_v29, %v2698_v18 }
 0x4ba   :  { %v2492_v39 = vpop.f32.mrb[152].mxu0 }
 0x4bb   :  { %v2493_v47 = vadd.f32 %v2492_v39, %v5478_v8  ;;  %v2494_v34 = vpop.f32.mrb[153].mxu0 }
 0x4bc   :  { %v2495_v4 = vpop.f32.mrb[154].mxu0 }
 0x4bd   :  { %v2496_v35 = vadd.f32 %v2495_v4, %v5478_v8  ;;  %v2497_v36 = vpop.f32.mrb[155].mxu0  ;;  %v2699_v37 = vmax.f32 %v2493_v47, 0.0 }
 0x4bf   :  { %v2700_v40 = vmax.f32 %v2496_v35, 0.0 }
 0x4c1   :  { %v2768_v41 = vmax.f32 %v2699_v37, %v2700_v40 }
 0x4c2   :  { %v2500_v24 = vpop.f32.mrb[156].mxu0 }
 0x4c3   :  { %v2501_v43 = vadd.f32 %v2500_v24, %v5478_v8  ;;  %v2502_v44 = vpop.f32.mrb[157].mxu0  ;;  %v2762_v24 = vrot.slane %v5512_v42, 4 }
 0x4c4   :  { %v2503_v45 = vpop.f32.mrb[158].mxu0 }
 0x4c5   :  { %v2701_v7 = vmax.f32 %v2501_v43, 0.0  ;;  %v2504_v33 = vadd.f32 %v2503_v45, %v5478_v8  ;;  %v2505_v51 = vpop.f32.mrb[159].mxu0 }
 0x4c7   :  { %v2769_v52 = vmax.f32 %v2768_v41, %v2701_v7  ;;  %v2702_v53 = vmax.f32 %v2504_v33, 0.0  ;;  %v4390_v7 = vld [vmem:[#allocation2 + $0xe8] ss:$16 sps:$4 sm:$0xff]   ;;  %v4392_v33 = vld [vmem:[#allocation2 + $0xec] ss:$16 sps:$4 sm:$0xff]  }
 0x4c8   :  { %2964 = vmatprep.subr.bf16.mxu1 %v4392_v33 }
 0x4c9   :  { %v2770_v54 = vmax.f32 %v2769_v52, %v2702_v53  ;;  %v2763_v52 = vmax.f32 %v5512_v42, %v2762_v24  ;;  %2965 = vmatpush1.bf16.msra.mxu1 %v4390_v7 }
 0x4ca   :  { %v2508_v55 = vpop.f32.mrb[160].mxu0 }
 0x4cb   :  { %v2509_v0 = vadd.f32 %v2508_v55, %v5478_v8  ;;  %v2510_v56 = vpop.f32.mrb[161].mxu0 }
 0x4cc   :  { %v2511_v57 = vpop.f32.mrb[162].mxu0 }
 0x4cd   :  { %v2703_v58 = vmax.f32 %v2509_v0, 0.0  ;;  %v2512_v46 = vadd.f32 %v2511_v57, %v5478_v8  ;;  %v2513_v59 = vpop.f32.mrb[163].mxu0 }
 0x4cf   :  { %v2771_v60 = vmax.f32 %v2770_v54, %v2703_v58  ;;  %v2704_v50 = vmax.f32 %v2512_v46, 0.0  ;;  %v2764_v58 = vrot.slane %v2763_v52, 2 }
 0x4d1   :  { %v2772_v61 = vmax.f32 %v2771_v60, %v2704_v50 }
 0x4d2   :  { %v2516_v3 = vpop.f32.mrb[164].mxu0 }
 0x4d3   :  { %v2517_v5 = vadd.f32 %v2516_v3, %v5478_v8  ;;  %v2518_v9 = vpop.f32.mrb[165].mxu0 }
 0x4d4   :  { %v2519_v63 = vpop.f32.mrb[166].mxu0 }
 0x4d5   :  { %v2705_v10 = vmax.f32 %v2517_v5, 0.0  ;;  %v2520_v11 = vadd.f32 %v2519_v63, %v5478_v8  ;;  %v2521_v12 = vpop.f32.mrb[167].mxu0 }
 0x4d7   :  { %v2773_v13 = vmax.f32 %v2772_v61, %v2705_v10  ;;  %v2706_v14 = vmax.f32 %v2520_v11, 0.0  ;;  %v2765_v61 = vmax.f32 %v2763_v52, %v2764_v58 }
 0x4d9   :  { %v2774_v15 = vmax.f32 %v2773_v13, %v2706_v14  ;;  %v2766_v10 = vrot.slane %v2765_v61, 1 }
 0x4da   :  { %v2524_v6 = vpop.f32.mrb[168].mxu0 }
 0x4db   :  { %v2525_v19 = vadd.f32 %v2524_v6, %v5478_v8  ;;  %v2526_v22 = vpop.f32.mrb[169].mxu0 }
 0x4dc   :  { %v2527_v49 = vpop.f32.mrb[170].mxu0 }
 0x4dd   :  { %v2707_v23 = vmax.f32 %v2525_v19, 0.0  ;;  %v2528_v21 = vadd.f32 %v2527_v49, %v5478_v8  ;;  %v2529_v30 = vpop.f32.mrb[171].mxu0 }
 0x4df   :  { %v2775_v1 = vmax.f32 %v2774_v15, %v2707_v23  ;;  %v2708_v2 = vmax.f32 %v2528_v21, 0.0  ;;  %v5535_v23 = vmax.f32 %v2765_v61, %v2766_v10 }
 0x4e1   :  { %v2776_v38 = vmax.f32 %v2775_v1, %v2708_v2 }
 0x4e2   :  { %v2532_v20 = vpop.f32.mrb[172].mxu0 }
 0x4e3   :  { %v2533_v26 = vadd.f32 %v2532_v20, %v5478_v8  ;;  %v2534_v27 = vpop.f32.mrb[173].mxu0 }
 0x4e4   :  { %v2535_v28 = vpop.f32.mrb[174].mxu0  ;;  %v3673_v27 = vmul.f32 %v5535_v23, %v5535_v23 }
 0x4e5   :  { %v2709_v25 = vmax.f32 %v2533_v26, 0.0  ;;  %v2536_v48 = vadd.f32 %v2535_v28, %v5478_v8  ;;  %v2537_v29 = vpop.f32.mrb[175].mxu0 }
 0x4e7   :  { %v2777_v18 = vmax.f32 %v2776_v38, %v2709_v25  ;;  %v2710_v39 = vmax.f32 %v2536_v48, 0.0 }
 0x4e9   :  { %v2778_v47 = vmax.f32 %v2777_v18, %v2710_v39 }
 0x4ea   :  { %v2540_v34 = vpop.f32.mrb[176].mxu0 }
 0x4eb   :  { %v2541_v4 = vadd.f32 %v2540_v34, %v5478_v8  ;;  %v2542_v35 = vpop.f32.mrb[177].mxu0 }
 0x4ec   :  { %v2543_v36 = vpop.f32.mrb[178].mxu0 }
 0x4ed   :  { %v2711_v37 = vmax.f32 %v2541_v4, 0.0  ;;  %v2544_v40 = vadd.f32 %v2543_v36, %v5478_v8  ;;  %v2545_v41 = vpop.f32.mrb[179].mxu0 }
 0x4ef   :  { %v2779_v43 = vmax.f32 %v2778_v47, %v2711_v37  ;;  %v2712_v44 = vmax.f32 %v2544_v40, 0.0 }
 0x4f1   :  { %v2780_v45 = vmax.f32 %v2779_v43, %v2712_v44 }
 0x4f2   :  { %v2548_v51 = vpop.f32.mrb[180].mxu0 }
 0x4f3   :  { %v2549_v53 = vadd.f32 %v2548_v51, %v5478_v8  ;;  %v2550_v54 = vpop.f32.mrb[181].mxu0 }
 0x4f4   :  { %v2551_v55 = vpop.f32.mrb[182].mxu0 }
 0x4f5   :  { %v2713_v0 = vmax.f32 %v2549_v53, 0.0  ;;  %v2552_v56 = vadd.f32 %v2551_v55, %v5478_v8  ;;  %v2553_v57 = vpop.f32.mrb[183].mxu0 }
 0x4f7   :  { %v2781_v46 = vmax.f32 %v2780_v45, %v2713_v0  ;;  %v2714_v59 = vmax.f32 %v2552_v56, 0.0 }
 0x4f9   :  { %v2782_v60 = vmax.f32 %v2781_v46, %v2714_v59 }
 0x4fa   :  { %v2556_v50 = vpop.f32.mrb[184].mxu0 }
 0x4fb   :  { %v2783_v62 = vrot.slane %v2782_v60, 4  ;;  %v2557_v32 = vadd.f32 %v2556_v50, %v5478_v8  ;;  %v2558_v42 = vpop.f32.mrb[185].mxu0 }
 0x4fc   :  { %v2559_v3 = vpop.f32.mrb[186].mxu0 }
 0x4fd   :  { %v2784_v5 = vmax.f32 %v2782_v60, %v2783_v62  ;;  %v2560_v9 = vadd.f32 %v2559_v3, %v5478_v8  ;;  %v2561_v63 = vpop.f32.mrb[187].mxu0  ;;  %v2715_v12 = vmax.f32 %v2557_v32, 0.0 }
 0x4ff   :  { %v2785_v11 = vrot.slane %v2784_v5, 2  ;;  %v2716_v13 = vmax.f32 %v2560_v9, 0.0 }
 0x501   :  { %v2786_v14 = vmax.f32 %v2784_v5, %v2785_v11  ;;  %v2789_v15 = vmax.f32 %v2715_v12, %v2716_v13 }
 0x502   :  { %v2564_v6 = vpop.f32.mrb[188].mxu0 }
 0x503   :  { %v2787_v19 = vrot.slane %v2786_v14, 1  ;;  %v2565_v22 = vadd.f32 %v2564_v6, %v5478_v8  ;;  %v2566_v49 = vpop.f32.mrb[189].mxu0 }
 0x504   :  { %v2567_v21 = vpop.f32.mrb[190].mxu0 }
 0x505   :  { %v2717_v30 = vmax.f32 %v2565_v22, 0.0  ;;  %v2568_v1 = vadd.f32 %v2567_v21, %v5478_v8  ;;  %v2569_v2 = vpop.f32.mrb[191].mxu0  ;;  %v5538_v38 = vmax.f32 %v2786_v14, %v2787_v19 }
 0x507   :  { %v2790_v20 = vmax.f32 %v2789_v15, %v2717_v30  ;;  %v2718_v26 = vmax.f32 %v2568_v1, 0.0  ;;  %v3674_v28 = vmul.f32 %v5538_v38, %v5538_v38 }
 0x509   :  { %v2791_v25 = vmax.f32 %v2790_v20, %v2718_v26  ;;  %v3677_v48 = vsel %vm2866_vm4, %v3674_v28, %v3673_v27 }
 0x50a   :  { %v2572_v29 = vpop.f32.mrb[192].mxu0  ;;  %v3679_v18 = vsel %vm255_vm1, %v3677_v48, 0.0 }
 0x50b   :  { %v2573_v39 = vadd.f32 %v2572_v29, %v5478_v8  ;;  %v2574_v47 = vpop.f32.mrb[193].mxu0  ;;  %3680 = vadd.xlane.f32.xlu0 %v3679_v18 }
 0x50c   :  { %v2575_v34 = vpop.f32.mrb[194].mxu0 }
 0x50d   :  { %v2719_v4 = vmax.f32 %v2573_v39, 0.0  ;;  %v2576_v35 = vadd.f32 %v2575_v34, %v5478_v8  ;;  %v2577_v36 = vpop.f32.mrb[195].mxu0 }
 0x50f   :  { %v2792_v37 = vmax.f32 %v2791_v25, %v2719_v4  ;;  %v2720_v40 = vmax.f32 %v2576_v35, 0.0 }
 0x511   :  { %v2793_v41 = vmax.f32 %v2792_v37, %v2720_v40 }
 0x512   :  { %v2580_v24 = vpop.f32.mrb[196].mxu0 }
 0x513   :  { %v2581_v43 = vadd.f32 %v2580_v24, %v5478_v8  ;;  %v2582_v44 = vpop.f32.mrb[197].mxu0 }
 0x514   :  { %v2583_v45 = vpop.f32.mrb[198].mxu0 }
 0x515   :  { %v2721_v7 = vmax.f32 %v2581_v43, 0.0  ;;  %v2584_v33 = vadd.f32 %v2583_v45, %v5478_v8  ;;  %v2585_v51 = vpop.f32.mrb[199].mxu0 }
 0x517   :  { %v2794_v52 = vmax.f32 %v2793_v41, %v2721_v7  ;;  %v2722_v53 = vmax.f32 %v2584_v33, 0.0 }
 0x519   :  { %v2795_v54 = vmax.f32 %v2794_v52, %v2722_v53 }
 0x51a   :  { %v2588_v55 = vpop.f32.mrb[200].mxu0 }
 0x51b   :  { %v2589_v0 = vadd.f32 %v2588_v55, %v5478_v8  ;;  %v2590_v56 = vpop.f32.mrb[201].mxu0 }
 0x51c   :  { %v2591_v57 = vpop.f32.mrb[202].mxu0 }
 0x51d   :  { %v2723_v58 = vmax.f32 %v2589_v0, 0.0  ;;  %v2592_v46 = vadd.f32 %v2591_v57, %v5478_v8  ;;  %v2593_v59 = vpop.f32.mrb[203].mxu0 }
 0x51f   :  { %v2796_v60 = vmax.f32 %v2795_v54, %v2723_v58  ;;  %v2724_v50 = vmax.f32 %v2592_v46, 0.0 }
 0x521   :  { %v2797_v61 = vmax.f32 %v2796_v60, %v2724_v50 }
 0x522   :  { %v2596_v62 = vpop.f32.mrb[204].mxu0 }
 0x523   :  { %v2597_v32 = vadd.f32 %v2596_v62, %v5478_v8  ;;  %v2598_v42 = vpop.f32.mrb[205].mxu0 }
 0x524   :  { %v2599_v3 = vpop.f32.mrb[206].mxu0 }
 0x525   :  { %v2725_v5 = vmax.f32 %v2597_v32, 0.0  ;;  %v2600_v9 = vadd.f32 %v2599_v3, %v5478_v8  ;;  %v2601_v63 = vpop.f32.mrb[207].mxu0 }
 0x527   :  { %v2798_v10 = vmax.f32 %v2797_v61, %v2725_v5  ;;  %v2726_v11 = vmax.f32 %v2600_v9, 0.0 }
 0x529   :  { %v2799_v12 = vmax.f32 %v2798_v10, %v2726_v11 }
 0x52a   :  { %v2604_v13 = vpop.f32.mrb[208].mxu0 }
 0x52b   :  { %v2605_v14 = vadd.f32 %v2604_v13, %v5478_v8  ;;  %v2606_v15 = vpop.f32.mrb[209].mxu0 }
 0x52c   :  { %v2607_v6 = vpop.f32.mrb[210].mxu0 }
 0x52d   :  { %v2727_v19 = vmax.f32 %v2605_v14, 0.0  ;;  %v2608_v22 = vadd.f32 %v2607_v6, %v5478_v8  ;;  %v2609_v49 = vpop.f32.mrb[211].mxu0 }
 0x52f   :  { %v2800_v21 = vmax.f32 %v2799_v12, %v2727_v19  ;;  %v2728_v30 = vmax.f32 %v2608_v22, 0.0 }
 0x531   :  { %v2801_v1 = vmax.f32 %v2800_v21, %v2728_v30 }
 0x532   :  { %v2612_v2 = vpop.f32.mrb[212].mxu0 }
 0x533   :  { %v2613_v20 = vadd.f32 %v2612_v2, %v5478_v8  ;;  %v2614_v26 = vpop.f32.mrb[213].mxu0 }
 0x534   :  { %v2615_v27 = vpop.f32.mrb[214].mxu0 }
 0x535   :  { %v2729_v28 = vmax.f32 %v2613_v20, 0.0  ;;  %v2616_v25 = vadd.f32 %v2615_v27, %v5478_v8  ;;  %v2617_v48 = vpop.f32.mrb[215].mxu0 }
 0x537   :  { %v2802_v29 = vmax.f32 %v2801_v1, %v2729_v28  ;;  %v2730_v18 = vmax.f32 %v2616_v25, 0.0 }
 0x539   :  { %v5558_v39 = vmax.f32 %v2802_v29, %v2730_v18 }
 0x53a   :  { %v2620_v47 = vpop.f32.mrb[216].mxu0 }
 0x53b   :  { %v2621_v34 = vadd.f32 %v2620_v47, %v5478_v8  ;;  %v2622_v4 = vpop.f32.mrb[217].mxu0 }
 0x53c   :  { %v2623_v35 = vpop.f32.mrb[218].mxu0 }
 0x53d   :  { %v2624_v36 = vadd.f32 %v2623_v35, %v5478_v8  ;;  %v2625_v37 = vpop.f32.mrb[219].mxu0  ;;  %v2731_v40 = vmax.f32 %v2621_v34, 0.0 }
 0x53f   :  { %v2732_v41 = vmax.f32 %v2624_v36, 0.0 }
 0x541   :  { %v2810_v24 = vmax.f32 %v2731_v40, %v2732_v41  ;;  %v2804_v40 = vrot.slane %v5558_v39, 4 }
 0x542   :  { %v2628_v43 = vpop.f32.mrb[220].mxu0 }
 0x543   :  { %v2629_v44 = vadd.f32 %v2628_v43, %v5478_v8  ;;  %v2630_v45 = vpop.f32.mrb[221].mxu0 }
 0x544   :  { %v2631_v7 = vpop.f32.mrb[222].mxu0 }
 0x545   :  { %v2733_v33 = vmax.f32 %v2629_v44, 0.0  ;;  %v2632_v51 = vadd.f32 %v2631_v7, %v5478_v8  ;;  %v2633_v52 = vpop.f32.mrb[223].mxu0  ;;  %v2805_v7 = vmax.f32 %v5558_v39, %v2804_v40  ;;  %v4417_v40 = vld [vmem:[%s5715_s5 + $0xac] ss:$12 sps:$4 sm:$0xff]  }
 0x547   :  { %v2811_v53 = vmax.f32 %v2810_v24, %v2733_v33  ;;  %v2734_v54 = vmax.f32 %v2632_v51, 0.0 }
 0x549   :  { %v2812_v55 = vmax.f32 %v2811_v53, %v2734_v54 }
 0x54a   :  { %v2636_v0 = vpop.f32.mrb[224].mxu0 }
 0x54b   :  { %v2637_v56 = vadd.f32 %v2636_v0, %v5478_v8  ;;  %v2638_v57 = vpop.f32.mrb[225].mxu0 }
 0x54c   :  { %v2639_v58 = vpop.f32.mrb[226].mxu0 }
 0x54d   :  { %v2735_v46 = vmax.f32 %v2637_v56, 0.0  ;;  %v2640_v59 = vadd.f32 %v2639_v58, %v5478_v8  ;;  %v2641_v60 = vpop.f32.mrb[227].mxu0 }
 0x54f   :  { %v2813_v50 = vmax.f32 %v2812_v55, %v2735_v46  ;;  %v2736_v61 = vmax.f32 %v2640_v59, 0.0  ;;  %v2806_v55 = vrot.slane %v2805_v7, 2 }
 0x551   :  { %v2814_v62 = vmax.f32 %v2813_v50, %v2736_v61  ;;  %v2807_v59 = vmax.f32 %v2805_v7, %v2806_v55  ;;  %v4426_v7 = vld [vmem:[%s5715_s5 + $0xf4] ss:$12 sps:$4 sm:$0xff]   ;;  %v4438_v55 = vld [vmem:[%s5715_s5 + $0x13c] ss:$12 sps:$4 sm:$0xff]  }
 0x552   :  { %v2644_v32 = vpop.f32.mrb[228].mxu0 }
 0x553   :  { %v2645_v42 = vadd.f32 %v2644_v32, %v5478_v8  ;;  %v2646_v3 = vpop.f32.mrb[229].mxu0  ;;  %v2808_v61 = vrot.slane %v2807_v59, 1 }
 0x554   :  { %v2647_v5 = vpop.f32.mrb[230].mxu0 }
 0x555   :  { %v2737_v9 = vmax.f32 %v2645_v42, 0.0  ;;  %v2648_v63 = vadd.f32 %v2647_v5, %v5478_v8  ;;  %v2649_v10 = vpop.f32.mrb[231].mxu0  ;;  %v2809_v39 = vmax.f32 %v2807_v59, %v2808_v61  ;;  %v4446_v59 = vld [vmem:[#allocation5 + $0x34] ss:$12 sps:$4 sm:$0xff]   ;;  %v4455_v61 = vld [vmem:[#allocation5 + $0x64] ss:$12 sps:$4 sm:$0xff]  }
 0x557   :  { %v2815_v11 = vmax.f32 %v2814_v62, %v2737_v9  ;;  %v2738_v12 = vmax.f32 %v2648_v63, 0.0  ;;  %v2847_v5 = vpack.c.bf16 %v2809_v39, %v2809_v39  ;;  %v3690_v63 = vmul.f32 %v2809_v39, %v2809_v39 }
 0x559   :  { %v2816_v13 = vmax.f32 %v2815_v11, %v2738_v12  ;;  %v3664_v12 = vmul.f32 %v2809_v39, %v5535_v23  ;;  %v4395_v23 = vld [vmem:[%s5715_s5 + $0x8] ss:$12 sps:$4 sm:$0xff]   ;;  %v4456_v39 = vld [vmem:[#allocation5 + $0x78] ss:$12 sps:$4 sm:$0xff]  }
 0x55a   :  { %v2652_v14 = vpop.f32.mrb[232].mxu0  ;;  %3200 = vmatprep.subr.bf16.mxu1 %v4395_v23  ;;  %v4480_v23 = vld [vmem:[#allocation5 + $0x138] ss:$12 sps:$4 sm:$0xff]  }
 0x55b   :  { %v2653_v15 = vadd.f32 %v2652_v14, %v5478_v8  ;;  %v2654_v6 = vpop.f32.mrb[233].mxu0 }
 0x55c   :  { %v2655_v19 = vpop.f32.mrb[234].mxu0 }
 0x55d   :  { %v2739_v22 = vmax.f32 %v2653_v15, 0.0  ;;  %v2656_v49 = vadd.f32 %v2655_v19, %v5478_v8  ;;  %v2657_v21 = vpop.f32.mrb[235].mxu0 }
 0x55f   :  { %v2817_v30 = vmax.f32 %v2816_v13, %v2739_v22  ;;  %v2740_v1 = vmax.f32 %v2656_v49, 0.0  ;;  %v2864_v13 = vunpack.c.l.b16 %v2847_v5  ;;  %v4459_v5 = vld [vmem:[#allocation5 + $0x90] ss:$12 sps:$4 sm:$0xff]  }
 0x561   :  { %v2818_v2 = vmax.f32 %v2817_v30, %v2740_v1  ;;  %v4398_v30 = vld [vmem:[%s5715_s5 + $0x20] ss:$12 sps:$4 sm:$0xff]   ;;  %v4396_v1 = vld [vmem:[%s5715_s5 + $0x1c] ss:$12 sps:$4 sm:$0xff]  }
 0x562   :  { %v2660_v20 = vpop.f32.mrb[236].mxu0 }
 0x563   :  { %v2661_v26 = vadd.f32 %v2660_v20, %v5478_v8  ;;  %v2662_v27 = vpop.f32.mrb[237].mxu0  ;;  %v4399_v20 = vld [vmem:[%s5715_s5 + $0x34] ss:$12 sps:$4 sm:$0xff]  }
 0x564   :  { %v2663_v28 = vpop.f32.mrb[238].mxu0  ;;  %v4402_v27 = vld [vmem:[%s5715_s5 + $0x4c] ss:$12 sps:$4 sm:$0xff]  }
 0x565   :  { %v2741_v25 = vmax.f32 %v2661_v26, 0.0  ;;  %v2664_v48 = vadd.f32 %v2663_v28, %v5478_v8  ;;  %v2665_v29 = vpop.f32.mrb[239].mxu0  ;;  %v4404_v26 = vld [vmem:[%s5715_s5 + $0x50] ss:$12 sps:$4 sm:$0xff]  }
 0x566   :  { %v4405_v28 = vld [vmem:[%s5715_s5 + $0x64] ss:$12 sps:$4 sm:$0xff]   ;;  %v4414_v29 = vld [vmem:[#allocation5] ss:$12 sps:$4 sm:$0xff]  }
 0x567   :  { %v2819_v18 = vmax.f32 %v2818_v2, %v2741_v25  ;;  %v2742_v47 = vmax.f32 %v2664_v48, 0.0  ;;  %v4401_v2 = vld [vmem:[%s5715_s5 + $0x38] ss:$12 sps:$4 sm:$0xff]   ;;  %v4407_v25 = vld [vmem:[%s5715_s5 + $0x68] ss:$12 sps:$4 sm:$0xff]  }
 0x568   :  { %v4410_v48 = vld [vmem:[%s5715_s5 + $0x80] ss:$12 sps:$4 sm:$0xff]  }
 0x569   :  { %v2820_v34 = vmax.f32 %v2819_v18, %v2742_v47  ;;  %v4416_v18 = vld [vmem:[#allocation5 + $0x4] ss:$12 sps:$4 sm:$0xff]   ;;  %v4408_v47 = vld [vmem:[%s5715_s5 + $0x7c] ss:$12 sps:$4 sm:$0xff]  }
 0x56a   :  { %v2668_v4 = vpop.f32.mrb[240].mxu0  ;;  %3583 = vmatprep.subr.bf16.mxu0 %v4416_v18 }
 0x56b   :  { %v2669_v35 = vadd.f32 %v2668_v4, %v5478_v8  ;;  %v2670_v36 = vpop.f32.mrb[241].mxu0  ;;  %3584 = vmatpush1.bf16.msra.mxu0 %v4414_v29  ;;  %v4429_v4 = vld [vmem:[#allocation5 + $0x18] ss:$12 sps:$4 sm:$0xff]  }
 0x56c   :  { %v2671_v37 = vpop.f32.mrb[242].mxu0  ;;  %v4411_v36 = vld [vmem:[%s5715_s5 + $0x94] ss:$12 sps:$4 sm:$0xff]  }
 0x56d   :  { %v2743_v41 = vmax.f32 %v2669_v35, 0.0  ;;  %v2672_v24 = vadd.f32 %v2671_v37, %v5478_v8  ;;  %v2673_v43 = vpop.f32.mrb[243].mxu0  ;;  %v4431_v35 = vld [vmem:[#allocation5 + $0x1c] ss:$12 sps:$4 sm:$0xff]  }
 0x56e   :  { %3585 = vmatprep.subr.bf16.mxu0 %v4431_v35  ;;  %v4419_v37 = vld [vmem:[%s5715_s5 + $0xb0] ss:$12 sps:$4 sm:$0xff]   ;;  %v4425_v43 = vld [vmem:[%s5715_s5 + $0xe0] ss:$12 sps:$4 sm:$0xff]  }
 0x56f   :  { %v2821_v44 = vmax.f32 %v2820_v34, %v2743_v41  ;;  %v2744_v45 = vmax.f32 %v2672_v24, 0.0  ;;  %v4413_v34 = vld [vmem:[%s5715_s5 + $0x98] ss:$12 sps:$4 sm:$0xff]   ;;  %3586 = vmatpush1.bf16.msra.mxu0 %v4429_v4  ;;  %v4422_v41 = vld [vmem:[%s5715_s5 + $0xc8] ss:$12 sps:$4 sm:$0xff]  }
 0x570   :  { %v4420_v24 = vld [vmem:[%s5715_s5 + $0xc4] ss:$12 sps:$4 sm:$0xff]   ;;  %3587 = vmatprep.subr.bf16.mxu0 %v4446_v59  ;;  %v4489_v59 = vld [vmem:[#allocation5 + $0x20] ss:$12 sps:$4 sm:$0xff]  }
 0x571   :  { %v2822_v33 = vmax.f32 %v2821_v44, %v2744_v45  ;;  %v4423_v44 = vld [vmem:[%s5715_s5 + $0xdc] ss:$12 sps:$4 sm:$0xff]   ;;  %v4428_v45 = vld [vmem:[%s5715_s5 + $0xf8] ss:$12 sps:$4 sm:$0xff]  }
 0x572   :  { %v2676_v51 = vpop.f32.mrb[244].mxu0 }
 0x573   :  { %v2677_v52 = vadd.f32 %v2676_v51, %v5478_v8  ;;  %v2678_v53 = vpop.f32.mrb[245].mxu0  ;;  %v4432_v51 = vld [vmem:[%s5715_s5 + $0x10c] ss:$12 sps:$4 sm:$0xff]  }
 0x574   :  { %v2679_v54 = vpop.f32.mrb[246].mxu0  ;;  %v4435_v53 = vld [vmem:[%s5715_s5 + $0x124] ss:$12 sps:$4 sm:$0xff]  }
 0x575   :  { %v2745_v0 = vmax.f32 %v2677_v52, 0.0  ;;  %v2680_v56 = vadd.f32 %v2679_v54, %v5478_v8  ;;  %v2681_v57 = vpop.f32.mrb[247].mxu0  ;;  %v4437_v52 = vld [vmem:[%s5715_s5 + $0x128] ss:$12 sps:$4 sm:$0xff]   ;;  %v4440_v54 = vld [vmem:[%s5715_s5 + $0x140] ss:$12 sps:$4 sm:$0xff]  }
 0x576   :  { %v4449_v57 = vld [vmem:[%s5715_s5 + $0x170] ss:$12 sps:$4 sm:$0xff]  }
 0x577   :  { %v2823_v58 = vmax.f32 %v2822_v33, %v2745_v0  ;;  %v2746_v46 = vmax.f32 %v2680_v56, 0.0  ;;  %v4434_v33 = vld [vmem:[%s5715_s5 + $0x110] ss:$12 sps:$4 sm:$0xff]   ;;  %v4443_v0 = vld [vmem:[%s5715_s5 + $0x158] ss:$12 sps:$4 sm:$0xff]  }
 0x578   :  { %v4441_v56 = vld [vmem:[%s5715_s5 + $0x154] ss:$12 sps:$4 sm:$0xff]  }
 0x579   :  { %v2824_v60 = vmax.f32 %v2823_v58, %v2746_v46  ;;  %v4447_v58 = vld [vmem:[%s5715_s5 + $0x16c] ss:$12 sps:$4 sm:$0xff]   ;;  %v4444_v46 = vld [vmem:[#allocation5 + $0x30] ss:$12 sps:$4 sm:$0xff]  }
 0x57a   :  { %3588 = vmatpush1.bf16.msra.mxu0 %v4444_v46  ;;  %v4488_v46 = vld [vmem:[#allocation5 + $0xe0] ss:$12 sps:$4 sm:$0xff]  }
 0x57b   :  { %v2825_v50 = vrot.slane %v2824_v60, 4 }
 0x57d   :  { %v2826_v62 = vmax.f32 %v2824_v60, %v2825_v50  ;;  %v4450_v60 = vld [vmem:[#allocation5 + $0x48] ss:$12 sps:$4 sm:$0xff]   ;;  %v4452_v50 = vld [vmem:[#allocation5 + $0x4c] ss:$12 sps:$4 sm:$0xff]  }
 0x57e   :  { %3589 = vmatprep.subr.bf16.mxu0 %v4452_v50  ;;  %v4491_v50 = vld [vmem:[#allocation5 + $0x38] ss:$12 sps:$4 sm:$0xff]  }
 0x57f   :  { %v2827_v32 = vrot.slane %v2826_v62, 2  ;;  %3590 = vmatpush1.bf16.msra.mxu0 %v4450_v60  ;;  %v4490_v60 = vld [vmem:[#allocation5 + $0xf8] ss:$12 sps:$4 sm:$0xff]  }
 0x580   :  { %3591 = vmatprep.subr.bf16.mxu0 %v4455_v61  ;;  %v4492_v61 = vld [vmem:[#allocation5 + $0x110] ss:$12 sps:$4 sm:$0xff]  }
 0x581   :  { %v2828_v42 = vmax.f32 %v2826_v62, %v2827_v32  ;;  %v4453_v62 = vld [vmem:[#allocation5 + $0x60] ss:$12 sps:$4 sm:$0xff]   ;;  %v4458_v32 = vld [vmem:[#allocation5 + $0x7c] ss:$12 sps:$4 sm:$0xff]  }
 0x583   :  { %v2829_v3 = vrot.slane %v2828_v42, 1  ;;  %3592 = vmatpush1.bf16.msra.mxu0 %v4453_v62  ;;  %v4493_v62 = vld [vmem:[#allocation5 + $0x50] ss:$12 sps:$4 sm:$0xff]  }
 0x584   :  { %3593 = vmatprep.subr.bf16.mxu0 %v4458_v32  ;;  %v4497_v32 = vld [vmem:[#allocation5 + $0x128] ss:$12 sps:$4 sm:$0xff]  }
 0x585   :  { %v2830_v9 = vmax.f32 %v2828_v42, %v2829_v3  ;;  %v4486_v42 = vld [vmem:[#allocation5 + $0xc8] ss:$12 sps:$4 sm:$0xff]  }
 0x586   :  { %v4461_v3 = vld [vmem:[#allocation5 + $0x94] ss:$12 sps:$4 sm:$0xff]  }
 0x587   :  { %v2848_v10 = vpack.c.bf16 %v2830_v9, %v2830_v9  ;;  %v3691_v11 = vmul.f32 %v2830_v9, %v2830_v9  ;;  %v3665_v8 = vmul.f32 %v2830_v9, %v5538_v38  ;;  %v4393_v38 = vld [vmem:[%s5715_s5 + $0x4] ss:$12 sps:$4 sm:$0xff]   ;;  %3594 = vmatpush1.bf16.msra.mxu0 %v4456_v39  ;;  %v4464_v9 = vld [vmem:[#allocation5 + $0xac] ss:$12 sps:$4 sm:$0xff]   ;;  %v4498_v39 = vld [vmem:[#allocation5 + $0x68] ss:$12 sps:$4 sm:$0xff]  }
 0x588   :  { %3595 = vmatprep.subr.bf16.mxu0 %v4461_v3  ;;  %v4500_v3 = vld [vmem:[#allocation5 + $0x80] ss:$12 sps:$4 sm:$0xff]  }
 0x589   :  { %v2865_v14 = vunpack.c.l.b16 %v2848_v10  ;;  %v3694_v15 = vsel %vm2866_vm4, %v3691_v11, %v3690_v63  ;;  %v3668_v6 = vsel %vm2866_vm4, %v3665_v8, %v3664_v12  ;;  %v4462_v63 = vld [vmem:[#allocation5 + $0xa8] ss:$12 sps:$4 sm:$0xff]   ;;  %v4467_v10 = vld [vmem:[#allocation5 + $0xc4] ss:$12 sps:$4 sm:$0xff]   ;;  %v4465_v11 = vld [vmem:[#allocation5 + $0xc0] ss:$12 sps:$4 sm:$0xff]  }
 0x58a   :  { %v3696_v19 = vsel %vm255_vm1, %v3694_v15, 0.0  ;;  %v3670_v22 = vsel %vm255_vm1, %v3668_v6, 0.0  ;;  %v4470_v12 = vld [vmem:[#allocation5 + $0xdc] ss:$12 sps:$4 sm:$0xff]   ;;  %v4468_v8 = vld [vmem:[#allocation5 + $0xd8] ss:$12 sps:$4 sm:$0xff]  }
 0x58b   :  { %3697 = vadd.xlane.f32.xlu0 %v3696_v19  ;;  %3671 = vadd.xlane.f32.xlu1 %v3670_v22  ;;  %v2867_v49 = vsel %vm2866_vm4, %v2865_v14, %v2864_v13  ;;  %v4473_v13 = vld [vmem:[#allocation5 + $0xf4] ss:$12 sps:$4 sm:$0xff]   ;;  %v4471_v14 = vld [vmem:[#allocation5 + $0xf0] ss:$12 sps:$4 sm:$0xff]   ;;  %v4476_v15 = vld [vmem:[#allocation5 + $0x10c] ss:$12 sps:$4 sm:$0xff]  }
 0x58c   :  { %v2868_v21 = vpack.c.b16 %v2867_v49, %v2867_v49  ;;  %3596 = vmatpush1.bf16.msra.mxu0 %v4459_v5  ;;  %v4474_v6 = vld [vmem:[#allocation5 + $0x108] ss:$12 sps:$4 sm:$0xff]   ;;  %v4479_v19 = vld [vmem:[#allocation5 + $0x124] ss:$12 sps:$4 sm:$0xff]   ;;  %v4477_v49 = vld [vmem:[#allocation5 + $0x120] ss:$12 sps:$4 sm:$0xff]  }
 0x58d   :  { %3597 = vmatprep.subr.bf16.mxu0 %v4464_v9  ;;  %v4501_v5 = vld [vmem:[#allocation5 + $0x158] ss:$12 sps:$4 sm:$0xff]  }
 0x58e   :  { %2983 = vmatmul.mubr.bf16.vlgmr.msra.gmra.mrb[200].mxu1 %v2868_v21  ;;  %v4482_v21 = vld [vmem:[#allocation5 + $0x13c] ss:$12 sps:$4 sm:$0xff]   ;;  %v4502_v9 = vld [vmem:[#allocation5 + $0x98] ss:$12 sps:$4 sm:$0xff]  }
 0x58f   :  { %3201 = vmatpush1.bf16.msra.mxu1 %v4393_v38  ;;  %v4485_v38 = vld [vmem:[#allocation5 + $0x154] ss:$12 sps:$4 sm:$0xff]  }
 0x590   :  { %3202 = vmatprep.subr.bf16.mxu1 %v4398_v30  ;;  %3598 = vmatpush1.bf16.msra.mxu0 %v4462_v63  ;;  %v4483_v30 = vld [vmem:[#allocation5 + $0x150] ss:$12 sps:$4 sm:$0xff]  }
 0x591   :  { %3599 = vmatprep.subr.bf16.mxu0 %v4467_v10  ;;  %v4503_v63 = vld [vmem:[#allocation5 + $0x170] ss:$12 sps:$4 sm:$0xff]  }
 0x592   :  { %v4504_v10 = vld [vmem:[#allocation5 + $0xb0] ss:$12 sps:$4 sm:$0xff]  }
 0x593   :  { %3203 = vmatpush1.bf16.msra.mxu1 %v4396_v1  ;;  %v4496_v1 = vld [vmem:[#allocation5 + $0x16c] ss:$12 sps:$4 sm:$0xff]  }
 0x594   :  { %3204 = vmatprep.subr.bf16.mxu1 %v4401_v2  ;;  %3600 = vmatpush1.bf16.msra.mxu0 %v4465_v11  ;;  %v3874_v11 = vld [vmem:[%s5717_s7 + $0x6] ss:$8 sm:$0x3] }
 0x595   :  { %3601 = vmatprep.subr.bf16.mxu0 %v4470_v12  ;;  %v3033_v12 = vrot.slane %v3874_v11, %v5338_v17 }
 0x597   :  { %3205 = vmatpush1.bf16.msra.mxu1 %v4399_v20  ;;  %v4494_v20 = vld [vmem:[#allocation5 + $0x168] ss:$12 sps:$4 sm:$0xff]  }
 0x598   :  { %3206 = vmatprep.subr.bf16.mxu1 %v4404_v26  ;;  %3602 = vmatpush1.bf16.msra.mxu0 %v4468_v8  ;;  %v3681_v22 = vpop.xlane.xlu0 %3680  ;;  %v3037_v8 = vrot.slane %v3874_v11, %v5344_v31 }
 0x599   :  { %3603 = vmatprep.subr.bf16.mxu0 %v4473_v13  ;;  %4505 = vrsqrt.f32 %v3681_v22  ;;  %vm3684_vm5 = vcmp.eq.f32.partialorder %v3681_v22, inf  ;;  %vm3686_vm6 = vcmp.eq.f32.partialorder %v3681_v22, 0.0 }
 0x59b   :  { %3207 = vmatpush1.bf16.msra.mxu1 %v4402_v27 }
 0x59c   :  { %3208 = vmatprep.subr.bf16.mxu1 %v4407_v25  ;;  %3604 = vmatpush1.bf16.msra.mxu0 %v4471_v14 }
 0x59d   :  { %3605 = vmatprep.subr.bf16.mxu0 %v4476_v15 }
 0x59f   :  { %3209 = vmatpush1.bf16.msra.mxu1 %v4405_v28 }
 0x5a0   :  { %3210 = vmatprep.subr.bf16.mxu1 %v4410_v48  ;;  %3606 = vmatpush1.bf16.msra.mxu0 %v4474_v6  ;;  %v3687_v48 = vand.u32 2147483648, %v3681_v22 }
 0x5a1   :  { %3607 = vmatprep.subr.bf16.mxu0 %v4479_v19 }
 0x5a3   :  { %3211 = vmatpush1.bf16.msra.mxu1 %v4408_v47  ;;  %v4506_v26 = vpop.eup %4505 }
 0x5a4   :  { %3212 = vmatprep.subr.bf16.mxu1 %v4413_v34  ;;  %3608 = vmatpush1.bf16.msra.mxu0 %v4477_v49  ;;  %v3683_v27 = vmul.f32 %v4506_v26, %v3681_v22 }
 0x5a5   :  { %3609 = vmatprep.subr.bf16.mxu0 %v4482_v21 }
 0x5a6   :  { %v3685_v28 = vsel %vm3684_vm5, %v3681_v22, %v3683_v27 }
 0x5a7   :  { %3213 = vmatpush1.bf16.msra.mxu1 %v4411_v36  ;;  %v3688_v18 = vsel %vm3686_vm6, %v3687_v48, %v3685_v28 }
 0x5a8   :  { %3214 = vmatprep.subr.bf16.mxu1 %v4419_v37  ;;  %3610 = vmatpush1.bf16.msra.mxu0 %v4480_v23  ;;  %v3689_v36 = vmax.f32 %v3688_v18, 1e-08 }
 0x5a9   :  { %3611 = vmatprep.subr.bf16.mxu0 %v4485_v38 }
 0x5ab   :  { %3215 = vmatpush1.bf16.msra.mxu1 %v4417_v40 }
 0x5ac   :  { %3216 = vmatprep.subr.bf16.mxu1 %v4422_v41  ;;  %3612 = vmatpush1.bf16.msra.mxu0 %v4483_v30  ;;  %v3907_v30 = vld [vmem:[%s5717_s7 + $0x7] ss:$8 sm:$0x7] }
 0x5ad   :  { %3613 = vmatprep.subr.bf16.mxu0 %v4496_v1  ;;  %v4591_v1 = vmov 1983009808   ;;  %v3315_v26 = vrot.slane %v3907_v30, %v5338_v17  ;;  %v3319_v27 = vrot.slane %v3907_v30, %v5344_v31 }
 0x5af   :  { %3217 = vmatpush1.bf16.msra.mxu1 %v4420_v24 }
 0x5b0   :  { %3218 = vmatprep.subr.bf16.mxu1 %v4425_v43  ;;  %3614 = vmatpush1.bf16.msra.mxu0 %v4494_v20  ;;  %v3857_v43 = vld [vmem:[%s5717_s7 + $0x5] ss:$8 sm:$0x3]  ;;  %v3322_v20 = vsub.s32 2, %v5334_v16  ;;  %s4592_s7 = smov [#allocation7]  }
 0x5b1   :  { %s3738_s11 = sshll.u32 %s4592_s7, 4  ;;  %s3739_s11 = int_to_ptr.vmem [resolvable:$true] %s3738_s11 }
 0x5b2   :  { %s4555_s12 = scalar_lea.vmem %s3739_s11, 128  ;;  %p4560_p3 = scmp.lt.s32.totalorder %s3739_s11, %s3739_s11 }
 0x5b3   :  { %3219 = vmatpush1.bf16.msra.mxu1 %v4423_v44  ;;  %v2855_v44 = vrot.slane %v3857_v43, %v5338_v17  ;;  %p4556_p2 = scmp.ne.s32.totalorder %s3739_s11, %s4555_s12  ;;  %p4561_p4 = scmp.lt.s32.totalorder %s4555_s12, %s4555_s12 }
 0x5b4   :  { %3220 = vmatprep.subr.bf16.mxu1 %v4428_v45  ;;  %v2859_v45 = vrot.slane %v3857_v43, %v5344_v31 }
 0x5b5   :  { %p4562_p5 = por %p4561_p4, %p4560_p3 }
 0x5b7   :  { %3221 = vmatpush1.bf16.msra.mxu1 %v4426_v7  ;;  %p4563_p6 = pnand %p4562_p5, %p4556_p2 }
 0x5b8   :  { %3222 = vmatprep.subr.bf16.mxu1 %v4434_v33 }
 0x5bb   :  { %3223 = vmatpush1.bf16.msra.mxu1 %v4432_v51 }
 0x5bc   :  { %3224 = vmatprep.subr.bf16.mxu1 %v4437_v52 }
 0x5bf   :  { %3225 = vmatpush1.bf16.msra.mxu1 %v4435_v53 }
 0x5c0   :  { %3226 = vmatprep.subr.bf16.mxu1 %v4440_v54 }
 0x5c3   :  { %3227 = vmatpush1.bf16.msra.mxu1 %v4438_v55 }
 0x5c4   :  { %3228 = vmatprep.subr.bf16.mxu1 %v4443_v0 }
 0x5c7   :  { %3229 = vmatpush1.bf16.msra.mxu1 %v4441_v56 }
 0x5c8   :  { %3230 = vmatprep.subr.bf16.mxu1 %v4449_v57  ;;  %v4487_v57 = vld [vmem:[#allocation5 + $0x8] ss:$12 sps:$4 sm:$0xff]  }
 0x5cb   :  { %3231 = vmatpush1.bf16.msra.mxu1 %v4447_v58 }
 0x5cc   :  { %4065 = vmatprep.subr.bf16.mxu1 %v4486_v42  ;;  %v4499_v42 = vld [vmem:[#allocation5 + $0x140] ss:$12 sps:$4 sm:$0xff]  }
 0x618   :  { %v3698_v2 = vpop.xlane.xlu0 %3697  ;;  %v3672_v41 = vpop.xlane.xlu1 %3671 }
 0x619   :  { %4507 = vrsqrt.f32 %v3698_v2  ;;  %vm3701_vm7 = vcmp.eq.f32.partialorder %v3698_v2, inf  ;;  %v3704_v47 = vand.u32 2147483648, %v3698_v2  ;;  %vm3703_vm8 = vcmp.eq.f32.partialorder %v3698_v2, 0.0 }
 0x623   :  { %v4508_v25 = vpop.eup %4507 }
 0x624   :  { %v3700_v29 = vmul.f32 %v4508_v25, %v3698_v2 }
 0x626   :  { %v3702_v34 = vsel %vm3701_vm7, %v3698_v2, %v3700_v29  ;;  %v3715_v2 = vunpack.c.l.s4 %v4591_v1  ;;  %v3323_v29 = vrot.slane %v3907_v30, %v3322_v20 }
 0x627   :  { %v3705_v4 = vsel %vm3703_vm8, %v3704_v47, %v3702_v34 }
 0x628   :  { %v3706_v35 = vmax.f32 %v3705_v4, 1e-08  ;;  %v3716_v28 = vunpack.c.0.s8 %v3715_v2 }
 0x62a   :  { %v3707_v37 = vmul.f32 %v3706_v35, %v3689_v36  ;;  %v3719_v35 = vsub.s32 %v3716_v28, %v5334_v16 }
 0x62c   :  { %4509 = vrcp.f32 %v3707_v37 }
 0x636   :  { %v4510_v40 = vpop.eup %4509 }
 0x637   :  { %v3709_v24 = vmul.f32 %v4510_v40, %v3672_v41 }
 0x639   :  { %3731 = vst [vmem:[#allocation7 + $0x6] sm:$0x3] %v3709_v24 }
 0x661   :  { %v2984_v7 = vpop.f32.mrb[200].mxu1 }
 0x662   :  { %v2985_v33 = vadd.f32 %v2984_v7, %v2855_v44  ;;  %v2986_v51 = vpop.f32.mrb[201].mxu1 }
 0x663   :  { %v2987_v52 = vadd.f32 %v2986_v51, %v2859_v45  ;;  %v2988_v53 = vpop.f32.mrb[202].mxu1 }
 0x664   :  { %v2991_v54 = vmax.f32 %v2985_v33, 0.0  ;;  %v2989_v55 = vpop.f32.mrb[203].mxu1 }
 0x665   :  { %v2992_v0 = vmax.f32 %v2987_v52, 0.0 }
 0x666   :  { %v3025_v58 = vpack.c.bf16 %v2991_v54, %v2991_v54 }
 0x667   :  { %v3026_v56 = vpack.c.bf16 %v2992_v0, %v2992_v0 }
 0x669   :  { %3232 = vmatprep.mubr.bf16.mxu1 %v3026_v56 }
 0x66a   :  { %3233 = vmatmul.mubr.bf16.vlgmr.msra.gmra.mrb[204].mxu1 %v3025_v58 }
 0x66b   :  { %4066 = vmatpush3.bf16.msra.mxu1 %v4487_v57 }
 0x66c   :  { %4067 = vmatprep.subr.bf16.mxu1 %v4488_v46 }
 0x66f   :  { %4068 = vmatpush3.bf16.msra.mxu1 %v4489_v59 }
 0x670   :  { %4069 = vmatprep.subr.bf16.mxu1 %v4490_v60 }
 0x673   :  { %4070 = vmatpush3.bf16.msra.mxu1 %v4491_v50 }
 0x674   :  { %4071 = vmatprep.subr.bf16.mxu1 %v4492_v61 }
 0x677   :  { %4072 = vmatpush3.bf16.msra.mxu1 %v4493_v62 }
 0x678   :  { %4073 = vmatprep.subr.bf16.mxu1 %v4497_v32 }
 0x67b   :  { %4074 = vmatpush3.bf16.msra.mxu1 %v4498_v39 }
 0x67c   :  { %4075 = vmatprep.subr.bf16.mxu1 %v4499_v42 }
 0x67f   :  { %4076 = vmatpush3.bf16.msra.mxu1 %v4500_v3 }
 0x680   :  { %4077 = vmatprep.subr.bf16.mxu1 %v4501_v5 }
 0x683   :  { %4078 = vmatpush3.bf16.msra.mxu1 %v4502_v9 }
 0x684   :  { %4079 = vmatprep.subr.bf16.mxu1 %v4503_v63 }
 0x687   :  { %4080 = vmatpush3.bf16.msra.mxu1 %v4504_v10 }
 0x73d   :  { %v3234_v13 = vpop.f32.mrb[204].mxu1 }
 0x73e   :  { %v3235_v14 = vadd.f32 %v3234_v13, %v3033_v12  ;;  %v3236_v15 = vpop.f32.mrb[205].mxu1 }
 0x73f   :  { %v3237_v6 = vadd.f32 %v3236_v15, %v3037_v8  ;;  %v3238_v19 = vpop.f32.mrb[206].mxu1 }
 0x740   :  { %v3241_v22 = vmax.f32 %v3235_v14, 0.0  ;;  %v3239_v49 = vpop.f32.mrb[207].mxu1 }
 0x741   :  { %v3242_v21 = vmax.f32 %v3237_v6, 0.0 }
 0x742   :  { %v3307_v38 = vpack.c.bf16 %v3241_v22, %v3241_v22 }
 0x743   :  { %v3308_v23 = vpack.c.bf16 %v3242_v21, %v3242_v21 }
 0x745   :  { %3615 = vmatprep.mubr.bf16.mxu0 %v3308_v23  ;;  %3656 = vmatprep.mubr.bf16.mxu1 %v3308_v23 }
 0x746   :  { %3616 = vmatmul.mubr.bf16.vlgmr.msra.gmra.mrb[248].mxu0 %v3307_v38  ;;  %3657 = vmatmul.mubr.bf16.vlgmr.msra.gmra.mrb[208].mxu1 %v3307_v38 }
 0x819   :  { %v3617_v25 = vpop.f32.mrb[248].mxu0  ;;  %v4081_v48 = vpop.f32.mrb[208].mxu1 }
 0x81a   :  { %v3618_v18 = vadd.f32 %v3617_v25, %v3315_v26  ;;  %v3619_v47 = vpop.f32.mrb[249].mxu0  ;;  %v4082_v34 = vpop.f32.mrb[209].mxu1 }
 0x81b   :  { %v3620_v4 = vadd.f32 %v3619_v47, %v3319_v27  ;;  %v4083_v36 = vadd.f32 %v4082_v34, %v4081_v48  ;;  %v3621_v37 = vpop.f32.mrb[250].mxu0  ;;  %v4084_v40 = vpop.f32.mrb[210].mxu1 }
 0x81c   :  { %v3622_v41 = vpop.f32.mrb[251].mxu0  ;;  %v4085_v24 = vpop.f32.mrb[211].mxu1 }
 0x81d   :  { %v3713_v43 = vcombine.low %v3618_v18, %v3620_v4  ;;  %v3659_v44 = vadd.f32 %v4083_v36, %v3323_v29 }
 0x81f   :  { %v3720_v17 = vrot.slane %v3713_v43, %v3719_v35  ;;  %v3727_v31 = vrot.slane %v3659_v44, %v3719_v35 }
 0x821   :  { %v3728_v45 = vcombine.low %v3720_v17, %v3727_v31 }
 0x823   :  { %3730 = vst [vmem:[#allocation7] sm:$0x3f] %v3728_v45 }
 0x824   :  { %4566 = shalt.err (!%p4563_p6)
}
 0x825   :  { %s4567_s14 = scalar_lea.hbm %s5718_s8, 128 }
 0x826   :  { %p4568_p7 = scmp.ne.s32.totalorder %s5718_s8, %s4567_s14  ;;  %p4571_p8 = scmp.lt.u32.totalorder %s4567_s14, %s5718_s8 }
 0x828   :  { %p4573_p9 = pnand %p4571_p8, %p4568_p7 }
 0x82a   :  { %4576 = shalt.err (!%p4573_p9)
}
 0x82b   :  { %3741 = dma.vmem_to_hbm [thread:$0]  %s3739_s11, 128, %s5718_s8, [#allocation4]  }
 0x82c   :  { %4581 = dma.done.wait [#allocation4], 128  }
 0x82d   :  { %4582 = vsyncadd [#allocation4], 4294967168 }
 0x82e   :  { %3745 = vsyncpa [#allocation3], 1 }
 0x82f   :  { %3746 = vsyncpa [#allocation6], 1 }
 0x830   :  { %3747 = vsyncpa [#allocation4], 1 }

</bundles_post_ra>
